<compile_context>
chip_gen: v7x
topology: tpu7x:2x2x1
jax: 0.10.0
libtpu: 0.0.40
codegen_flags: <defaults>
</compile_context>

<pallas_src>
import functools

import jax
import jax.numpy as jnp
from jax import lax
from jax.experimental import pallas as pl
from jax.experimental.pallas import tpu as pltpu

EPS = 1e-5
CP = 128  # lane-dense padded output-channel width


def _round_up(x, m):
    return (x + m - 1) // m * m


def _residual_block_kernel(x_ref, w1d_ref, w2_ref, prm_ref, out_ref, ypad_ref,
                           *, nb, ho, wo, cin, cp):
    m = nb * ho * wo
    wp = ypad_ref.shape[2]                       # sublane-padded scratch width

    prm = prm_ref[...]                           # (8, cp) f32
    t1, t2, td = prm[0:1, :], prm[1:2, :], prm[2:3, :]
    a1, a2 = prm[3:4, :], prm[4:5, :]

    # ---- conv1 (3x3 s2 p1) + 1x1 s2 downsample as ONE GEMM ------------------
    # Input is parity-packed: x_ref[n, i, j, (rp*2+cpar)*cin + c] is the padded
    # input pixel (2i+rp, 2j+cpar), so tap (kh, kw) of the stride-2 im2col is a
    # static contiguous slice (no strided gathers, 1x HBM read of the input).
    xv = x_ref[...].astype(jnp.float32)          # (nb, ho+1, wo+1, 4*cin)
    taps = []
    for kh in range(3):
        for kw in range(3):
            i0, rp = kh // 2, kh % 2
            j0, cpar = kw // 2, kw % 2
            c0 = (rp * 2 + cpar) * cin
            taps.append(xv[:, i0:i0 + ho, j0:j0 + wo, c0:c0 + cin])
    patches1 = jnp.concatenate(taps, axis=-1).reshape(m, 9 * cin)
    patches1 = patches1.astype(jnp.bfloat16)

    # BN scales are pre-folded into the weights; columns [:cp] are conv1,
    # [cp:] are the downsample branch (the centre tap), MXU N = 2*cp.
    z = jnp.dot(patches1, w1d_ref[...], preferred_element_type=jnp.float32)
    y1 = z[:, :cp] + t1
    y1 = jnp.where(y1 > 0, y1, a1 * y1)          # PReLU (block)
    d = z[:, cp:] + td                           # downsample branch (no act)

    # ---- write conv2 input into the bf16 halo scratch ------------------------
    # Column zero-padding folded into one full-width aligned row-slab store;
    # only the two 1-row borders are written separately (cheap, megacore-safe).
    y1_4d = y1.reshape(nb, ho, wo, cp)
    lpad = jnp.zeros((nb, ho, 1, cp), jnp.float32)
    rpad = jnp.zeros((nb, ho, wp - wo - 1, cp), jnp.float32)
    interior = jnp.concatenate([lpad, y1_4d, rpad], axis=2).astype(jnp.bfloat16)
    ypad_ref[:, 1:ho + 1, :, :] = interior
    zrow = jnp.zeros((nb, 1, wp, cp), jnp.bfloat16)
    ypad_ref[:, 0:1, :, :] = zrow
    ypad_ref[:, ho + 1:ho + 2, :, :] = zrow

    # ---- conv2 (3x3 s1 p1): 9 accumulated K=cp GEMMs over shifted views ------
    # Avoids materializing a (m, 9*cp) im2col slab in VMEM; scratch stays bf16.
    r2 = None
    for idx in range(9):
        kh, kw = idx // 3, idx % 3
        tap = ypad_ref[:, kh:kh + ho, kw:kw + wo, :].reshape(m, cp)
        part = jnp.dot(tap, w2_ref[idx * cp:(idx + 1) * cp, :],
                       preferred_element_type=jnp.float32)
        r2 = part if r2 is None else r2 + part

    # ---- residual add + final PReLU ------------------------------------------
    out = d + (r2 + t2)
    out_ref[...] = jnp.where(out > 0, out, a2 * out)


def _vmem_limit_bytes():
    """Scoped-VMEM limit: most of physical VMEM (128 MiB v5e/v6e, 64 MiB v7x)."""
    try:
        cap = int(pltpu.get_tpu_info().vmem_capacity_bytes)
    except Exception:  # query unavailable -> conservative default
        cap = 64 * 1024 * 1024
    return max(32 * 1024 * 1024, min(100 * 1024 * 1024, (cap * 3) // 4))


def _pick_batch_block(n, ho, wo, cin, cp, wp_pad, vmem_budget):
    """Batch-block NB: >=128 GEMM rows/step, prefer >=2 grid steps, fit VMEM."""
    rows_per_image = ho * wo

    def step_bytes(nb):
        rows = nb * rows_per_image
        return (
            2 * nb * (ho + 1) * (wo + 1) * 4 * cin * 2     # bf16 input block (x2 buf)
            + 2 * rows * cp * 4                            # f32 output block (x2 buf)
            + nb * (ho + 2) * wp_pad * cp * 2              # bf16 conv2 scratch
            + rows * (2 * cp + 3 * cp) * 4                 # z + y1/d/r2 f32 temps
            + rows * 9 * cin * 2                           # bf16 conv1 im2col temp
            + 2 * (9 * cin * 2 * cp + 9 * cp * cp) * 2     # bf16 weights (x2 buf)
        )

    divisors = [d for d in range(1, n + 1) if n % d == 0]

    def legal(nb):
        rows = nb * rows_per_image
        return step_bytes(nb) <= vmem_budget and (rows % 8 == 0 or nb == n)

    # 1) >=128 rows per step AND >=2 grid steps (megacore sharding / pipelining)
    for nb in divisors:
        if legal(nb) and nb * rows_per_image >= 128 and n // nb >= 2:
            return nb
    # 2) >=128 rows per step
    for nb in divisors:
        if legal(nb) and nb * rows_per_image >= 128:
            return nb
    # 3) largest block that fits
    for nb in reversed(divisors):
        if legal(nb):
            return nb
    # 4) smallest shape-legal block, else whole batch (block == full array dims)
    for nb in divisors:
        if (nb * rows_per_image) % 8 == 0:
            return nb
    return n


def residual_block_forward(x_nchw, params):
    """NCHW in -> NCHW out, matching the PyTorch module's forward (eval-mode BN)."""
    x = jnp.transpose(x_nchw, (0, 2, 3, 1)).astype(jnp.float32)   # NHWC
    N, H, W, Cin = x.shape
    Cout = params["w1"].shape[-1]
    assert H % 2 == 0 and W % 2 == 0, "even spatial dims expected (stride-2, pad-1)"
    Ho, Wo = H // 2, W // 2
    Cp = CP
    # TODO(synk): for Cout in (128, 256] pad channels to 256 (full v6e/v7x MXU N)
    # instead of the fixed 128-lane padding used here.
    assert Cout <= Cp, "Cout > 128 needs wider lane padding"

    # ---- fold BN (eval mode): scale into conv weights, keep additive shift ----
    def fold(gamma, beta, mean, var, bias):
        s = gamma / jnp.sqrt(var + EPS)
        t = beta + (bias - mean) * s
        return s, t

    s1, t1 = fold(params["g1"], params["be1"], params["m1"], params["v1"], params["b1"])
    s2, t2 = fold(params["g2"], params["be2"], params["m2"], params["v2"], params["b2"])
    sd, td = fold(params["gd"], params["bed"], params["md"], params["vd"], params["bd"])
    w1s = params["w1"] * s1                  # (3,3,Cin,Cout)
    w2s = params["w2"] * s2                  # (3,3,Cout,Cout)
    wds = params["wd"] * sd                  # (Cin,Cout)

    # ---- fused conv1 + downsample weight: (9*Cin, 2*Cp), bf16 -----------------
    # Downsample (1x1 stride-2) input is exactly the centre tap (kh=kw=1) of the
    # conv1 im2col patches, so it lives in the same GEMM (rows [4*Cin:5*Cin]).
    w1_flat = w1s.reshape(9 * Cin, Cout)
    w1_pad = jnp.zeros((9 * Cin, Cp), jnp.float32).at[:, :Cout].set(w1_flat)
    wd_pad = jnp.zeros((9 * Cin, Cp), jnp.float32).at[4 * Cin:5 * Cin, :Cout].set(wds)
    w1d = jnp.concatenate([w1_pad, wd_pad], axis=1).astype(jnp.bfloat16)

    # ---- conv2 weight, tap-major: (9*Cp, Cp), bf16 ----------------------------
    w2_pad = jnp.zeros((3, 3, Cp, Cp), jnp.float32).at[:, :, :Cout, :Cout].set(w2s)
    w2_im2col = w2_pad.reshape(9 * Cp, Cp).astype(jnp.bfloat16)

    # ---- per-channel shifts + PReLU slopes, padded to Cp lanes ----------------
    def padc(v):
        return jnp.zeros((Cp,), jnp.float32).at[:Cout].set(v)

    zero = jnp.zeros((Cp,), jnp.float32)
    prm = jnp.stack([padc(t1), padc(t2), padc(td),
                     jnp.full((Cp,), params["a1"], jnp.float32),
                     jnp.full((Cp,), params["a2"], jnp.float32),
                     zero, zero, zero], axis=0)

    # ---- parity-packed, 1-px-padded input (1x input volume, bf16) -------------
    # xr[n, i, j, (rp*2+cpar)*Cin + c] == xpad[n, 2*i+rp, 2*j+cpar, c]
    xp = jnp.pad(x, ((0, 0), (1, 1), (1, 1), (0, 0)))
    xr = xp.reshape(N, Ho + 1, 2, Wo + 1, 2, Cin)
    xr = xr.transpose(0, 1, 3, 2, 4, 5).reshape(N, Ho + 1, Wo + 1, 4 * Cin)
    xr = xr.astype(jnp.bfloat16)

    # ---- batch tiling under a chip-derived VMEM budget ------------------------
    Wp_pad = _round_up(Wo + 2, 8)
    vmem_limit = _vmem_limit_bytes()
    NB = _pick_batch_block(N, Ho, Wo, Cin, Cp, Wp_pad, (vmem_limit * 3) // 5)
    TM = NB * Ho * Wo
    grid = (N // NB,)

    kernel = functools.partial(_residual_block_kernel,
                               nb=NB, ho=Ho, wo=Wo, cin=Cin, cp=Cp)

    # TODO(synk): the three constant-index operands (w1d, w2, prm) could use
    # pipeline_mode=pl.Buffered(1) to skip double-buffering (~300 KB VMEM on v7x).
    out_flat = pl.pallas_call(
        kernel,
        out_shape=jax.ShapeDtypeStruct((N * Ho * Wo, Cp), jnp.float32),
        grid_spec=pltpu.PrefetchScalarGridSpec(
            num_scalar_prefetch=0,
            grid=grid,
            in_specs=[
                pl.BlockSpec((NB, Ho + 1, Wo + 1, 4 * Cin), lambda b: (b, 0, 0, 0)),
                pl.BlockSpec((9 * Cin, 2 * Cp), lambda b: (0, 0)),
                pl.BlockSpec((9 * Cp, Cp), lambda b: (0, 0)),
                pl.BlockSpec((8, Cp), lambda b: (0, 0)),
            ],
            out_specs=pl.BlockSpec((TM, Cp), lambda b: (b, 0)),   # lane-dense
            scratch_shapes=[pltpu.VMEM((NB, Ho + 2, Wp_pad, Cp), jnp.bfloat16)],
        ),
        compiler_params=pltpu.CompilerParams(
            dimension_semantics=("parallel",),
            vmem_limit_bytes=vmem_limit),
    )(xr, w1d, w2_im2col, prm)

    # TODO(synk): emit bf16 from the kernel if downstream tolerates it (halves
    # the padded output's HBM write traffic); kept f32 to match module dtype.
    out = out_flat.reshape(N, Ho, Wo, Cp)[..., :Cout]
    return jnp.transpose(out, (0, 3, 1, 2))                         # back to NCHW


def init_params(in_channels, out_channels, key):
    ks = jax.random.split(key, 18)

    def n(k, shape, scale=0.1):
        return scale * jax.random.normal(k, shape, jnp.float32)

    def u(k, shape):
        return jax.random.uniform(k, shape, jnp.float32, 0.5, 1.5)

    C = out_channels
    return dict(
        # block conv1 (3x3, stride 2) + BN1  (weights in HWIO)
        w1=n(ks[0], (3, 3, in_channels, C)), b1=n(ks[1], (C,)),
        g1=1.0 + n(ks[2], (C,)), be1=n(ks[3], (C,)),
        m1=n(ks[4], (C,)), v1=u(ks[5], (C,)),
        # block conv2 (3x3, stride 1) + BN2
        w2=n(ks[6], (3, 3, C, C)), b2=n(ks[7], (C,)),
        g2=1.0 + n(ks[8], (C,)), be2=n(ks[9], (C,)),
        m2=n(ks[10], (C,)), v2=u(ks[11], (C,)),
        # downsample conv (1x1, stride 2) + BN
        wd=n(ks[12], (in_channels, C)), bd=n(ks[13], (C,)),
        gd=1.0 + n(ks[14], (C,)), bed=n(ks[15], (C,)),
        md=n(ks[16], (C,)), vd=u(ks[17], (C,)),
        # PReLU slopes (PyTorch default init 0.25, num_parameters=1)
        a1=jnp.float32(0.25), a2=jnp.float32(0.25),
    )


def reference_forward(x_nchw, params):
    """Pure-JAX reference (lax.conv, f32) mirroring the PyTorch forward (eval-mode BN)."""
    x = jnp.transpose(x_nchw, (0, 2, 3, 1)).astype(jnp.float32)

    def conv(x, w, b, stride, pad):
        y = lax.conv_general_dilated(x, w, (stride, stride),
                                     [(pad, pad), (pad, pad)],
                                     dimension_numbers=("NHWC", "HWIO", "NHWC"),
                                     precision=lax.Precision.HIGHEST)
        return y + b

    def bn(x, g, be, m, v):
        return g * (x - m) / jnp.sqrt(v + EPS) + be

    def prelu(x, a):
        return jnp.where(x > 0, x, a * x)

    r = conv(x, params["w1"], params["b1"], 2, 1)
    r = bn(r, params["g1"], params["be1"], params["m1"], params["v1"])
    r = prelu(r, params["a1"])
    r = conv(r, params["w2"], params["b2"], 1, 1)
    r = bn(r, params["g2"], params["be2"], params["m2"], params["v2"])

    d = conv(x, params["wd"][None, None], params["bd"], 2, 0)
    d = bn(d, params["gd"], params["bed"], params["md"], params["vd"])

    out = prelu(d + r, params["a2"])
    return jnp.transpose(out, (0, 3, 1, 2))


if __name__ == "__main__":
    key = jax.random.PRNGKey(0)
    kx, kp = jax.random.split(key)

    # small shapes consistent with the module: batch=2, channels=4, spatial=16
    x = jax.random.normal(kx, (2, 4, 16, 16), jnp.float32)      # NCHW like PyTorch
    params = init_params(in_channels=4, out_channels=4, key=kp)

    out = residual_block_forward(x, params)
    out = jax.block_until_ready(out)

    ref = reference_forward(x, params)
    # Tolerance accounts for bf16 MXU operands in the kernel (f32 accumulation).
    if not jnp.allclose(out, ref, atol=2e-2, rtol=2e-2):
        raise AssertionError(
            f"mismatch vs reference, max abs err = {jnp.max(jnp.abs(out - ref))}")

    print("KERNEL_OK")
</pallas_src>

<mosaic_0001>
module attributes {stable_mosaic.version = 11 : i64} {
  func.func @_residual_block_kernel(%arg0: i32, %arg1: memref<2x9x9x16xbf16, #tpu.memory_space<vmem>>, %arg2: memref<36x256xbf16, #tpu.memory_space<vmem>>, %arg3: memref<1152x128xbf16, #tpu.memory_space<vmem>>, %arg4: memref<8x128xf32, #tpu.memory_space<vmem>>, %arg5: memref<128x128xf32, #tpu.memory_space<vmem>>, %arg6: memref<2x10x16x128xbf16, #tpu.memory_space<vmem>>) attributes {dimension_semantics = [#tpu.dimension_semantics<parallel>], iteration_bounds = array<i64: 1>, scalar_prefetch = 0 : i64, scratch_operands = 1 : i64, tpu.core_type = #tpu.core_type<tc>, window_params = [{transform_indices = @transform_0, window_bounds = array<i64: 2, 9, 9, 16>}, {pipeline_mode = #tpu.pipeline_mode<synchronous>, transform_indices = @transform_1, window_bounds = array<i64: 36, 256>}, {pipeline_mode = #tpu.pipeline_mode<synchronous>, transform_indices = @transform_2, window_bounds = array<i64: 1152, 128>}, {pipeline_mode = #tpu.pipeline_mode<synchronous>, transform_indices = @transform_3, window_bounds = array<i64: 8, 128>}, {transform_indices = @transform_4, window_bounds = array<i64: 128, 128>}]} {
    %c0 = arith.constant 0 : index
    %c0_0 = arith.constant 0 : index
    %0 = vector.load %arg4[%c0, %c0_0] : memref<8x128xf32, #tpu.memory_space<vmem>>, vector<8x128xf32>
    %1 = vector.extract_strided_slice %0 {offsets = [0, 0], sizes = [1, 128], strides = [1, 1]} : vector<8x128xf32> to vector<1x128xf32>
    %2 = vector.extract_strided_slice %0 {offsets = [1, 0], sizes = [1, 128], strides = [1, 1]} : vector<8x128xf32> to vector<1x128xf32>
    %3 = vector.extract_strided_slice %0 {offsets = [2, 0], sizes = [1, 128], strides = [1, 1]} : vector<8x128xf32> to vector<1x128xf32>
    %4 = vector.extract_strided_slice %0 {offsets = [3, 0], sizes = [1, 128], strides = [1, 1]} : vector<8x128xf32> to vector<1x128xf32>
    %5 = vector.extract_strided_slice %0 {offsets = [4, 0], sizes = [1, 128], strides = [1, 1]} : vector<8x128xf32> to vector<1x128xf32>
    %c0_1 = arith.constant 0 : index
    %c0_2 = arith.constant 0 : index
    %c0_3 = arith.constant 0 : index
    %c0_4 = arith.constant 0 : index
    %6 = vector.load %arg1[%c0_1, %c0_2, %c0_3, %c0_4] : memref<2x9x9x16xbf16, #tpu.memory_space<vmem>>, vector<2x9x9x16xbf16>
    %7 = arith.extf %6 : vector<2x9x9x16xbf16> to vector<2x9x9x16xf32>
    %8 = vector.extract_strided_slice %7 {offsets = [0, 0, 0, 0], sizes = [2, 8, 8, 4], strides = [1, 1, 1, 1]} : vector<2x9x9x16xf32> to vector<2x8x8x4xf32>
    %9 = vector.extract_strided_slice %7 {offsets = [0, 0, 0, 4], sizes = [2, 8, 8, 4], strides = [1, 1, 1, 1]} : vector<2x9x9x16xf32> to vector<2x8x8x4xf32>
    %10 = vector.extract_strided_slice %7 {offsets = [0, 0, 1, 0], sizes = [2, 8, 8, 4], strides = [1, 1, 1, 1]} : vector<2x9x9x16xf32> to vector<2x8x8x4xf32>
    %11 = vector.extract_strided_slice %7 {offsets = [0, 0, 0, 8], sizes = [2, 8, 8, 4], strides = [1, 1, 1, 1]} : vector<2x9x9x16xf32> to vector<2x8x8x4xf32>
    %12 = vector.extract_strided_slice %7 {offsets = [0, 0, 0, 12], sizes = [2, 8, 8, 4], strides = [1, 1, 1, 1]} : vector<2x9x9x16xf32> to vector<2x8x8x4xf32>
    %13 = vector.extract_strided_slice %7 {offsets = [0, 0, 1, 8], sizes = [2, 8, 8, 4], strides = [1, 1, 1, 1]} : vector<2x9x9x16xf32> to vector<2x8x8x4xf32>
    %14 = vector.extract_strided_slice %7 {offsets = [0, 1, 0, 0], sizes = [2, 8, 8, 4], strides = [1, 1, 1, 1]} : vector<2x9x9x16xf32> to vector<2x8x8x4xf32>
    %15 = vector.extract_strided_slice %7 {offsets = [0, 1, 0, 4], sizes = [2, 8, 8, 4], strides = [1, 1, 1, 1]} : vector<2x9x9x16xf32> to vector<2x8x8x4xf32>
    %16 = vector.extract_strided_slice %7 {offsets = [0, 1, 1, 0], sizes = [2, 8, 8, 4], strides = [1, 1, 1, 1]} : vector<2x9x9x16xf32> to vector<2x8x8x4xf32>
    %17 = tpu.concatenate %8, %9, %10, %11, %12, %13, %14, %15, %16 in 3 : vector<2x8x8x4xf32>, vector<2x8x8x4xf32>, vector<2x8x8x4xf32>, vector<2x8x8x4xf32>, vector<2x8x8x4xf32>, vector<2x8x8x4xf32>, vector<2x8x8x4xf32>, vector<2x8x8x4xf32>, vector<2x8x8x4xf32> -> vector<2x8x8x36xf32>
    %18 = vector.shape_cast %17 : vector<2x8x8x36xf32> to vector<128x36xf32>
    %19 = arith.truncf %18 : vector<128x36xf32> to vector<128x36xbf16>
    %c0_5 = arith.constant 0 : index
    %c0_6 = arith.constant 0 : index
    %20 = vector.load %arg2[%c0_5, %c0_6] : memref<36x256xbf16, #tpu.memory_space<vmem>>, vector<36x256xbf16>
    %cst = arith.constant dense<0.000000e+00> : vector<128x256xf32>
    %21 = tpu.matmul %19, %20, %cst {dimension_numbers = #tpu.dot_dimension_numbers<[1], [0], [0], [1], [0, 0, 1, 1], [], []>} : vector<128x36xbf16>, vector<36x256xbf16>, vector<128x256xf32> -> vector<128x256xf32>
    %22 = vector.extract_strided_slice %21 {offsets = [0, 0], sizes = [128, 128], strides = [1, 1]} : vector<128x256xf32> to vector<128x128xf32>
    %23 = vector.broadcast %1 : vector<1x128xf32> to vector<128x128xf32>
    %24 = arith.addf %22, %23 : vector<128x128xf32>
    %cst_7 = arith.constant 0.000000e+00 : f32
    %25 = vector.broadcast %cst_7 : f32 to vector<128x128xf32>
    %26 = arith.cmpf ogt, %24, %25 : vector<128x128xf32>
    %27 = vector.broadcast %4 : vector<1x128xf32> to vector<128x128xf32>
    %28 = arith.mulf %27, %24 : vector<128x128xf32>
    %29 = arith.select %26, %24, %28 : vector<128x128xi1>, vector<128x128xf32>
    %30 = vector.extract_strided_slice %21 {offsets = [0, 128], sizes = [128, 128], strides = [1, 1]} : vector<128x256xf32> to vector<128x128xf32>
    %31 = vector.broadcast %3 : vector<1x128xf32> to vector<128x128xf32>
    %32 = arith.addf %30, %31 : vector<128x128xf32>
    %33 = vector.shape_cast %29 : vector<128x128xf32> to vector<2x8x8x128xf32>
    %cst_8 = arith.constant 0.000000e+00 : f32
    %34 = vector.broadcast %cst_8 : f32 to vector<2x8x1x128xf32>
    %cst_9 = arith.constant 0.000000e+00 : f32
    %35 = vector.broadcast %cst_9 : f32 to vector<2x8x7x128xf32>
    %36 = tpu.concatenate %34, %33, %35 in 2 : vector<2x8x1x128xf32>, vector<2x8x8x128xf32>, vector<2x8x7x128xf32> -> vector<2x8x16x128xf32>
    %37 = arith.truncf %36 : vector<2x8x16x128xf32> to vector<2x8x16x128xbf16>
    %c0_10 = arith.constant 0 : index
    %c1 = arith.constant 1 : index
    %c0_11 = arith.constant 0 : index
    %c0_12 = arith.constant 0 : index
    %38 = vector.load %arg6[%c0_10, %c1, %c0_11, %c0_12] : memref<2x10x16x128xbf16, #tpu.memory_space<vmem>>, vector<2x8x16x128xbf16>
    tpu.vector_store %arg6[%c0_10, %c1, %c0_11, %c0_12], %37 {strides = array<i32>} : memref<2x10x16x128xbf16, #tpu.memory_space<vmem>>, vector<2x8x16x128xbf16>,
    %cst_13 = arith.constant 0.000000e+00 : bf16
    %39 = vector.broadcast %cst_13 : bf16 to vector<2x1x16x128xbf16>
    %c0_14 = arith.constant 0 : index
    %c0_15 = arith.constant 0 : index
    %c0_16 = arith.constant 0 : index
    %c0_17 = arith.constant 0 : index
    %40 = vector.load %arg6[%c0_14, %c0_15, %c0_16, %c0_17] : memref<2x10x16x128xbf16, #tpu.memory_space<vmem>>, vector<2x1x16x128xbf16>
    tpu.vector_store %arg6[%c0_14, %c0_15, %c0_16, %c0_17], %39 {strides = array<i32>} : memref<2x10x16x128xbf16, #tpu.memory_space<vmem>>, vector<2x1x16x128xbf16>,
    %c0_18 = arith.constant 0 : index
    %c9 = arith.constant 9 : index
    %c0_19 = arith.constant 0 : index
    %c0_20 = arith.constant 0 : index
    %41 = vector.load %arg6[%c0_18, %c9, %c0_19, %c0_20] : memref<2x10x16x128xbf16, #tpu.memory_space<vmem>>, vector<2x1x16x128xbf16>
    tpu.vector_store %arg6[%c0_18, %c9, %c0_19, %c0_20], %39 {strides = array<i32>} : memref<2x10x16x128xbf16, #tpu.memory_space<vmem>>, vector<2x1x16x128xbf16>,
    %c0_21 = arith.constant 0 : index
    %c0_22 = arith.constant 0 : index
    %c0_23 = arith.constant 0 : index
    %c0_24 = arith.constant 0 : index
    %42 = vector.load %arg6[%c0_21, %c0_22, %c0_23, %c0_24] : memref<2x10x16x128xbf16, #tpu.memory_space<vmem>>, vector<2x8x8x128xbf16>
    %43 = vector.shape_cast %42 : vector<2x8x8x128xbf16> to vector<128x128xbf16>
    %c0_25 = arith.constant 0 : index
    %c0_26 = arith.constant 0 : index
    %44 = vector.load %arg3[%c0_25, %c0_26] : memref<1152x128xbf16, #tpu.memory_space<vmem>>, vector<128x128xbf16>
    %cst_27 = arith.constant dense<0.000000e+00> : vector<128x128xf32>
    %45 = tpu.matmul %43, %44, %cst_27 {dimension_numbers = #tpu.dot_dimension_numbers<[1], [0], [0], [1], [0, 0, 1, 1], [], []>} : vector<128x128xbf16>, vector<128x128xbf16>, vector<128x128xf32> -> vector<128x128xf32>
    %c0_28 = arith.constant 0 : index
    %c0_29 = arith.constant 0 : index
    %c1_30 = arith.constant 1 : index
    %c0_31 = arith.constant 0 : index
    %46 = vector.load %arg6[%c0_28, %c0_29, %c1_30, %c0_31] : memref<2x10x16x128xbf16, #tpu.memory_space<vmem>>, vector<2x8x8x128xbf16>
    %47 = vector.shape_cast %46 : vector<2x8x8x128xbf16> to vector<128x128xbf16>
    %c128 = arith.constant 128 : index
    %c0_32 = arith.constant 0 : index
    %48 = vector.load %arg3[%c128, %c0_32] : memref<1152x128xbf16, #tpu.memory_space<vmem>>, vector<128x128xbf16>
    %cst_33 = arith.constant dense<0.000000e+00> : vector<128x128xf32>
    %49 = tpu.matmul %47, %48, %cst_33 {dimension_numbers = #tpu.dot_dimension_numbers<[1], [0], [0], [1], [0, 0, 1, 1], [], []>} : vector<128x128xbf16>, vector<128x128xbf16>, vector<128x128xf32> -> vector<128x128xf32>
    %50 = arith.addf %45, %49 : vector<128x128xf32>
    %c0_34 = arith.constant 0 : index
    %c0_35 = arith.constant 0 : index
    %c2 = arith.constant 2 : index
    %c0_36 = arith.constant 0 : index
    %51 = vector.load %arg6[%c0_34, %c0_35, %c2, %c0_36] : memref<2x10x16x128xbf16, #tpu.memory_space<vmem>>, vector<2x8x8x128xbf16>
    %52 = vector.shape_cast %51 : vector<2x8x8x128xbf16> to vector<128x128xbf16>
    %c256 = arith.constant 256 : index
    %c0_37 = arith.constant 0 : index
    %53 = vector.load %arg3[%c256, %c0_37] : memref<1152x128xbf16, #tpu.memory_space<vmem>>, vector<128x128xbf16>
    %cst_38 = arith.constant dense<0.000000e+00> : vector<128x128xf32>
    %54 = tpu.matmul %52, %53, %cst_38 {dimension_numbers = #tpu.dot_dimension_numbers<[1], [0], [0], [1], [0, 0, 1, 1], [], []>} : vector<128x128xbf16>, vector<128x128xbf16>, vector<128x128xf32> -> vector<128x128xf32>
    %55 = arith.addf %50, %54 : vector<128x128xf32>
    %c0_39 = arith.constant 0 : index
    %c1_40 = arith.constant 1 : index
    %c0_41 = arith.constant 0 : index
    %c0_42 = arith.constant 0 : index
    %56 = vector.load %arg6[%c0_39, %c1_40, %c0_41, %c0_42] : memref<2x10x16x128xbf16, #tpu.memory_space<vmem>>, vector<2x8x8x128xbf16>
    %57 = vector.shape_cast %56 : vector<2x8x8x128xbf16> to vector<128x128xbf16>
    %c384 = arith.constant 384 : index
    %c0_43 = arith.constant 0 : index
    %58 = vector.load %arg3[%c384, %c0_43] : memref<1152x128xbf16, #tpu.memory_space<vmem>>, vector<128x128xbf16>
    %cst_44 = arith.constant dense<0.000000e+00> : vector<128x128xf32>
    %59 = tpu.matmul %57, %58, %cst_44 {dimension_numbers = #tpu.dot_dimension_numbers<[1], [0], [0], [1], [0, 0, 1, 1], [], []>} : vector<128x128xbf16>, vector<128x128xbf16>, vector<128x128xf32> -> vector<128x128xf32>
    %60 = arith.addf %55, %59 : vector<128x128xf32>
    %c0_45 = arith.constant 0 : index
    %c1_46 = arith.constant 1 : index
    %c1_47 = arith.constant 1 : index
    %c0_48 = arith.constant 0 : index
    %61 = vector.load %arg6[%c0_45, %c1_46, %c1_47, %c0_48] : memref<2x10x16x128xbf16, #tpu.memory_space<vmem>>, vector<2x8x8x128xbf16>
    %62 = vector.shape_cast %61 : vector<2x8x8x128xbf16> to vector<128x128xbf16>
    %c512 = arith.constant 512 : index
    %c0_49 = arith.constant 0 : index
    %63 = vector.load %arg3[%c512, %c0_49] : memref<1152x128xbf16, #tpu.memory_space<vmem>>, vector<128x128xbf16>
    %cst_50 = arith.constant dense<0.000000e+00> : vector<128x128xf32>
    %64 = tpu.matmul %62, %63, %cst_50 {dimension_numbers = #tpu.dot_dimension_numbers<[1], [0], [0], [1], [0, 0, 1, 1], [], []>} : vector<128x128xbf16>, vector<128x128xbf16>, vector<128x128xf32> -> vector<128x128xf32>
    %65 = arith.addf %60, %64 : vector<128x128xf32>
    %c0_51 = arith.constant 0 : index
    %c1_52 = arith.constant 1 : index
    %c2_53 = arith.constant 2 : index
    %c0_54 = arith.constant 0 : index
    %66 = vector.load %arg6[%c0_51, %c1_52, %c2_53, %c0_54] : memref<2x10x16x128xbf16, #tpu.memory_space<vmem>>, vector<2x8x8x128xbf16>
    %67 = vector.shape_cast %66 : vector<2x8x8x128xbf16> to vector<128x128xbf16>
    %c640 = arith.constant 640 : index
    %c0_55 = arith.constant 0 : index
    %68 = vector.load %arg3[%c640, %c0_55] : memref<1152x128xbf16, #tpu.memory_space<vmem>>, vector<128x128xbf16>
    %cst_56 = arith.constant dense<0.000000e+00> : vector<128x128xf32>
    %69 = tpu.matmul %67, %68, %cst_56 {dimension_numbers = #tpu.dot_dimension_numbers<[1], [0], [0], [1], [0, 0, 1, 1], [], []>} : vector<128x128xbf16>, vector<128x128xbf16>, vector<128x128xf32> -> vector<128x128xf32>
    %70 = arith.addf %65, %69 : vector<128x128xf32>
    %c0_57 = arith.constant 0 : index
    %c2_58 = arith.constant 2 : index
    %c0_59 = arith.constant 0 : index
    %c0_60 = arith.constant 0 : index
    %71 = vector.load %arg6[%c0_57, %c2_58, %c0_59, %c0_60] : memref<2x10x16x128xbf16, #tpu.memory_space<vmem>>, vector<2x8x8x128xbf16>
    %72 = vector.shape_cast %71 : vector<2x8x8x128xbf16> to vector<128x128xbf16>
    %c768 = arith.constant 768 : index
    %c0_61 = arith.constant 0 : index
    %73 = vector.load %arg3[%c768, %c0_61] : memref<1152x128xbf16, #tpu.memory_space<vmem>>, vector<128x128xbf16>
    %cst_62 = arith.constant dense<0.000000e+00> : vector<128x128xf32>
    %74 = tpu.matmul %72, %73, %cst_62 {dimension_numbers = #tpu.dot_dimension_numbers<[1], [0], [0], [1], [0, 0, 1, 1], [], []>} : vector<128x128xbf16>, vector<128x128xbf16>, vector<128x128xf32> -> vector<128x128xf32>
    %75 = arith.addf %70, %74 : vector<128x128xf32>
    %c0_63 = arith.constant 0 : index
    %c2_64 = arith.constant 2 : index
    %c1_65 = arith.constant 1 : index
    %c0_66 = arith.constant 0 : index
    %76 = vector.load %arg6[%c0_63, %c2_64, %c1_65, %c0_66] : memref<2x10x16x128xbf16, #tpu.memory_space<vmem>>, vector<2x8x8x128xbf16>
    %77 = vector.shape_cast %76 : vector<2x8x8x128xbf16> to vector<128x128xbf16>
    %c896 = arith.constant 896 : index
    %c0_67 = arith.constant 0 : index
    %78 = vector.load %arg3[%c896, %c0_67] : memref<1152x128xbf16, #tpu.memory_space<vmem>>, vector<128x128xbf16>
    %cst_68 = arith.constant dense<0.000000e+00> : vector<128x128xf32>
    %79 = tpu.matmul %77, %78, %cst_68 {dimension_numbers = #tpu.dot_dimension_numbers<[1], [0], [0], [1], [0, 0, 1, 1], [], []>} : vector<128x128xbf16>, vector<128x128xbf16>, vector<128x128xf32> -> vector<128x128xf32>
    %80 = arith.addf %75, %79 : vector<128x128xf32>
    %c0_69 = arith.constant 0 : index
    %c2_70 = arith.constant 2 : index
    %c2_71 = arith.constant 2 : index
    %c0_72 = arith.constant 0 : index
    %81 = vector.load %arg6[%c0_69, %c2_70, %c2_71, %c0_72] : memref<2x10x16x128xbf16, #tpu.memory_space<vmem>>, vector<2x8x8x128xbf16>
    %82 = vector.shape_cast %81 : vector<2x8x8x128xbf16> to vector<128x128xbf16>
    %c1024 = arith.constant 1024 : index
    %c0_73 = arith.constant 0 : index
    %83 = vector.load %arg3[%c1024, %c0_73] : memref<1152x128xbf16, #tpu.memory_space<vmem>>, vector<128x128xbf16>
    %cst_74 = arith.constant dense<0.000000e+00> : vector<128x128xf32>
    %84 = tpu.matmul %82, %83, %cst_74 {dimension_numbers = #tpu.dot_dimension_numbers<[1], [0], [0], [1], [0, 0, 1, 1], [], []>} : vector<128x128xbf16>, vector<128x128xbf16>, vector<128x128xf32> -> vector<128x128xf32>
    %85 = arith.addf %80, %84 : vector<128x128xf32>
    %86 = vector.broadcast %2 : vector<1x128xf32> to vector<128x128xf32>
    %87 = arith.addf %85, %86 : vector<128x128xf32>
    %88 = arith.addf %32, %87 : vector<128x128xf32>
    %cst_75 = arith.constant 0.000000e+00 : f32
    %89 = vector.broadcast %cst_75 : f32 to vector<128x128xf32>
    %90 = arith.cmpf ogt, %88, %89 : vector<128x128xf32>
    %91 = vector.broadcast %5 : vector<1x128xf32> to vector<128x128xf32>
    %92 = arith.mulf %91, %88 : vector<128x128xf32>
    %93 = arith.select %90, %88, %92 : vector<128x128xi1>, vector<128x128xf32>
    %c0_76 = arith.constant 0 : index
    %c0_77 = arith.constant 0 : index
    %94 = vector.load %arg5[%c0_76, %c0_77] : memref<128x128xf32, #tpu.memory_space<vmem>>, vector<128x128xf32>
    tpu.vector_store %arg5[%c0_76, %c0_77], %93 {strides = array<i32>} : memref<128x128xf32, #tpu.memory_space<vmem>>, vector<128x128xf32>,
    return
  }
  func.func @transform_0(%arg0: i32) -> (i32, i32, i32, i32) {
    %c0_i32 = arith.constant 0 : i32
    %c0_i32_0 = arith.constant 0 : i32
    %c0_i32_1 = arith.constant 0 : i32
    %c0_i32_2 = arith.constant 0 : i32
    return %arg0, %c0_i32, %c0_i32_0, %c0_i32_1 : i32, i32, i32, i32
  }
  func.func @transform_1(%arg0: i32) -> (i32, i32) {
    %c0_i32 = arith.constant 0 : i32
    %c0_i32_0 = arith.constant 0 : i32
    %c0_i32_1 = arith.constant 0 : i32
    return %c0_i32, %c0_i32_0 : i32, i32
  }
  func.func @transform_2(%arg0: i32) -> (i32, i32) {
    %c0_i32 = arith.constant 0 : i32
    %c0_i32_0 = arith.constant 0 : i32
    %c0_i32_1 = arith.constant 0 : i32
    return %c0_i32, %c0_i32_0 : i32, i32
  }
  func.func @transform_3(%arg0: i32) -> (i32, i32) {
    %c0_i32 = arith.constant 0 : i32
    %c0_i32_0 = arith.constant 0 : i32
    %c0_i32_1 = arith.constant 0 : i32
    return %c0_i32, %c0_i32_0 : i32, i32
  }
  func.func @transform_4(%arg0: i32) -> (i32, i32) {
    %c0_i32 = arith.constant 0 : i32
    %c0_i32_0 = arith.constant 0 : i32
    return %arg0, %c0_i32 : i32, i32
  }
}

</mosaic_0001>

<bundles_post_ra>
// kernel: tpu_custom_call.1
= control target key start
LH: loop header
LB: loop body
LE: loop exit
PB: predicated region body
PF: predicated region fallthrough
CT: control target
= control target key end

     0   :  { %9 = vsyncpa [#allocation4], 0  ;;  %s7031_s0 = inlined_call_operand.vmem [shape: bf16[2,9,9,16], index: 0, kind: input, shape index: {}]   ;;  %s7032_s1 = inlined_call_operand.vmem [shape: bf16[36,256], index: 1, kind: input, shape index: {}]   ;;  %s7033_s2 = inlined_call_operand.hbm [shape: bf16[1152,128], index: 2, kind: input, shape index: {}]   ;;  %s7034_s3 = inlined_call_operand.vmem [shape: f32[8,128], index: 3, kind: input, shape index: {}]   ;;  %s7035_s4 = inlined_call_operand.hbm [shape: f32[128,128], index: 4, kind: output, shape index: {}]  }
   0x1   :  { %10 = vsyncpa [#allocation5], 0  ;;  %s5993_s15 = smov [#allocation3]   ;;  %s5945_s19 = scalar_lea.hbm %s7033_s2, 9216 }
   0x2   :  { %s20_s16 = sshll.u32 %s5993_s15, 4  ;;  %p5946_p0 = scmp.ne.s32.totalorder %s7033_s2, %s5945_s19  ;;  %s21_s16 = int_to_ptr.vmem [resolvable:$true] %s20_s16 }
   0x3   :  { %p5949_p1 = scmp.lt.u32.totalorder %s5945_s19, %s7033_s2 }
   0x5   :  { %p5951_p2 = pnand %p5949_p1, %p5946_p0 }
   0x7   :  { %5954 = shalt.err (!%p5951_p2)
}
   0x8   :  { %s5955_s24 = scalar_lea.vmem %s21_s16, 9216  ;;  %p5960_p4 = scmp.lt.s32.totalorder %s21_s16, %s21_s16 }
   0x9   :  { %p5956_p3 = scmp.ne.s32.totalorder %s21_s16, %s5955_s24  ;;  %p5961_p5 = scmp.lt.s32.totalorder %s5955_s24, %s5955_s24 }
   0xb   :  { %p5962_p6 = por %p5961_p5, %p5960_p4 }
   0xd   :  { %p5963_p7 = pnand %p5962_p6, %p5956_p3 }
   0xf   :  { %5966 = shalt.err (!%p5963_p7)
}
  0x10   :  { %s5994_s25 = smov 64   ;;  %s5995_s26 = smov 4  }
  0x11   :  { %26 = dma.hbm_to_vmem [thread:$0]  %s7033_s2, 9216, %s21_s16, [#allocation4], %s5994_s25, %s5994_s25, %s5995_s26  }
  0x12   :  { %5989 = dma.done.wait [#allocation4], 9216  }
  0x13   :  { %5990 = vsyncadd [#allocation4], 4294958080  ;;  %vm138_vm0 = vcmask 1046528   ;;  %v36_v0 = vld [vmem:[%s7031_s0 + $0x8] ss:$8 sps:$4 sm:$0xff]   ;;  %s5996_s18 = smov 24  }
  0x14   :  { %v34_v1 = vld [vmem:[%s7031_s0] ss:$24 sps:$4 sm:$0xff]   ;;  %v35_v2 = vld [vmem:[%s7031_s0 + $0x4] sm:$0x1]  ;;  %v6050_v3 = vunpack.c.l.bf16 %v36_v0  ;;  %v6052_v4 = vunpack.c.h.bf16 %v36_v0  ;;  %v37_v7 = vld [vmem:[%s7031_s0 + $0xc] sm:$0x1] }
  0x15   :  { %v6054_v5 = vunpack.c.l.bf16 %v34_v1  ;;  %v6056_v6 = vunpack.c.h.bf16 %v34_v1  ;;  %v39_v8 = vld [vmem:[%s7031_s0 + $0x14] sm:$0x1]  ;;  %v41_v9 = vld [vmem:[%s7031_s0 + $0x1c] sm:$0x1]  ;;  %v71_v10 = vunpack.c.l.bf16 %v35_v2  ;;  %v73_v11 = vunpack.c.l.bf16 %v37_v7  ;;  %v42_v17 = vld [vmem:[%s7031_s0 + $0x20] ss:$8 sps:$4 sm:$0xff]  }
  0x16   :  { %v75_v12 = vunpack.c.l.bf16 %v39_v8  ;;  %v77_v13 = vunpack.c.l.bf16 %v41_v9  ;;  %v5453_v14 = vpack.i.bf16 %v6052_v4, %v6050_v3  ;;  %v43_v18 = vld [vmem:[%s7031_s0 + $0x24] sm:$0x1]  ;;  %v142_v20 = vrot.slane %v6050_v3, 1  ;;  %v45_v31 = vld [vmem:[%s7031_s0 + $0x2c] sm:$0x1]  ;;  %s5997_s21 = smov 12  }
  0x17   :  { %v5448_v15 = vpack.i.bf16 %v6050_v3, %v6054_v5  ;;  %v139_v16 = vrot.slane %v6054_v5, 1  ;;  %v140_v19 = vrot.slane %v71_v10, 1  ;;  %v143_v21 = vrot.slane %v73_v11, 1  ;;  %v46_v40 = vld [vmem:[%s7031_s0 + $0x30] ss:$8 sps:$4 sm:$0xff]   ;;  %s5998_s7 = smov 8  }
  0x18   :  { %v145_v22 = vrot.slane %v6052_v4, 1  ;;  %5454 = vrot.lane.b32.xlu1 %v5453_v14, %s5996_s18  ;;  %v5458_v23 = vpack.i.bf16 %v6056_v6, %v6052_v4  ;;  %v146_v24 = vrot.slane %v75_v12, 1  ;;  %v148_v25 = vrot.slane %v6056_v6, 1  ;;  %v5648_v41 = vld [vmem:[%s7032_s1 + $0x4] ss:$8 sps:$4 sm:$0xff]   ;;  %s5999_s11 = smov 32  }
  0x19   :  { %5449 = vrot.lane.b32.xlu0 %v5448_v15, %s5995_s26  ;;  %v149_v26 = vrot.slane %v77_v13, 1  ;;  %v141_v27 = vsel %vm138_vm0, %v139_v16, %v140_v19  ;;  %v144_v28 = vsel %vm138_vm0, %v142_v20, %v143_v21  ;;  %v6087_v29 = vunpack.c.l.bf16 %v42_v17  ;;  %v47_v42 = vld [vmem:[%s7031_s0 + $0x34] sm:$0x1]  ;;  %v5650_v43 = vld [vmem:[%s7032_s1] ss:$8 sps:$4 sm:$0xff]   ;;  %626 = vmatprep.subr.bf16.mxu0 %v5648_v41 }
  0x1a   :  { %v79_v30 = vunpack.c.l.bf16 %v43_v18  ;;  %v5468_v32 = vpack.i.bf16 %v144_v28, %v141_v27  ;;  %v147_v33 = vsel %vm138_vm0, %v145_v22, %v146_v24  ;;  %v6096_v36 = vunpack.c.h.bf16 %v42_v17  ;;  %v5651_v44 = vld [vmem:[%s7032_s1 + $0x14] ss:$8 sps:$4 sm:$0xff]   ;;  %v5653_v50 = vld [vmem:[%s7032_s1 + $0x10] ss:$8 sps:$4 sm:$0xff]   ;;  %627 = vmatpush1.bf16.msra.mxu0 %v5650_v43  ;;  %v6135_v57 = vld [vmem:[%s7031_s0 + $0x40] ss:$8 sps:$4 sm:$0xff]  }
  0x1b   :  { %v150_v34 = vsel %vm138_vm0, %v148_v25, %v149_v26  ;;  %v81_v37 = vunpack.c.l.bf16 %v45_v31  ;;  %v151_v38 = vrot.slane %v6087_v29, 1  ;;  %v5473_v45 = vpack.i.bf16 %v147_v33, %v144_v28  ;;  %v49_v48 = vld [vmem:[%s7031_s0 + $0x3c] sm:$0x1]  ;;  %628 = vmatprep.subr.bf16.mxu0 %v5651_v44  ;;  %v51_v59 = vld [vmem:[%s7031_s0 + $0x44] sm:$0x1] }
  0x1c   :  { %5469 = vrot.lane.b32.xlu1 %v5468_v32, %s5997_s21  ;;  %v5483_v35 = vpack.i.bf16 %v150_v34, %v147_v33  ;;  %v152_v39 = vrot.slane %v79_v30, 1  ;;  %v154_v46 = vrot.slane %v6096_v36, 1  ;;  %v6124_v51 = vunpack.c.l.bf16 %v46_v40  ;;  %v53_v62 = vld [vmem:[%s7031_s0 + $0x4c] sm:$0x1]  ;;  %v54_v1 = vld [vmem:[%s7031_s0 + $0x50] ss:$8 sps:$4 sm:$0xff]  }
  0x1d   :  { %5459 = vrot.lane.b32.xlu0 %v5458_v23, %s5995_s26  ;;  %v155_v47 = vrot.slane %v81_v37, 1  ;;  %v83_v52 = vunpack.c.l.bf16 %v47_v42  ;;  %v6126_v53 = vunpack.c.h.bf16 %v46_v40  ;;  %v85_v54 = vunpack.c.l.bf16 %v49_v48  ;;  %v55_v2 = vld [vmem:[%s7031_s0 + $0x54] sm:$0x1]  ;;  %v57_v10 = vld [vmem:[%s7031_s0 + $0x5c] sm:$0x1] }
  0x1e   :  { %v153_v49 = vsel %vm138_vm0, %v151_v38, %v152_v39  ;;  %v5478_v55 = vpack.i.bf16 %v6087_v29, %v6056_v6  ;;  %v157_v60 = vrot.slane %v6124_v51, 1  ;;  %629 = vmatpush1.bf16.msra.mxu0 %v5653_v50  ;;  %v5503_v8 = vpack.i.bf16 %v6096_v36, %v6087_v29  ;;  %v58_v12 = vld [vmem:[%s7031_s0 + $0x60] ss:$8 sps:$4 sm:$0xff]   ;;  %v59_v13 = vld [vmem:[%s7031_s0 + $0x64] sm:$0x1] }
  0x1f   :  { %v5493_v56 = vpack.i.bf16 %v153_v49, %v150_v34  ;;  %v6138_v58 = vsel %vm138_vm0, %v154_v46, %v155_v47  ;;  %v158_v61 = vrot.slane %v83_v52, 1  ;;  %v160_v63 = vrot.slane %v6126_v53, 1  ;;  %v61_v15 = vld [vmem:[%s7031_s0 + $0x6c] sm:$0x1]  ;;  %v62_v16 = vld [vmem:[%s7031_s0 + $0x70] ss:$8 sps:$4 sm:$0xff]  }
  0x20   :  { %5484 = vrot.lane.b32.xlu1 %v5483_v35, %s5998_s7  ;;  %v161_v0 = vrot.slane %v85_v54, 1  ;;  %v5498_v7 = vpack.i.bf16 %v6138_v58, %v153_v49  ;;  %v86_v9 = vunpack.c.l.bf16 %v6135_v57  ;;  %v87_v11 = vunpack.c.l.bf16 %v51_v59  ;;  %v63_v21 = vld [vmem:[%s7031_s0 + $0x74] sm:$0x1]  ;;  %v65_v25 = vld [vmem:[%s7031_s0 + $0x7c] sm:$0x1] }
  0x21   :  { %5464 = vrot.lane.b32.xlu0 %v5468_v32, %s5998_s7  ;;  %v159_v14 = vsel %vm138_vm0, %v157_v60, %v158_v61  ;;  %v5513_v17 = vpack.i.bf16 %v6124_v51, %v6096_v36  ;;  %v6182_v19 = vunpack.c.h.bf16 %v6135_v57  ;;  %v89_v20 = vunpack.c.l.bf16 %v53_v62  ;;  %v6202_v31 = vld [vmem:[%s7031_s0 + $0x80] ss:$8 sps:$4 sm:$0xff]   ;;  %v67_v37 = vld [vmem:[%s7031_s0 + $0x84] sm:$0x1] }
  0x22   :  { %v6179_v18 = vsel %vm138_vm0, %v160_v63, %v161_v0  ;;  %v383_v22 = vrot.slane %v86_v9, 1  ;;  %v6191_v23 = vunpack.c.l.bf16 %v54_v1  ;;  %v91_v24 = vunpack.c.l.bf16 %v55_v2  ;;  %v568_v46 = vld [vmem:[%s7032_s1 + $0x20] sm:$0x33] }
  0x23   :  { %v5518_v26 = vpack.i.bf16 %v159_v14, %v6138_v58  ;;  %v384_v27 = vrot.slane %v87_v11, 1  ;;  %v6197_v28 = vunpack.c.h.bf16 %v54_v1  ;;  %v93_v30 = vunpack.c.l.bf16 %v57_v10 }
  0x24   :  { %5489 = vrot.lane.b32.xlu1 %v5483_v35, %s5997_s21  ;;  %v5523_v32 = vpack.i.bf16 %v6179_v18, %v159_v14  ;;  %v6205_v33 = vunpack.c.l.bf16 %v58_v12  ;;  %v95_v34 = vunpack.c.l.bf16 %v59_v13  ;;  %v6207_v35 = vunpack.c.h.bf16 %v58_v12 }
  0x25   :  { %5474 = vrot.lane.b32.xlu0 %v5473_v45, %s5999_s11  ;;  %v163_v38 = vrot.slane %v6182_v19, 1  ;;  %v164_v39 = vrot.slane %v89_v20, 1  ;;  %v97_v40 = vunpack.c.l.bf16 %v61_v15  ;;  %v6213_v41 = vunpack.c.l.bf16 %v62_v16 }
  0x26   :  { %v166_v42 = vrot.slane %v6191_v23, 1  ;;  %v167_v43 = vrot.slane %v91_v24, 1  ;;  %v99_v44 = vunpack.c.l.bf16 %v63_v21  ;;  %v6218_v45 = vunpack.c.h.bf16 %v62_v16 }
  0x27   :  { %v169_v47 = vrot.slane %v6197_v28, 1  ;;  %v170_v48 = vrot.slane %v93_v30, 1  ;;  %v101_v49 = vunpack.c.l.bf16 %v65_v25  ;;  %v172_v50 = vrot.slane %v6205_v33, 1 }
  0x28   :  { %5494 = vrot.lane.b32.xlu1 %v5493_v56, %s5999_s11  ;;  %v173_v52 = vrot.slane %v95_v34, 1  ;;  %v175_v54 = vrot.slane %v6207_v35, 1  ;;  %v5528_v56 = vpack.i.bf16 %v6126_v53, %v6124_v51  ;;  %v176_v58 = vrot.slane %v97_v40, 1  ;;  %v69_v34 = vld [vmem:[%s7031_s0 + $0x8c] sm:$0x1] }
  0x29   :  { %5479 = vrot.lane.b32.xlu0 %v5478_v55, %s5996_s18  ;;  %v6227_v55 = vunpack.c.l.bf16 %v6202_v31  ;;  %v178_v59 = vrot.slane %v6213_v41, 1  ;;  %v103_v60 = vunpack.c.l.bf16 %v67_v37  ;;  %v385_v61 = vsel %vm138_vm0, %v383_v22, %v384_v27 }
  0x2a   :  { %v179_v62 = vrot.slane %v99_v44, 1  ;;  %v181_v63 = vrot.slane %v6218_v45, 1  ;;  %v182_v0 = vrot.slane %v101_v49, 1  ;;  %v4468_v1 = vcombine.high %v568_v46, %v568_v46 }
  0x2b   :  { %vm619_vm1 = vcmask 1041408   ;;  %v4467_v2 = vcombine.low %v568_v46, %v568_v46  ;;  %v6000_v11 = vmov 0   ;;  %v5538_v12 = vpack.i.bf16 %v86_v9, %v6126_v53 }
  0x2c   :  { %5504 = vrot.lane.b32.xlu1 %v5503_v8, %s5995_s26  ;;  %v185_v8 = vrot.slane %v103_v60, 1  ;;  %4469 = vmatprep.subr.msk.bf16.mxu0 %vm619_vm1, %v4468_v1  ;;  %945 = vst [vmem:[#allocation2] sm:$0xff] %v6000_v11  ;;  %946 = vst [vmem:[#allocation2 + $0x50] sm:$0xff] %v6000_v11  ;;  %v5543_v13 = vpack.i.bf16 %v385_v61, %v6179_v18  ;;  %v165_v14 = vsel %vm138_vm0, %v163_v38, %v164_v39  ;;  %vm437_vm2 = vcmask 64512  }
  0x2d   :  { %5499 = vrot.lane.b32.xlu0 %v5498_v7, %s5998_s7  ;;  %v621_v10 = vsel %vm619_vm1, %v4467_v2, 0  ;;  %658 = vmatprep.mubr.bf16.mxu0 %v6000_v11  ;;  %948 = vst [vmem:[#allocation2 + $0x48] sm:$0xff] %v6000_v11  ;;  %949 = vst [vmem:[#allocation2 + $0x98] sm:$0xff] %v6000_v11  ;;  %v168_v15 = vsel %vm138_vm0, %v166_v42, %v167_v43  ;;  %v5563_v57 = vpack.i.bf16 %v6197_v28, %v6191_v23  ;;  %vm454_vm3 = vcmask 97280  }
  0x2e   :  { %631 = vmatpush1.bf16.msra.mxu0 %v621_v10  ;;  %v5548_v16 = vpack.i.bf16 %v168_v15, %v165_v14  ;;  %v171_v9 = vsel %vm138_vm0, %v169_v47, %v170_v48  ;;  %v174_v18 = vsel %vm138_vm0, %v172_v50, %v173_v52  ;;  %v5578_v22 = vpack.i.bf16 %v6205_v33, %v6197_v28  ;;  %v5656_v50 = vld [vmem:[#allocation3 + $0xc0] sm:$0xff]  }
  0x2f   :  { %v5568_v20 = vpack.i.bf16 %v171_v9, %v168_v15  ;;  %v5573_v21 = vpack.i.bf16 %v174_v18, %v171_v9  ;;  %v177_v24 = vsel %vm138_vm0, %v175_v54, %v176_v58  ;;  %v5588_v25 = vpack.i.bf16 %v6207_v35, %v6205_v33  ;;  %5102 = vmatprep.subr.bf16.mxu1 %v5656_v50 }
  0x30   :  { %5514 = vrot.lane.b32.xlu1 %v5513_v17, %s5996_s18  ;;  %v5553_v17 = vpack.i.bf16 %v6191_v23, %v6182_v19  ;;  %v180_v27 = vsel %vm138_vm0, %v178_v59, %v179_v62  ;;  %v5613_v37 = vpack.i.bf16 %v6218_v45, %v6213_v41  ;;  %v183_v38 = vsel %vm138_vm0, %v181_v63, %v182_v0 }
  0x31   :  { %5509 = vrot.lane.b32.xlu0 %v5498_v7, %s5997_s21  ;;  %v184_v7 = vrot.slane %v6227_v55, 1  ;;  %v5598_v30 = vpack.i.bf16 %v180_v27, %v177_v24  ;;  %v104_v40 = vunpack.c.h.bf16 %v6202_v31  ;;  %v105_v42 = vunpack.c.l.bf16 %v69_v34  ;;  %5103 = vmatpush3.bf16.msra.mxu1 %v5656_v50 }
  0x32   :  { %v5618_v43 = vpack.i.bf16 %v183_v38, %v180_v27  ;;  %v5628_v48 = vpack.i.bf16 %v6227_v55, %v6218_v45  ;;  %vm471_vm4 = vcmask 130048   ;;  %vm488_vm5 = vcmask 162816  }
  0x33   :  { %v186_v39 = vsel %vm138_vm0, %v184_v7, %v185_v8  ;;  %v386_v46 = vrot.slane %v104_v40, 1  ;;  %v387_v47 = vrot.slane %v105_v42, 1  ;;  %v5638_v31 = vpack.i.bf16 %v104_v40, %v6227_v55 }
  0x34   :  { %5524 = vrot.lane.b32.xlu1 %v5523_v32, %s5998_s7  ;;  %v5623_v44 = vpack.i.bf16 %v186_v39, %v183_v38  ;;  %vm505_vm6 = vcmask 195584   ;;  %vm522_vm7 = vcmask 228352   ;;  %vm539_vm8 = vcmask 261120  }
  0x35   :  { %5519 = vrot.lane.b32.xlu0 %v5518_v26, %s5999_s11  ;;  %v5593_v26 = vpack.i.bf16 %v177_v24, %v174_v18  ;;  %v388_v49 = vsel %vm138_vm0, %v386_v46, %v387_v47  ;;  %vm594_vm9 = vcmask 293888   ;;  %vm879_vm11 = vcmask 1040384  }
  0x36   :  { %v5643_v52 = vpack.i.bf16 %v388_v49, %v186_v39  ;;  %vm1078_vm15 = vsmask.f32 3328  ;;  %vm1079_vm0 = vsmask.f32 7440 }
  0x37   :  { %vm6488_vm1 = vmor %vm1078_vm15, %vm1079_vm0 }
  0x38   :  { %5534 = vrot.lane.b32.xlu1 %v5523_v32, %s5997_s21  ;;  %v5603_v32 = vpack.i.bf16 %v6213_v41, %v6207_v35 }
  0x39   :  { %5529 = vrot.lane.b32.xlu0 %v5528_v56, %s5995_s26 }
  0x3c   :  { %5544 = vrot.lane.b32.xlu1 %v5543_v13, %s5999_s11 }
  0x3d   :  { %5539 = vrot.lane.b32.xlu0 %v5538_v12, %s5996_s18 }
  0x40   :  { %5554 = vrot.lane.b32.xlu1 %v5553_v17, %s5995_s26 }
  0x41   :  { %5549 = vrot.lane.b32.xlu0 %v5548_v16, %s5998_s7 }
  0x44   :  { %5564 = vrot.lane.b32.xlu1 %v5563_v57, %s5996_s18 }
  0x45   :  { %5559 = vrot.lane.b32.xlu0 %v5548_v16, %s5997_s21 }
  0x48   :  { %5574 = vrot.lane.b32.xlu1 %v5573_v21, %s5998_s7 }
  0x49   :  { %5569 = vrot.lane.b32.xlu0 %v5568_v20, %s5999_s11 }
  0x4c   :  { %5584 = vrot.lane.b32.xlu1 %v5573_v21, %s5997_s21 }
  0x4d   :  { %5579 = vrot.lane.b32.xlu0 %v5578_v22, %s5995_s26 }
  0x50   :  { %5594 = vrot.lane.b32.xlu1 %v5593_v26, %s5999_s11 }
  0x51   :  { %5589 = vrot.lane.b32.xlu0 %v5588_v25, %s5996_s18 }
  0x54   :  { %5604 = vrot.lane.b32.xlu1 %v5603_v32, %s5995_s26 }
  0x55   :  { %5599 = vrot.lane.b32.xlu0 %v5598_v30, %s5998_s7 }
  0x58   :  { %5614 = vrot.lane.b32.xlu1 %v5613_v37, %s5996_s18 }
  0x59   :  { %5609 = vrot.lane.b32.xlu0 %v5598_v30, %s5997_s21 }
  0x5c   :  { %5624 = vrot.lane.b32.xlu1 %v5623_v44, %s5998_s7 }
  0x5d   :  { %5619 = vrot.lane.b32.xlu0 %v5618_v43, %s5999_s11 }
  0x60   :  { %5634 = vrot.lane.b32.xlu1 %v5623_v44, %s5997_s21 }
  0x61   :  { %5629 = vrot.lane.b32.xlu0 %v5628_v48, %s5995_s26 }
  0x64   :  { %5644 = vrot.lane.b32.xlu1 %v5643_v52, %s5999_s11 }
  0x65   :  { %5639 = vrot.lane.b32.xlu0 %v5638_v31, %s5996_s18 }
  0x8a   :  { %v5455_v54 = vpop.permute.xlu1 %5454 }
  0x8b   :  { %v5450_v56 = vpop.permute.xlu0 %5449  ;;  %v5456_v24 = vunpack.i.l.bf16 %v5455_v54 }
  0x8c   :  { %v5452_v2 = vunpack.i.h.bf16 %v5450_v56  ;;  %v5451_v7 = vunpack.i.l.bf16 %v5450_v56 }
  0x8e   :  { %v5470_v59 = vpop.permute.xlu1 %5469 }
  0x8f   :  { %v5460_v58 = vpop.permute.xlu0 %5459  ;;  %v5471_v21 = vunpack.i.l.bf16 %v5470_v59 }
  0x90   :  { %v5462_v8 = vunpack.i.h.bf16 %v5460_v58  ;;  %v5461_v10 = vunpack.i.l.bf16 %v5460_v58 }
  0x92   :  { %v5485_v60 = vpop.permute.xlu1 %5484 }
  0x93   :  { %v5465_v61 = vpop.permute.xlu0 %5464  ;;  %v5487_v62 = vunpack.i.h.bf16 %v5485_v60  ;;  %v5486_v63 = vunpack.i.l.bf16 %v5485_v60 }
  0x94   :  { %v5467_v0 = vunpack.i.h.bf16 %v5465_v61  ;;  %v5466_v1 = vunpack.i.l.bf16 %v5465_v61 }
  0x95   :  { %v441_v12 = vsel %vm437_vm2, %v6056_v6, %v5487_v62  ;;  %v440_v13 = vsel %vm437_vm2, %v6052_v4, %v5486_v63  ;;  %v5472_v6 = vunpack.i.h.bf16 %v5470_v59 }
  0x96   :  { %v439_v14 = vsel %vm437_vm2, %v6050_v3, %v5467_v0  ;;  %v438_v15 = vsel %vm437_vm2, %v6054_v5, %v5466_v1  ;;  %v458_v16 = vsel %vm454_vm3, %v441_v12, %v5462_v8  ;;  %v457_v17 = vsel %vm454_vm3, %v440_v13, %v5461_v10  ;;  %v5490_v18 = vpop.permute.xlu1 %5489 }
  0x97   :  { %v456_v57 = vsel %vm454_vm3, %v439_v14, %v5452_v2  ;;  %v455_v9 = vsel %vm454_vm3, %v438_v15, %v5451_v7  ;;  %v5475_v20 = vpop.permute.xlu0 %5474  ;;  %v5457_v3 = vunpack.i.h.bf16 %v5455_v54  ;;  %v5492_v25 = vunpack.i.h.bf16 %v5490_v18 }
  0x98   :  { %v473_v4 = vsel %vm471_vm4, %v456_v57, %v5452_v2  ;;  %v472_v22 = vsel %vm471_vm4, %v455_v9, %v5451_v7  ;;  %v5491_v5 = vunpack.i.l.bf16 %v5490_v18  ;;  %v474_v26 = vsel %vm471_vm4, %v457_v17, %v5461_v10 }
  0x99   :  { %v475_v27 = vsel %vm471_vm4, %v458_v16, %v5462_v8  ;;  %v489_v30 = vsel %vm488_vm5, %v472_v22, %v5471_v21  ;;  %v490_v32 = vsel %vm488_vm5, %v473_v4, %v5472_v6  ;;  %v5477_v34 = vunpack.i.h.bf16 %v5475_v20 }
  0x9a   :  { %v5476_v37 = vunpack.i.l.bf16 %v5475_v20  ;;  %v506_v38 = vsel %vm505_vm6, %v489_v30, %v5456_v24  ;;  %v507_v39 = vsel %vm505_vm6, %v490_v32, %v5457_v3  ;;  %v5495_v42 = vpop.permute.xlu1 %5494  ;;  %v491_v48 = vsel %vm488_vm5, %v474_v26, %v5491_v5 }
  0x9b   :  { %v5480_v40 = vpop.permute.xlu0 %5479  ;;  %v523_v43 = vsel %vm522_vm7, %v506_v38, %v5456_v24  ;;  %v524_v44 = vsel %vm522_vm7, %v507_v39, %v5457_v3  ;;  %v492_v49 = vsel %vm488_vm5, %v475_v27, %v5492_v25  ;;  %v5497_v58 = vunpack.i.h.bf16 %v5495_v42 }
  0x9c   :  { %v5482_v46 = vunpack.i.h.bf16 %v5480_v40  ;;  %v5481_v47 = vunpack.i.l.bf16 %v5480_v40  ;;  %v540_v50 = vsel %vm539_vm8, %v523_v43, %v5476_v37  ;;  %v541_v31 = vsel %vm539_vm8, %v524_v44, %v5477_v34 }
  0x9d   :  { %v556_v52 = vpack.c.bf16 %v541_v31, %v540_v50  ;;  %v5496_v59 = vunpack.i.l.bf16 %v5495_v42 }
  0x9e   :  { %v509_v54 = vsel %vm505_vm6, %v492_v49, %v5482_v46  ;;  %v508_v56 = vsel %vm505_vm6, %v491_v48, %v5481_v47  ;;  %v5505_v61 = vpop.permute.xlu1 %5504 }
  0x9f   :  { %v5500_v60 = vpop.permute.xlu0 %5499  ;;  %v526_v62 = vsel %vm522_vm7, %v509_v54, %v5482_v46  ;;  %v525_v63 = vsel %vm522_vm7, %v508_v56, %v5481_v47  ;;  %4470 = vmatmul.mubr.msk.bf16.vlgmr.msra.gmra.mrb[0].mxu0 %vm594_vm9, %v556_v52  ;;  %v5507_v2 = vunpack.i.h.bf16 %v5505_v61  ;;  %v5506_v7 = vunpack.i.l.bf16 %v5505_v61 }
  0xa0   :  { %v5502_v0 = vunpack.i.h.bf16 %v5500_v60  ;;  %v5501_v1 = vunpack.i.l.bf16 %v5500_v60  ;;  %668 = vmatprep.mubr.bf16.mxu0 %v6000_v11  ;;  %v542_v12 = vsel %vm539_vm8, %v525_v63, %v5496_v59  ;;  %v543_v13 = vsel %vm539_vm8, %v526_v62, %v5497_v58 }
  0xa1   :  { %v557_v21 = vpack.c.bf16 %v543_v13, %v542_v12 }
  0xa2   :  { %v443_v8 = vsel %vm437_vm2, %v6096_v36, %v5502_v0  ;;  %v442_v10 = vsel %vm437_vm2, %v6087_v29, %v5501_v1  ;;  %v5515_v17 = vpop.permute.xlu1 %5514 }
  0xa3   :  { %v459_v14 = vsel %vm454_vm3, %v442_v10, %v5506_v7  ;;  %v460_v15 = vsel %vm454_vm3, %v443_v8, %v5507_v2  ;;  %v5510_v16 = vpop.permute.xlu0 %5509  ;;  %v5517_v36 = vunpack.i.h.bf16 %v5515_v17  ;;  %v5516_v6 = vunpack.i.l.bf16 %v5515_v17 }
  0xa4   :  { %v476_v57 = vsel %vm471_vm4, %v459_v14, %v5506_v7  ;;  %v477_v9 = vsel %vm471_vm4, %v460_v15, %v5507_v2  ;;  %v5512_v18 = vunpack.i.h.bf16 %v5510_v16  ;;  %v5511_v20 = vunpack.i.l.bf16 %v5510_v16 }
  0xa6   :  { %v493_v29 = vsel %vm488_vm5, %v476_v57, %v5511_v20  ;;  %v494_v4 = vsel %vm488_vm5, %v477_v9, %v5512_v18  ;;  %v5525_v25 = vpop.permute.xlu1 %5524 }
  0xa7   :  { %v510_v22 = vsel %vm505_vm6, %v493_v29, %v5516_v6  ;;  %v511_v3 = vsel %vm505_vm6, %v494_v4, %v5517_v36  ;;  %v5520_v24 = vpop.permute.xlu0 %5519  ;;  %4471 = vmatmul.mubr.msk.bf16.gmra.mrb[4].mxu0 %vm594_vm9, %v557_v21  ;;  %v5527_v32 = vunpack.i.h.bf16 %v5525_v25  ;;  %v5526_v34 = vunpack.i.l.bf16 %v5525_v25 }
  0xa8   :  { %v527_v5 = vsel %vm522_vm7, %v510_v22, %v5516_v6  ;;  %v528_v26 = vsel %vm522_vm7, %v511_v3, %v5517_v36  ;;  %v5522_v27 = vunpack.i.h.bf16 %v5520_v24  ;;  %v5521_v30 = vunpack.i.l.bf16 %v5520_v24  ;;  %678 = vmatprep.mubr.bf16.mxu0 %v6000_v11 }
  0xa9   :  { %v445_v39 = vsel %vm437_vm2, %v6126_v53, %v5527_v32  ;;  %v444_v40 = vsel %vm437_vm2, %v6124_v51, %v5526_v34 }
  0xaa   :  { %v544_v37 = vsel %vm539_vm8, %v527_v5, %v5521_v30  ;;  %v545_v38 = vsel %vm539_vm8, %v528_v26, %v5522_v27  ;;  %v5535_v43 = vpop.permute.xlu1 %5534 }
  0xab   :  { %v5530_v42 = vpop.permute.xlu0 %5529  ;;  %v5537_v47 = vunpack.i.h.bf16 %v5535_v43  ;;  %v5536_v48 = vunpack.i.l.bf16 %v5535_v43  ;;  %v558_v49 = vpack.c.bf16 %v545_v38, %v544_v37 }
  0xac   :  { %v5532_v44 = vunpack.i.h.bf16 %v5530_v42  ;;  %v5531_v46 = vunpack.i.l.bf16 %v5530_v42 }
  0xae   :  { %v462_v50 = vsel %vm454_vm3, %v445_v39, %v5532_v44  ;;  %v461_v31 = vsel %vm454_vm3, %v444_v40, %v5531_v46  ;;  %v5545_v53 = vpop.permute.xlu1 %5544 }
  0xaf   :  { %v479_v52 = vsel %vm471_vm4, %v462_v50, %v5532_v44  ;;  %v478_v54 = vsel %vm471_vm4, %v461_v31, %v5531_v46  ;;  %v5540_v56 = vpop.permute.xlu0 %5539  ;;  %4472 = vmatmul.mubr.msk.bf16.gmra.mrb[8].mxu0 %vm594_vm9, %v558_v49  ;;  %v5547_v61 = vunpack.i.h.bf16 %v5545_v53  ;;  %v5546_v62 = vunpack.i.l.bf16 %v5545_v53 }
  0xb0   :  { %v495_v58 = vsel %vm488_vm5, %v478_v54, %v5536_v48  ;;  %v496_v51 = vsel %vm488_vm5, %v479_v52, %v5537_v47  ;;  %v5542_v59 = vunpack.i.h.bf16 %v5540_v56  ;;  %v5541_v60 = vunpack.i.l.bf16 %v5540_v56  ;;  %688 = vmatprep.mubr.bf16.mxu0 %v6000_v11 }
  0xb2   :  { %v512_v63 = vsel %vm505_vm6, %v495_v58, %v5541_v60  ;;  %v513_v0 = vsel %vm505_vm6, %v496_v51, %v5542_v59  ;;  %v5555_v8 = vpop.permute.xlu1 %5554 }
  0xb3   :  { %v529_v1 = vsel %vm522_vm7, %v512_v63, %v5541_v60  ;;  %v530_v2 = vsel %vm522_vm7, %v513_v0, %v5542_v59  ;;  %v5550_v7 = vpop.permute.xlu0 %5549  ;;  %v5557_v16 = vunpack.i.h.bf16 %v5555_v8  ;;  %v5556_v17 = vunpack.i.l.bf16 %v5555_v8 }
  0xb4   :  { %v546_v10 = vsel %vm539_vm8, %v529_v1, %v5546_v62  ;;  %v547_v12 = vsel %vm539_vm8, %v530_v2, %v5547_v61  ;;  %v5552_v13 = vunpack.i.h.bf16 %v5550_v7  ;;  %v5551_v14 = vunpack.i.l.bf16 %v5550_v7 }
  0xb5   :  { %v559_v15 = vpack.c.bf16 %v547_v12, %v546_v10 }
  0xb6   :  { %v447_v57 = vsel %vm437_vm2, %v6191_v23, %v5552_v13  ;;  %v446_v9 = vsel %vm437_vm2, %v6182_v19, %v5551_v14  ;;  %v5565_v6 = vpop.permute.xlu1 %5564 }
  0xb7   :  { %v463_v18 = vsel %vm454_vm3, %v446_v9, %v5556_v17  ;;  %v464_v20 = vsel %vm454_vm3, %v447_v57, %v5557_v16  ;;  %v5560_v36 = vpop.permute.xlu0 %5559  ;;  %4473 = vmatmul.mubr.msk.bf16.gmra.mrb[12].mxu0 %vm594_vm9, %v559_v15  ;;  %v5567_v3 = vunpack.i.h.bf16 %v5565_v6  ;;  %v5566_v24 = vunpack.i.l.bf16 %v5565_v6 }
  0xb8   :  { %v480_v21 = vsel %vm471_vm4, %v463_v18, %v5556_v17  ;;  %v481_v29 = vsel %vm471_vm4, %v464_v20, %v5557_v16  ;;  %v5562_v4 = vunpack.i.h.bf16 %v5560_v36  ;;  %v5561_v22 = vunpack.i.l.bf16 %v5560_v36  ;;  %698 = vmatprep.mubr.bf16.mxu0 %v6000_v11 }
  0xba   :  { %v497_v19 = vsel %vm488_vm5, %v480_v21, %v5561_v22  ;;  %v498_v23 = vsel %vm488_vm5, %v481_v29, %v5562_v4  ;;  %v5575_v27 = vpop.permute.xlu1 %5574 }
  0xbb   :  { %v514_v25 = vsel %vm505_vm6, %v497_v19, %v5566_v24  ;;  %v515_v5 = vsel %vm505_vm6, %v498_v23, %v5567_v3  ;;  %v5570_v26 = vpop.permute.xlu0 %5569  ;;  %v5577_v38 = vunpack.i.h.bf16 %v5575_v27  ;;  %v5576_v39 = vunpack.i.l.bf16 %v5575_v27 }
  0xbc   :  { %v531_v30 = vsel %vm522_vm7, %v514_v25, %v5566_v24  ;;  %v532_v32 = vsel %vm522_vm7, %v515_v5, %v5567_v3  ;;  %v5572_v34 = vunpack.i.h.bf16 %v5570_v26  ;;  %v5571_v37 = vunpack.i.l.bf16 %v5570_v26 }
  0xbd   :  { %v449_v44 = vsel %vm437_vm2, %v6205_v33, %v5577_v38  ;;  %v448_v46 = vsel %vm437_vm2, %v6197_v28, %v5576_v39 }
  0xbe   :  { %v548_v40 = vsel %vm539_vm8, %v531_v30, %v5571_v37  ;;  %v549_v42 = vsel %vm539_vm8, %v532_v32, %v5572_v34  ;;  %v5585_v48 = vpop.permute.xlu1 %5584 }
  0xbf   :  { %v560_v43 = vpack.c.bf16 %v549_v42, %v548_v40  ;;  %v5580_v47 = vpop.permute.xlu0 %5579  ;;  %v5587_v31 = vunpack.i.h.bf16 %v5585_v48  ;;  %v5586_v52 = vunpack.i.l.bf16 %v5585_v48 }
  0xc0   :  { %v5582_v49 = vunpack.i.h.bf16 %v5580_v47  ;;  %v5581_v50 = vunpack.i.l.bf16 %v5580_v47 }
  0xc1   :  { %4474 = vmatmul.mubr.msk.bf16.gmra.mrb[16].mxu0 %vm594_vm9, %v560_v43 }
  0xc2   :  { %v466_v54 = vsel %vm454_vm3, %v449_v44, %v5582_v49  ;;  %v465_v56 = vsel %vm454_vm3, %v448_v46, %v5581_v50  ;;  %708 = vmatprep.mubr.bf16.mxu0 %v6000_v11  ;;  %v5595_v28 = vpop.permute.xlu1 %5594 }
  0xc3   :  { %v483_v53 = vsel %vm471_vm4, %v466_v54, %v5582_v49  ;;  %v482_v33 = vsel %vm471_vm4, %v465_v56, %v5581_v50  ;;  %v5590_v58 = vpop.permute.xlu0 %5589  ;;  %v5597_v62 = vunpack.i.h.bf16 %v5595_v28  ;;  %v5596_v63 = vunpack.i.l.bf16 %v5595_v28 }
  0xc4   :  { %v499_v51 = vsel %vm488_vm5, %v482_v33, %v5586_v52  ;;  %v500_v59 = vsel %vm488_vm5, %v483_v53, %v5587_v31  ;;  %v5592_v60 = vunpack.i.h.bf16 %v5590_v58  ;;  %v5591_v61 = vunpack.i.l.bf16 %v5590_v58 }
  0xc6   :  { %v516_v0 = vsel %vm505_vm6, %v499_v51, %v5591_v61  ;;  %v517_v1 = vsel %vm505_vm6, %v500_v59, %v5592_v60  ;;  %v5605_v10 = vpop.permute.xlu1 %5604 }
  0xc7   :  { %v533_v2 = vsel %vm522_vm7, %v516_v0, %v5591_v61  ;;  %v534_v7 = vsel %vm522_vm7, %v517_v1, %v5592_v60  ;;  %v5600_v8 = vpop.permute.xlu0 %5599  ;;  %v5607_v17 = vunpack.i.h.bf16 %v5605_v10  ;;  %v5606_v57 = vunpack.i.l.bf16 %v5605_v10  ;;  %v5659_v10 = vld [vmem:[#allocation3 + $0x40] sm:$0xff]  }
  0xc8   :  { %v550_v12 = vsel %vm539_vm8, %v533_v2, %v5596_v63  ;;  %v551_v13 = vsel %vm539_vm8, %v534_v7, %v5597_v62  ;;  %v5602_v14 = vunpack.i.h.bf16 %v5600_v8  ;;  %v5601_v15 = vunpack.i.l.bf16 %v5600_v8  ;;  %v5657_v7 = vld [vmem:[#allocation3 + $0xc8] sm:$0xff]   ;;  %v5658_v8 = vld [vmem:[#allocation3 + $0xd0] sm:$0xff]   ;;  %5006 = vmatprep.subr.bf16.mxu0 %v5659_v10 }
  0xc9   :  { %v561_v16 = vpack.c.bf16 %v551_v13, %v550_v12  ;;  %5104 = vmatprep.subr.bf16.mxu1 %v5657_v7  ;;  %v5660_v12 = vld [vmem:[#allocation3 + $0xd8] sm:$0xff]   ;;  %5007 = vmatpush3.bf16.msra.mxu0 %v5659_v10  ;;  %v5661_v13 = vld [vmem:[#allocation3 + $0x48] sm:$0xff]  }
  0xca   :  { %v451_v9 = vsel %vm437_vm2, %v6213_v41, %v5602_v14  ;;  %v450_v18 = vsel %vm437_vm2, %v6207_v35, %v5601_v15  ;;  %v5615_v21 = vpop.permute.xlu1 %5614  ;;  %5105 = vmatpush3.bf16.msra.mxu1 %v5657_v7  ;;  %5008 = vmatprep.subr.bf16.mxu0 %v5661_v13  ;;  %v5662_v14 = vld [vmem:[#allocation3 + $0xe0] sm:$0xff]   ;;  %v5663_v15 = vld [vmem:[#allocation3 + $0x50] sm:$0xff]  }
  0xcb   :  { %v467_v20 = vsel %vm454_vm3, %v450_v18, %v5606_v57  ;;  %v468_v36 = vsel %vm454_vm3, %v451_v9, %v5607_v17  ;;  %v5610_v6 = vpop.permute.xlu0 %5609  ;;  %4475 = vmatmul.mubr.msk.bf16.gmra.mrb[20].mxu0 %vm594_vm9, %v561_v16  ;;  %v5617_v41 = vunpack.i.h.bf16 %v5615_v21  ;;  %v5616_v24 = vunpack.i.l.bf16 %v5615_v21  ;;  %5106 = vmatprep.subr.bf16.mxu1 %v5658_v8  ;;  %v5664_v16 = vld [vmem:[#allocation3 + $0xe8] sm:$0xff]   ;;  %v5668_v9 = vld [vmem:[#allocation3 + $0x60] sm:$0xff]   ;;  %v5669_v18 = vld [vmem:[#allocation3 + $0xf8] sm:$0xff]  }
  0xcc   :  { %v484_v29 = vsel %vm471_vm4, %v467_v20, %v5606_v57  ;;  %v485_v4 = vsel %vm471_vm4, %v468_v36, %v5607_v17  ;;  %v5612_v22 = vunpack.i.h.bf16 %v5610_v6  ;;  %v5611_v3 = vunpack.i.l.bf16 %v5610_v6  ;;  %718 = vmatprep.mubr.bf16.mxu0 %v6000_v11  ;;  %v5665_v17 = vld [vmem:[#allocation3 + $0x58] sm:$0xff]   ;;  %v5666_v57 = vld [vmem:[#allocation3 + $0xf0] sm:$0xff]   ;;  %v5670_v20 = vld [vmem:[#allocation3 + $0x68] sm:$0xff]  }
  0xcd   :  { %5009 = vmatpush3.bf16.msra.mxu0 %v5661_v13  ;;  %v5672_v36 = vld [vmem:[#allocation3 + $0x70] sm:$0xff]   ;;  %v5677_v6 = vld [vmem:[#allocation3 + $0x78] sm:$0xff]   ;;  %v6441_v21 = vld [vmem:[#allocation3 + $0x100] sm:$0xff]  }
  0xce   :  { %v501_v35 = vsel %vm488_vm5, %v484_v29, %v5611_v3  ;;  %v502_v19 = vsel %vm488_vm5, %v485_v4, %v5612_v22  ;;  %v5625_v26 = vpop.permute.xlu1 %5624  ;;  %5107 = vmatpush3.bf16.msra.mxu1 %v5658_v8  ;;  %5010 = vmatprep.subr.bf16.mxu0 %v5663_v15  ;;  %v6444_v29 = vld [vmem:[#allocation3] sm:$0xff]   ;;  %v739_v4 = vlaneseq }
  0xcf   :  { %v518_v23 = vsel %vm505_vm6, %v501_v35, %v5616_v24  ;;  %v519_v25 = vsel %vm505_vm6, %v502_v19, %v5617_v41  ;;  %v5620_v5 = vpop.permute.xlu0 %5619  ;;  %v5627_v37 = vunpack.i.h.bf16 %v5625_v26  ;;  %v5626_v38 = vunpack.i.l.bf16 %v5625_v26  ;;  %5108 = vmatprep.subr.bf16.mxu1 %v5660_v12 }
  0xd0   :  { %v535_v27 = vsel %vm522_vm7, %v518_v23, %v5616_v24  ;;  %v536_v30 = vsel %vm522_vm7, %v519_v25, %v5617_v41  ;;  %v5622_v32 = vunpack.i.h.bf16 %v5620_v5  ;;  %v5621_v34 = vunpack.i.l.bf16 %v5620_v5  ;;  %v982_v41 = vld [vmem:[#allocation2] sm:$0x1f]  ;;  %v33_v24 = vld [vmem:[%s7034_s3] sm:$0xff] }
  0xd1   :  { %v453_v43 = vsel %vm437_vm2, %v6227_v55, %v5627_v37  ;;  %v452_v44 = vsel %vm437_vm2, %v6218_v45, %v5626_v38  ;;  %5011 = vmatpush3.bf16.msra.mxu0 %v5663_v15  ;;  %v6447_v22 = vshrl.u32 %v739_v4, 7  ;;  %v4478_v19 = vcombine.low %v982_v41, %v982_v41 }
  0xd2   :  { %v552_v39 = vsel %vm539_vm8, %v535_v27, %v5621_v34  ;;  %v553_v40 = vsel %vm539_vm8, %v536_v30, %v5622_v32  ;;  %v5635_v47 = vpop.permute.xlu1 %5634  ;;  %5109 = vmatpush3.bf16.msra.mxu1 %v5660_v12  ;;  %5012 = vmatprep.subr.bf16.mxu0 %v5665_v17 }
  0xd3   :  { %v562_v42 = vpack.c.bf16 %v553_v40, %v552_v39  ;;  %v5630_v46 = vpop.permute.xlu0 %5629  ;;  %v5637_v50 = vunpack.i.h.bf16 %v5635_v47  ;;  %v5636_v31 = vunpack.i.l.bf16 %v5635_v47  ;;  %5110 = vmatprep.subr.bf16.mxu1 %v5662_v14  ;;  %v741_v3 = vsub.s32 0, %v6447_v22  ;;  %v6465_v40 = vld [vmem:[#allocation2 + $0x50] sm:$0x1f] }
  0xd4   :  { %v5632_v48 = vunpack.i.h.bf16 %v5630_v46  ;;  %v5631_v49 = vunpack.i.l.bf16 %v5630_v46  ;;  %v777_v35 = vsub.s32 3, %v6447_v22  ;;  %v1082_v26 = vshrl.u32 %v4478_v19, 16 }
  0xd5   :  { %4476 = vmatmul.mubr.msk.bf16.gmra.mrb[24].mxu0 %vm594_vm9, %v562_v42  ;;  %v6454_v23 = vrot.slane %v33_v24, %v741_v3  ;;  %v1085_v32 = vshll.u32 %v4478_v19, 16 }
  0xd6   :  { %v470_v52 = vsel %vm454_vm3, %v453_v43, %v5632_v48  ;;  %v469_v54 = vsel %vm454_vm3, %v452_v44, %v5631_v49  ;;  %728 = vmatprep.mubr.bf16.mxu0 %v6000_v11  ;;  %v5645_v45 = vpop.permute.xlu1 %5644  ;;  %5111 = vmatpush3.bf16.msra.mxu1 %v5662_v14  ;;  %v6456_v25 = vrot.slane %v33_v24, %v777_v35  ;;  %v1084_v42 = vrot.slane %v1082_v26, 4 }
  0xd7   :  { %v487_v56 = vsel %vm471_vm4, %v470_v52, %v5632_v48  ;;  %v486_v55 = vsel %vm471_vm4, %v469_v54, %v5631_v49  ;;  %v5640_v53 = vpop.permute.xlu0 %5639  ;;  %v5647_v59 = vunpack.i.h.bf16 %v5645_v45  ;;  %v5646_v60 = vunpack.i.l.bf16 %v5645_v45  ;;  %5112 = vmatprep.subr.bf16.mxu1 %v5664_v16  ;;  %5013 = vmatpush3.bf16.msra.mxu0 %v5665_v17 }
  0xd8   :  { %v503_v33 = vsel %vm488_vm5, %v486_v55, %v5636_v31  ;;  %v504_v58 = vsel %vm488_vm5, %v487_v56, %v5637_v50  ;;  %v5642_v28 = vunpack.i.h.bf16 %v5640_v53  ;;  %v5641_v51 = vunpack.i.l.bf16 %v5640_v53  ;;  %5014 = vmatprep.subr.bf16.mxu0 %v5668_v9 }
  0xd9   :  { %v1087_v46 = vrot.slane %v1085_v32, 5  ;;  %v4494_v48 = vcombine.low %v6465_v40, %v6465_v40  ;;  %v4479_v56 = vcombine.high %v982_v41, %v982_v41  ;;  %v4495_v41 = vcombine.high %v6465_v40, %v6465_v40 }
  0xda   :  { %v520_v61 = vsel %vm505_vm6, %v503_v33, %v5641_v51  ;;  %v521_v62 = vsel %vm505_vm6, %v504_v58, %v5642_v28  ;;  %5113 = vmatpush3.bf16.msra.mxu1 %v5664_v16 }
  0xdb   :  { %v537_v11 = vsel %vm522_vm7, %v520_v61, %v5641_v51  ;;  %v538_v63 = vsel %vm522_vm7, %v521_v62, %v5642_v28  ;;  %5114 = vmatprep.subr.bf16.mxu1 %v5666_v57  ;;  %5015 = vmatpush3.bf16.msra.mxu0 %v5668_v9  ;;  %v1088_v33 = vor.u32 %v1087_v46, %v1084_v42 }
  0xdc   :  { %v554_v0 = vsel %vm539_vm8, %v537_v11, %v5646_v60  ;;  %v555_v1 = vsel %vm539_vm8, %v538_v63, %v5647_v59  ;;  %5016 = vmatprep.subr.bf16.mxu0 %v5670_v20  ;;  %v1194_v59 = vshrl.u32 %v4494_v48, 16  ;;  %v1197_v60 = vshll.u32 %v4494_v48, 16 }
  0xdd   :  { %v563_v2 = vpack.c.bf16 %v555_v1, %v554_v0  ;;  %v1091_v0 = vshll.u32 %v4479_v56, 16  ;;  %v1089_v13 = vrot.slane %v1088_v33, 4  ;;  %vm1787_vm8 = vcmask 1042432  }
  0xde   :  { %5115 = vmatpush3.bf16.msra.mxu1 %v5666_v57  ;;  %v1196_v8 = vrot.slane %v1194_v59, 4  ;;  %v1199_v10 = vrot.slane %v1197_v60, 5 }
  0xdf   :  { %4477 = vmatmul.mubr.msk.bf16.gmra.mrb[28].mxu0 %vm594_vm9, %v563_v2  ;;  %5116 = vmatprep.subr.bf16.mxu1 %v5669_v18  ;;  %v1093_v57 = vrot.slane %v1091_v0, 5  ;;  %vm1788_vm9 = vcmask 1046532  }
  0xe0   :  { %5017 = vmatpush3.bf16.msra.mxu0 %v5670_v20  ;;  %v1200_v24 = vor.u32 %v1199_v10, %v1196_v8 }
  0xe1   :  { %5018 = vmatprep.subr.bf16.mxu0 %v5672_v36 }
  0xe2   :  { %5117 = vmatpush3.bf16.msra.mxu1 %v5669_v18 }
  0xe3   :  { %5134 = vmatprep.subr.bf16.mxu1 %v6441_v21 }
  0xe4   :  { %5019 = vmatpush3.bf16.msra.mxu0 %v5672_v36 }
  0xe5   :  { %5020 = vmatprep.subr.bf16.mxu0 %v5677_v6 }
  0xe8   :  { %5021 = vmatpush3.bf16.msra.mxu0 %v5677_v6 }
  0xe9   :  { %5038 = vmatprep.subr.bf16.mxu0 %v6444_v29 }
 0x172   :  { %v660_v5 = vpop.f32.mrb[0].mxu0 }
 0x173   :  { %v743_v27 = vadd.f32 %v6454_v23, %v660_v5  ;;  %v6459_v30 = vpop.f32.mrb[1].mxu0 }
 0x174   :  { %v664_v34 = vpop.f32.mrb[2].mxu0 }
 0x175   :  { %vm759_vm10 = vcmp.gt.f32.partialorder %v743_v27, 0.0  ;;  %v779_v37 = vmul.f32 %v6456_v25, %v743_v27  ;;  %v744_v38 = vadd.f32 %v6454_v23, %v664_v34  ;;  %v6463_v39 = vpop.f32.mrb[3].mxu0 }
 0x177   :  { %v795_v43 = vsel %vm759_vm10, %v743_v27, %v779_v37  ;;  %vm760_vm12 = vcmp.gt.f32.partialorder %v744_v38, 0.0  ;;  %v780_v44 = vmul.f32 %v6456_v25, %v744_v38 }
 0x178   :  { %v847_v47 = vrot.slane %v795_v43, 7 }
 0x179   :  { %v796_v49 = vsel %vm760_vm12, %v744_v38, %v780_v44  ;;  %v6502_v38 = vsel %vm6488_vm1, %v1089_v13, %v1093_v57 }
 0x17a   :  { %v880_v50 = vsel %vm879_vm11, 0.0, %v847_v47  ;;  %v896_v31 = vsel %vm879_vm11, %v847_v47, 0.0  ;;  %v848_v52 = vrot.slane %v796_v49, 7  ;;  %v670_v54 = vpop.f32.mrb[4].mxu0  ;;  %v6505_v49 = vshll.u32 %v4495_v41, 16 }
 0x17b   :  { %v912_v55 = vpack.c.bf16 %v896_v31, %v880_v50  ;;  %v745_v53 = vadd.f32 %v6454_v23, %v670_v54  ;;  %v6473_v45 = vpop.f32.mrb[5].mxu0  ;;  %v6507_v54 = vrot.slane %v1200_v24, 4 }
 0x17c   :  { %v881_v58 = vsel %vm879_vm11, 0.0, %v848_v52  ;;  %v897_v28 = vsel %vm879_vm11, %v848_v52, 0.0  ;;  %v674_v51 = vpop.f32.mrb[6].mxu0  ;;  %v1205_v57 = vrot.slane %v6505_v49, 5 }
 0x17d   :  { %929 = vst [vmem:[#allocation2 + $0x8] sm:$0xff] %v912_v55  ;;  %v913_v61 = vpack.c.bf16 %v897_v28, %v881_v58  ;;  %vm761_vm13 = vcmp.gt.f32.partialorder %v745_v53, 0.0  ;;  %v781_v62 = vmul.f32 %v6456_v25, %v745_v53  ;;  %v746_v11 = vadd.f32 %v6454_v23, %v674_v51  ;;  %v6479_v63 = vpop.f32.mrb[7].mxu0 }
 0x17f   :  { %930 = vst [vmem:[#allocation2 + $0x10] sm:$0xff] %v913_v61  ;;  %v797_v1 = vsel %vm761_vm13, %v745_v53, %v781_v62  ;;  %vm762_vm14 = vcmp.gt.f32.partialorder %v746_v11, 0.0  ;;  %v782_v2 = vmul.f32 %v6456_v25, %v746_v11  ;;  %vm6606_vm13 = vmor %vm1787_vm8, %vm1788_vm9 }
 0x180   :  { %v849_v7 = vrot.slane %v797_v1, 7 }
 0x181   :  { %v798_v12 = vsel %vm762_vm14, %v746_v11, %v782_v2 }
 0x182   :  { %v882_v14 = vsel %vm879_vm11, 0.0, %v849_v7  ;;  %v898_v15 = vsel %vm879_vm11, %v849_v7, 0.0  ;;  %v850_v16 = vrot.slane %v798_v12, 7  ;;  %v680_v17 = vpop.f32.mrb[8].mxu0 }
 0x183   :  { %v914_v9 = vpack.c.bf16 %v898_v15, %v882_v14  ;;  %v747_v18 = vadd.f32 %v6454_v23, %v680_v17  ;;  %v6485_v20 = vpop.f32.mrb[9].mxu0 }
 0x184   :  { %v883_v6 = vsel %vm879_vm11, 0.0, %v850_v16  ;;  %v899_v4 = vsel %vm879_vm11, %v850_v16, 0.0  ;;  %v684_v3 = vpop.f32.mrb[10].mxu0  ;;  %v983_v27 = vld [vmem:[#allocation2 + $0x8] sm:$0x1f] }
 0x185   :  { %931 = vst [vmem:[#allocation2 + $0x18] sm:$0xff] %v914_v9  ;;  %v915_v35 = vpack.c.bf16 %v899_v4, %v883_v6  ;;  %vm763_vm2 = vcmp.gt.f32.partialorder %v747_v18, 0.0  ;;  %v783_v19 = vmul.f32 %v6456_v25, %v747_v18  ;;  %v748_v5 = vadd.f32 %v6454_v23, %v684_v3  ;;  %v6498_v26 = vpop.f32.mrb[11].mxu0  ;;  %v5698_v9 = vld [vmem:[#allocation3 + $0x108] sm:$0xff]  }
 0x186   :  { %v5667_v32 = vld [vmem:[#allocation2 + $0x8] ss:$8 sps:$4 sm:$0xff]   ;;  %v4480_v34 = vcombine.low %v983_v27, %v983_v27  ;;  %v4481_v37 = vcombine.high %v983_v27, %v983_v27 }
 0x187   :  { %v984_v42 = vld [vmem:[#allocation2 + $0x10] sm:$0x1f]  ;;  %932 = vst [vmem:[#allocation2 + $0x20] sm:$0xff] %v915_v35  ;;  %v799_v40 = vsel %vm763_vm2, %v747_v18, %v783_v19  ;;  %vm764_vm3 = vcmp.gt.f32.partialorder %v748_v5, 0.0  ;;  %v784_v43 = vmul.f32 %v6456_v25, %v748_v5  ;;  %5118 = vmatprep.mubr.bf16.mxu1 %v5667_v32 }
 0x188   :  { %v4482_v44 = vcombine.low %v984_v42, %v984_v42  ;;  %v851_v46 = vrot.slane %v799_v40, 7  ;;  %v1096_v47 = vshrl.u32 %v4480_v34, 16  ;;  %v1099_v48 = vshll.u32 %v4480_v34, 16 }
 0x189   :  { %v800_v50 = vsel %vm764_vm3, %v748_v5, %v784_v43  ;;  %v1105_v31 = vshll.u32 %v4481_v37, 16  ;;  %v4483_v1 = vcombine.high %v984_v42, %v984_v42  ;;  %v5700_v43 = vld [vmem:[#allocation3 + $0x110] sm:$0xff]  }
 0x18a   :  { %v1110_v52 = vshrl.u32 %v4482_v44, 16  ;;  %v884_v56 = vsel %vm879_vm11, 0.0, %v851_v46  ;;  %v900_v55 = vsel %vm879_vm11, %v851_v46, 0.0  ;;  %v852_v53 = vrot.slane %v800_v50, 7  ;;  %v690_v33 = vpop.f32.mrb[12].mxu0 }
 0x18b   :  { %v1098_v58 = vrot.slane %v1096_v47, 4  ;;  %v916_v28 = vpack.c.bf16 %v900_v55, %v884_v56  ;;  %v749_v51 = vadd.f32 %v6454_v23, %v690_v33  ;;  %v6512_v59 = vpop.f32.mrb[13].mxu0  ;;  %v1101_v60 = vrot.slane %v1099_v48, 5 }
 0x18c   :  { %v1113_v61 = vshll.u32 %v4482_v44, 16  ;;  %v885_v62 = vsel %vm879_vm11, 0.0, %v852_v53  ;;  %v901_v11 = vsel %vm879_vm11, %v852_v53, 0.0  ;;  %v694_v0 = vpop.f32.mrb[14].mxu0  ;;  %v1112_v2 = vrot.slane %v1110_v52, 4 }
 0x18d   :  { %933 = vst [vmem:[#allocation2 + $0x28] sm:$0xff] %v916_v28  ;;  %v917_v7 = vpack.c.bf16 %v901_v11, %v885_v62  ;;  %vm765_vm4 = vcmp.gt.f32.partialorder %v749_v51, 0.0  ;;  %v785_v8 = vmul.f32 %v6456_v25, %v749_v51  ;;  %v750_v10 = vadd.f32 %v6454_v23, %v694_v0  ;;  %v6518_v12 = vpop.f32.mrb[15].mxu0  ;;  %v985_v13 = vld [vmem:[#allocation2 + $0x18] sm:$0x1f] }
 0x18e   :  { %v5671_v14 = vld [vmem:[#allocation2 + $0x18] ss:$8 sps:$4 sm:$0xff]   ;;  %v1102_v15 = vor.u32 %v1101_v60, %v1098_v58  ;;  %v4484_v16 = vcombine.low %v985_v13, %v985_v13  ;;  %v4485_v17 = vcombine.high %v985_v13, %v985_v13  ;;  %v1115_v4 = vrot.slane %v1113_v61, 5 }
 0x18f   :  { %934 = vst [vmem:[#allocation2 + $0x30] sm:$0xff] %v917_v7  ;;  %v801_v18 = vsel %vm765_vm4, %v749_v51, %v785_v8  ;;  %vm766_vm5 = vcmp.gt.f32.partialorder %v750_v10, 0.0  ;;  %v786_v6 = vmul.f32 %v6456_v25, %v750_v10  ;;  %5119 = vmatmul.mubr.bf16.vlgmr.msra.gmra.mrb[0].mxu1 %v5671_v14  ;;  %v1107_v24 = vrot.slane %v1105_v31, 5  ;;  %v6527_v44 = vld [vmem:[#allocation2] sm:$0x1e]  ;;  %v5702_v61 = vld [vmem:[#allocation3 + $0x118] sm:$0xff]  }
 0x190   :  { %v853_v3 = vrot.slane %v801_v18, 7  ;;  %v1103_v41 = vrot.slane %v1102_v15, 4  ;;  %v1124_v35 = vshrl.u32 %v4484_v16, 16  ;;  %v1116_v5 = vor.u32 %v1115_v4, %v1112_v2  ;;  %5135 = vmatpush3.bf16.msra.mxu1 %v6441_v21  ;;  %v986_v52 = vld [vmem:[#allocation2 + $0x20] sm:$0x1f] }
 0x191   :  { %v802_v19 = vsel %vm766_vm5, %v750_v10, %v786_v6  ;;  %v1119_v27 = vshll.u32 %v4483_v1, 16  ;;  %v1127_v32 = vshll.u32 %v4484_v16, 16  ;;  %5136 = vmatprep.subr.bf16.mxu1 %v5698_v9  ;;  %v1133_v31 = vshll.u32 %v4485_v17, 16 }
 0x192   :  { %v886_v34 = vsel %vm879_vm11, 0.0, %v853_v3  ;;  %v902_v37 = vsel %vm879_vm11, %v853_v3, 0.0  ;;  %v854_v42 = vrot.slane %v802_v19, 7  ;;  %v1108_v40 = vsel %vm6488_vm1, %v1103_v41, %v1107_v24  ;;  %v5709_v19 = vld [vmem:[#allocation3 + $0x120] sm:$0xff]  }
 0x193   :  { %v918_v46 = vpack.c.bf16 %v902_v37, %v886_v34  ;;  %v4510_v47 = vcombine.low %v6502_v38, %v1108_v40  ;;  %v1117_v50 = vrot.slane %v1116_v5, 4  ;;  %v1126_v33 = vrot.slane %v1124_v35, 4  ;;  %v5707_v37 = vld [vmem:[#allocation3 + $0x8] sm:$0xff]  }
 0x194   :  { %v700_v48 = vpop.f32.mrb[16].mxu0  ;;  %v887_v21 = vsel %vm879_vm11, 0.0, %v854_v42  ;;  %v903_v56 = vsel %vm879_vm11, %v854_v42, 0.0  ;;  %v1121_v51 = vrot.slane %v1119_v27, 5  ;;  %v1129_v60 = vrot.slane %v1127_v32, 5  ;;  %5137 = vmatpush3.bf16.msra.mxu1 %v5698_v9 }
 0x195   :  { %v751_v55 = vadd.f32 %v6454_v23, %v700_v48  ;;  %v6533_v53 = vpop.f32.mrb[17].mxu0  ;;  %935 = vst [vmem:[#allocation2 + $0x38] sm:$0xff] %v918_v46  ;;  %v919_v58 = vpack.c.bf16 %v903_v56, %v887_v21  ;;  %5022 = vmatprep.mubr.bf16.mxu0 %v4510_v47  ;;  %v6535_v38 = vld [vmem:[#allocation2 + $0x28] sm:$0x1f]  ;;  %v4542_v62 = vcombine.low %v6527_v44, %v6527_v44  ;;  %v1135_v13 = vrot.slane %v1133_v31, 5 }
 0x196   :  { %v704_v28 = vpop.f32.mrb[18].mxu0  ;;  %v5678_v2 = vld [vmem:[#allocation2 + $0x28] ss:$8 sps:$4 sm:$0xff]   ;;  %v4486_v7 = vcombine.low %v986_v52, %v986_v52  ;;  %5138 = vmatprep.subr.bf16.mxu1 %v5700_v43  ;;  %v1122_v8 = vsel %vm6488_vm1, %v1117_v50, %v1121_v51  ;;  %v1130_v10 = vor.u32 %v1129_v60, %v1126_v33  ;;  %v4543_v14 = vcombine.high %v6527_v44, %v6527_v44 }
 0x197   :  { %vm767_vm6 = vcmp.gt.f32.partialorder %v751_v55, 0.0  ;;  %v787_v11 = vmul.f32 %v6456_v25, %v751_v55  ;;  %v752_v0 = vadd.f32 %v6454_v23, %v704_v28  ;;  %v6541_v1 = vpop.f32.mrb[19].mxu0  ;;  %936 = vst [vmem:[#allocation2 + $0x40] sm:$0xff] %v919_v58  ;;  %5122 = vmatprep.mubr.bf16.mxu1 %v5678_v2  ;;  %v4488_v17 = vcombine.low %v6535_v38, %v6535_v38  ;;  %v6556_v46 = vld [vmem:[#allocation2 + $0x30] sm:$0x1f]  ;;  %v5711_v47 = vld [vmem:[#allocation3 + $0x128] sm:$0xff]  }
 0x198   :  { %v1131_v18 = vrot.slane %v1130_v10, 4  ;;  %v4487_v6 = vcombine.high %v986_v52, %v986_v52  ;;  %v1138_v4 = vshrl.u32 %v4486_v7, 16  ;;  %5139 = vmatpush3.bf16.msra.mxu1 %v5700_v43  ;;  %v4489_v41 = vcombine.high %v6535_v38, %v6535_v38 }
 0x199   :  { %v803_v15 = vsel %vm767_vm6, %v751_v55, %v787_v11  ;;  %vm768_vm7 = vcmp.gt.f32.partialorder %v752_v0, 0.0  ;;  %v788_v16 = vmul.f32 %v6456_v25, %v752_v0  ;;  %v1141_v24 = vshll.u32 %v4486_v7, 16  ;;  %5140 = vmatprep.subr.bf16.mxu1 %v5702_v61  ;;  %v5710_v7 = vld [vmem:[#allocation3 + $0x10] sm:$0xff]  }
 0x19a   :  { %v855_v9 = vrot.slane %v803_v15, 7  ;;  %v1152_v35 = vshrl.u32 %v4488_v17, 16  ;;  %v1136_v34 = vsel %vm6488_vm1, %v1131_v18, %v1135_v13  ;;  %v1140_v43 = vrot.slane %v1138_v4, 4 }
 0x19b   :  { %v804_v3 = vsel %vm768_vm7, %v752_v0, %v788_v16  ;;  %v4511_v40 = vcombine.low %v1122_v8, %v1136_v34  ;;  %v1143_v44 = vrot.slane %v1141_v24, 5  ;;  %v1147_v52 = vshll.u32 %v4487_v6, 16 }
 0x19c   :  { %v888_v5 = vsel %vm879_vm11, 0.0, %v855_v9  ;;  %v904_v27 = vsel %vm879_vm11, %v855_v9, 0.0  ;;  %v856_v32 = vrot.slane %v804_v3, 7  ;;  %v6560_v21 = vld [vmem:[#allocation2 + $0x38] sm:$0x1f]  ;;  %v6567_v56 = vsel %vm6488_vm1, %v6507_v54, %v1205_v57  ;;  %5141 = vmatpush3.bf16.msra.mxu1 %v5702_v61  ;;  %v5717_v9 = vld [vmem:[#allocation3 + $0x130] sm:$0xff]  }
 0x19d   :  { %v920_v42 = vpack.c.bf16 %v904_v27, %v888_v5  ;;  %5023 = vmatmul.mubr.bf16.vlgmr.msra.gmra.mrb[32].mxu0 %v4511_v40  ;;  %v1144_v51 = vor.u32 %v1143_v44, %v1140_v43  ;;  %v1155_v60 = vshll.u32 %v4488_v17, 16  ;;  %5142 = vmatprep.subr.bf16.mxu1 %v5709_v19  ;;  %v1154_v38 = vrot.slane %v1152_v35, 4 }
 0x19e   :  { %v889_v48 = vsel %vm879_vm11, 0.0, %v856_v32  ;;  %v905_v50 = vsel %vm879_vm11, %v856_v32, 0.0  ;;  %v710_v31 = vpop.f32.mrb[20].mxu0  ;;  %v5683_v28 = vld [vmem:[#allocation2 + $0x38] ss:$8 sps:$4 sm:$0xff]   ;;  %v1161_v11 = vshll.u32 %v4489_v41, 16  ;;  %v4490_v54 = vcombine.low %v6556_v46, %v6556_v46  ;;  %5039 = vmatpush3.bf16.msra.mxu0 %v6444_v29 }
 0x19f   :  { %937 = vst [vmem:[#allocation2 + $0x58] sm:$0xff] %v920_v42  ;;  %v921_v55 = vpack.c.bf16 %v905_v50, %v889_v48  ;;  %v753_v33 = vadd.f32 %v6454_v23, %v710_v31  ;;  %v6570_v58 = vpop.f32.mrb[21].mxu0  ;;  %v6575_v57 = vrot.slane %v4542_v62, 9  ;;  %5123 = vmatmul.mubr.bf16.gmra.mrb[4].mxu1 %v5683_v28  ;;  %5040 = vmatprep.subr.bf16.mxu0 %v5707_v37  ;;  %v6581_v8 = vrot.slane %v4543_v14, 5 }
 0x1a0   :  { %v714_v49 = vpop.f32.mrb[22].mxu0  ;;  %v1149_v10 = vrot.slane %v1147_v52, 5  ;;  %v1157_v13 = vrot.slane %v1155_v60, 5  ;;  %v4491_v29 = vcombine.high %v6556_v46, %v6556_v46  ;;  %v6587_v62 = vcombine.low %v6560_v21, %v6560_v21  ;;  %5143 = vmatpush3.bf16.msra.mxu1 %v5709_v19  ;;  %v5712_v19 = vld [vmem:[#allocation3 + $0x18] sm:$0xff]  }
 0x1a1   :  { %938 = vst [vmem:[#allocation2 + $0x60] sm:$0xff] %v921_v55  ;;  %vm769_vm10 = vcmp.gt.f32.partialorder %v753_v33, 0.0  ;;  %v789_v61 = vmul.f32 %v6456_v25, %v753_v33  ;;  %v754_v0 = vadd.f32 %v6454_v23, %v714_v49  ;;  %v6579_v2 = vpop.f32.mrb[23].mxu0  ;;  %v1145_v17 = vrot.slane %v1144_v51, 4  ;;  %5144 = vmatprep.subr.bf16.mxu1 %v5711_v47  ;;  %v5724_v46 = vld [vmem:[#allocation3 + $0x138] sm:$0xff]   ;;  %v5719_v49 = vld [vmem:[#allocation3 + $0x20] sm:$0xff]  }
 0x1a2   :  { %v1158_v14 = vor.u32 %v1157_v13, %v1154_v38  ;;  %v1163_v6 = vrot.slane %v1161_v11, 5  ;;  %v1166_v4 = vshrl.u32 %v4490_v54, 16  ;;  %5041 = vmatpush3.bf16.msra.mxu0 %v5707_v37  ;;  %v4493_v41 = vcombine.high %v6560_v21, %v6560_v21 }
 0x1a3   :  { %v805_v15 = vsel %vm769_vm10, %v753_v33, %v789_v61  ;;  %vm770_vm12 = vcmp.gt.f32.partialorder %v754_v0, 0.0  ;;  %v790_v16 = vmul.f32 %v6456_v25, %v754_v0  ;;  %v1169_v24 = vshll.u32 %v4490_v54, 16  ;;  %5042 = vmatprep.subr.bf16.mxu0 %v5710_v7 }
 0x1a4   :  { %v857_v18 = vrot.slane %v805_v15, 7  ;;  %v1180_v35 = vshrl.u32 %v6587_v62, 16  ;;  %v1159_v34 = vrot.slane %v1158_v14, 4  ;;  %5145 = vmatpush3.bf16.msra.mxu1 %v5711_v47  ;;  %v1150_v37 = vsel %vm6488_vm1, %v1145_v17, %v1149_v10 }
 0x1a5   :  { %v806_v3 = vsel %vm770_vm12, %v754_v0, %v790_v16  ;;  %v1168_v40 = vrot.slane %v1166_v4, 4  ;;  %v1171_v43 = vrot.slane %v1169_v24, 5  ;;  %5146 = vmatprep.subr.bf16.mxu1 %v5717_v9  ;;  %v1175_v21 = vshll.u32 %v4491_v29, 16  ;;  %v6615_v16 = vld [vmem:[#allocation3 + $0x140] sm:$0xff]  }
 0x1a6   :  { %v890_v5 = vsel %vm879_vm11, 0.0, %v857_v18  ;;  %v906_v27 = vsel %vm879_vm11, %v857_v18, 0.0  ;;  %v858_v32 = vrot.slane %v806_v3, 7  ;;  %v991_v44 = vld [vmem:[#allocation2 + $0x58] sm:$0x1f]  ;;  %v1164_v31 = vsel %vm6488_vm1, %v1159_v34, %v1163_v6  ;;  %5043 = vmatpush3.bf16.msra.mxu0 %v5710_v7 }
 0x1a7   :  { %v922_v42 = vpack.c.bf16 %v906_v27, %v890_v5  ;;  %v4512_v55 = vcombine.low %v1150_v37, %v1164_v31  ;;  %v1172_v51 = vor.u32 %v1171_v43, %v1168_v40  ;;  %5044 = vmatprep.subr.bf16.mxu0 %v5712_v19  ;;  %v1182_v54 = vrot.slane %v1180_v35, 4 }
 0x1a8   :  { %v891_v48 = vsel %vm879_vm11, 0.0, %v858_v32  ;;  %v907_v50 = vsel %vm879_vm11, %v858_v32, 0.0  ;;  %v720_v52 = vpop.f32.mrb[24].mxu0  ;;  %v5692_v60 = vld [vmem:[#allocation2 + $0x58] ss:$8 sps:$4 sm:$0xff]   ;;  %v1183_v61 = vshll.u32 %v6587_v62, 16  ;;  %v4496_v7 = vcombine.low %v991_v44, %v991_v44  ;;  %5147 = vmatpush3.bf16.msra.mxu1 %v5717_v9 }
 0x1a9   :  { %939 = vst [vmem:[#allocation2 + $0x68] sm:$0xff] %v922_v42  ;;  %v923_v47 = vpack.c.bf16 %v907_v50, %v891_v48  ;;  %v755_v33 = vadd.f32 %v6454_v23, %v720_v52  ;;  %v6602_v28 = vpop.f32.mrb[25].mxu0  ;;  %v1189_v0 = vshll.u32 %v4493_v41, 16  ;;  %5026 = vmatprep.mubr.bf16.mxu0 %v4512_v55  ;;  %v1173_v29 = vrot.slane %v1172_v51, 4  ;;  %5126 = vmatprep.mubr.bf16.mxu1 %v5692_v60  ;;  %v992_v62 = vld [vmem:[#allocation2 + $0x60] sm:$0x1f] }
 0x1aa   :  { %v724_v11 = vpop.f32.mrb[26].mxu0  ;;  %v1177_v17 = vrot.slane %v1175_v21, 5  ;;  %v1185_v18 = vrot.slane %v1183_v61, 5  ;;  %v4497_v14 = vcombine.high %v991_v44, %v991_v44  ;;  %5045 = vmatpush3.bf16.msra.mxu0 %v5712_v19  ;;  %5148 = vmatprep.subr.bf16.mxu1 %v5724_v46  ;;  %v1793_v9 = vsel %vm6606_vm13, %v6575_v57, %v6581_v8  ;;  %v5725_v41 = vld [vmem:[#allocation3 + $0x28] sm:$0xff]   ;;  %v5735_v21 = vld [vmem:[#allocation3 + $0x30] sm:$0xff]  }
 0x1ab   :  { %940 = vst [vmem:[#allocation2 + $0x70] sm:$0xff] %v923_v47  ;;  %vm771_vm14 = vcmp.gt.f32.partialorder %v755_v33, 0.0  ;;  %v791_v10 = vmul.f32 %v6456_v25, %v755_v33  ;;  %v756_v13 = vadd.f32 %v6454_v23, %v724_v11  ;;  %v6613_v15 = vpop.f32.mrb[27].mxu0  ;;  %v1191_v3 = vrot.slane %v1189_v0, 5  ;;  %5046 = vmatprep.subr.bf16.mxu0 %v5719_v49  ;;  %v1695_v57 = vld [vmem:[#allocation2 + $0x20] sm:$0x1e] }
 0x1ac   :  { %v1186_v35 = vor.u32 %v1185_v18, %v1182_v54  ;;  %v1208_v5 = vshrl.u32 %v4496_v7, 16  ;;  %v1211_v27 = vshll.u32 %v4496_v7, 16  ;;  %5149 = vmatpush3.bf16.msra.mxu1 %v5724_v46  ;;  %v1178_v19 = vsel %vm6488_vm1, %v1173_v29, %v1177_v17  ;;  %v1696_v8 = vld [vmem:[#allocation2 + $0x28] sm:$0x1e] }
 0x1ad   :  { %v807_v6 = vsel %vm771_vm14, %v755_v33, %v791_v10  ;;  %vm772_vm15 = vcmp.gt.f32.partialorder %v756_v13, 0.0  ;;  %v792_v4 = vmul.f32 %v6456_v25, %v756_v13  ;;  %v1217_v34 = vshll.u32 %v4497_v14, 16  ;;  %5166 = vmatprep.subr.bf16.mxu1 %v6615_v16  ;;  %v6634_v10 = vld [vmem:[#allocation2 + $0x8] sm:$0x1f] }
 0x1ae   :  { %v859_v24 = vrot.slane %v807_v6, 7  ;;  %v4498_v42 = vcombine.low %v992_v62, %v992_v62  ;;  %v1187_v44 = vrot.slane %v1186_v35, 4  ;;  %5047 = vmatpush3.bf16.msra.mxu0 %v5719_v49  ;;  %v1210_v50 = vrot.slane %v1208_v5, 4 }
 0x1af   :  { %v808_v32 = vsel %vm772_vm15, %v756_v13, %v792_v4  ;;  %v1213_v31 = vrot.slane %v1211_v27, 5  ;;  %v4499_v46 = vcombine.high %v992_v62, %v992_v62  ;;  %5048 = vmatprep.subr.bf16.mxu0 %v5725_v41  ;;  %v1219_v60 = vrot.slane %v1217_v34, 5 }
 0x1b0   :  { %v892_v37 = vsel %vm879_vm11, 0.0, %v859_v24  ;;  %v908_v40 = vsel %vm879_vm11, %v859_v24, 0.0  ;;  %v860_v43 = vrot.slane %v808_v32, 7  ;;  %v993_v52 = vld [vmem:[#allocation2 + $0x68] sm:$0x1f]  ;;  %v1192_v33 = vsel %vm6488_vm1, %v1187_v44, %v1191_v3  ;;  %v5742_v24 = vld [vmem:[#allocation3 + $0x38] sm:$0xff]  }
 0x1b1   :  { %v924_v48 = vpack.c.bf16 %v908_v40, %v892_v37  ;;  %v4513_v54 = vcombine.low %v1178_v19, %v1192_v33  ;;  %v1214_v0 = vor.u32 %v1213_v31, %v1210_v50  ;;  %v4500_v29 = vcombine.low %v993_v52, %v993_v52 }
 0x1b2   :  { %v893_v47 = vsel %vm879_vm11, 0.0, %v860_v43  ;;  %v909_v55 = vsel %vm879_vm11, %v860_v43, 0.0  ;;  %v730_v51 = vpop.f32.mrb[28].mxu0  ;;  %v5699_v7 = vld [vmem:[#allocation2 + $0x68] ss:$8 sps:$4 sm:$0xff]   ;;  %v4501_v17 = vcombine.high %v993_v52, %v993_v52  ;;  %v1222_v18 = vshrl.u32 %v4498_v42, 16  ;;  %5049 = vmatpush3.bf16.msra.mxu0 %v5725_v41 }
 0x1b3   :  { %941 = vst [vmem:[#allocation2 + $0x78] sm:$0xff] %v924_v48  ;;  %v925_v11 = vpack.c.bf16 %v909_v55, %v893_v47  ;;  %v757_v49 = vadd.f32 %v6454_v23, %v730_v51  ;;  %v6632_v61 = vpop.f32.mrb[29].mxu0  ;;  %v1225_v14 = vshll.u32 %v4498_v42, 16  ;;  %5027 = vmatmul.mubr.bf16.gmra.mrb[36].mxu0 %v4513_v54  ;;  %v1215_v4 = vrot.slane %v1214_v0, 4  ;;  %5127 = vmatmul.mubr.bf16.gmra.mrb[8].mxu1 %v5699_v7  ;;  %v994_v31 = vld [vmem:[#allocation2 + $0x70] sm:$0x1f] }
 0x1b4   :  { %v734_v13 = vpop.f32.mrb[30].mxu0  ;;  %v1224_v35 = vrot.slane %v1222_v18, 4  ;;  %v1231_v27 = vshll.u32 %v4499_v46, 16  ;;  %v6642_v32 = vcombine.low %v6634_v10, %v6634_v10  ;;  %5050 = vmatprep.subr.bf16.mxu0 %v5735_v21  ;;  %v1236_v44 = vshrl.u32 %v4500_v29, 16  ;;  %v6648_v52 = vld [vmem:[#allocation3 + $0x80] sm:$0xff]  }
 0x1b5   :  { %942 = vst [vmem:[#allocation2 + $0x80] sm:$0xff] %v925_v11  ;;  %vm773_vm0 = vcmp.gt.f32.partialorder %v757_v49, 0.0  ;;  %v793_v62 = vmul.f32 %v6456_v25, %v757_v49  ;;  %v758_v6 = vadd.f32 %v6454_v23, %v734_v13  ;;  %v6638_v3 = vpop.f32.mrb[31].mxu0  ;;  %v1227_v5 = vrot.slane %v1225_v14, 5  ;;  %v2305_v14 = vld [vmem:[#allocation2 + $0x10] sm:$0x1f] }
 0x1b6   :  { %v1220_v23 = vsel %vm6488_vm1, %v1215_v4, %v1219_v60  ;;  %v1233_v40 = vrot.slane %v1231_v27, 5  ;;  %5051 = vmatpush3.bf16.msra.mxu0 %v5735_v21  ;;  %v1239_v48 = vshll.u32 %v4500_v29, 16  ;;  %v1245_v50 = vshll.u32 %v4501_v17, 16 }
 0x1b7   :  { %v809_v41 = vsel %vm773_vm0, %v757_v49, %v793_v62  ;;  %vm774_vm2 = vcmp.gt.f32.partialorder %v758_v6, 0.0  ;;  %v794_v19 = vmul.f32 %v6456_v25, %v758_v6  ;;  %v4514_v42 = vcombine.low %v6567_v56, %v1220_v23  ;;  %5052 = vmatprep.subr.bf16.mxu0 %v5742_v24 }
 0x1b8   :  { %v861_v34 = vrot.slane %v809_v41, 7  ;;  %v1228_v37 = vor.u32 %v1227_v5, %v1224_v35  ;;  %v1238_v56 = vrot.slane %v1236_v44, 4  ;;  %v1241_v51 = vrot.slane %v1239_v48, 5 }
 0x1b9   :  { %v810_v43 = vsel %vm774_vm2, %v758_v6, %v794_v19  ;;  %5030 = vmatprep.mubr.bf16.mxu0 %v4514_v42  ;;  %v1247_v60 = vrot.slane %v1245_v50, 5  ;;  %v4502_v7 = vcombine.low %v994_v31, %v994_v31  ;;  %v4503_v17 = vcombine.high %v994_v31, %v994_v31 }
 0x1ba   :  { %v894_v46 = vsel %vm879_vm11, 0.0, %v861_v34  ;;  %v910_v25 = vsel %vm879_vm11, %v861_v34, 0.0  ;;  %v862_v47 = vrot.slane %v810_v43, 7  ;;  %v1229_v55 = vrot.slane %v1228_v37, 4  ;;  %v995_v21 = vld [vmem:[#allocation2 + $0x78] sm:$0x1f]  ;;  %5053 = vmatpush3.bf16.msra.mxu0 %v5742_v24 }
 0x1bb   :  { %v926_v33 = vpack.c.bf16 %v910_v25, %v894_v46  ;;  %v1242_v29 = vor.u32 %v1241_v51, %v1238_v56  ;;  %v4504_v18 = vcombine.low %v995_v21, %v995_v21  ;;  %5070 = vmatprep.subr.bf16.mxu0 %v6648_v52  ;;  %v4505_v62 = vcombine.high %v995_v21, %v995_v21 }
 0x1bc   :  { %v895_v11 = vsel %vm879_vm11, 0.0, %v862_v47  ;;  %v911_v54 = vsel %vm879_vm11, %v862_v47, 0.0  ;;  %v1234_v49 = vsel %vm6488_vm1, %v1229_v55, %v1233_v40  ;;  %v5708_v0 = vld [vmem:[#allocation2 + $0x78] ss:$8 sps:$4 sm:$0xff]   ;;  %v1250_v6 = vshrl.u32 %v4502_v7, 16 }
 0x1bd   :  { %943 = vst [vmem:[#allocation2 + $0x88] sm:$0xff] %v926_v33  ;;  %v927_v13 = vpack.c.bf16 %v911_v54, %v895_v11  ;;  %5130 = vmatprep.mubr.bf16.mxu1 %v5708_v0  ;;  %v1253_v4 = vshll.u32 %v4502_v7, 16  ;;  %v4623_v35 = vcombine.high %v6634_v10, %v6634_v10  ;;  %v1243_v5 = vrot.slane %v1242_v29, 4  ;;  %v2306_v33 = vld [vmem:[#allocation2 + $0x18] sm:$0x1f] }
 0x1be   :  { %v1259_v27 = vshll.u32 %v4503_v17, 16  ;;  %v1264_v41 = vshrl.u32 %v4504_v18, 16  ;;  %v1267_v24 = vshll.u32 %v4504_v18, 16  ;;  %v1252_v19 = vrot.slane %v1250_v6, 4 }
 0x1bf   :  { %944 = vst [vmem:[#allocation2 + $0x90] sm:$0xff] %v927_v13  ;;  %v1255_v23 = vrot.slane %v1253_v4, 5  ;;  %v1273_v34 = vshll.u32 %v4505_v62, 16  ;;  %v4624_v42 = vcombine.low %v2305_v14, %v2305_v14  ;;  %v1248_v37 = vsel %vm6488_vm1, %v1243_v5, %v1247_v60 }
 0x1c0   :  { %v1261_v40 = vrot.slane %v1259_v27, 5  ;;  %v1266_v43 = vrot.slane %v1264_v41, 4  ;;  %v1269_v44 = vrot.slane %v1267_v24, 5  ;;  %v4515_v48 = vcombine.low %v1234_v49, %v1248_v37  ;;  %v2307_v49 = vld [vmem:[#allocation2 + $0x20] sm:$0x1f] }
 0x1c1   :  { %v1256_v50 = vor.u32 %v1255_v23, %v1252_v19  ;;  %v1275_v31 = vrot.slane %v1273_v34, 5  ;;  %v4625_v46 = vcombine.high %v2305_v14, %v2305_v14  ;;  %v2401_v25 = vshrl.u32 %v6642_v32, 16  ;;  %v996_v24 = vld [vmem:[#allocation2 + $0x80] sm:$0x1f] }
 0x1c2   :  { %v1270_v10 = vor.u32 %v1269_v44, %v1266_v43  ;;  %v2404_v47 = vshll.u32 %v6642_v32, 16  ;;  %v2410_v55 = vshll.u32 %v4623_v35, 16  ;;  %5031 = vmatmul.mubr.bf16.gmra.mrb[40].mxu0 %v4515_v48  ;;  %v2415_v51 = vshrl.u32 %v4624_v42, 16 }
 0x1c3   :  { %v1257_v56 = vrot.slane %v1256_v50, 4  ;;  %v2418_v21 = vshll.u32 %v4624_v42, 16  ;;  %v2424_v11 = vshll.u32 %v4625_v46, 16  ;;  %v2403_v54 = vrot.slane %v2401_v25, 4 }
 0x1c4   :  { %v1271_v60 = vrot.slane %v1270_v10, 4  ;;  %v2406_v0 = vrot.slane %v2404_v47, 5  ;;  %v2412_v7 = vrot.slane %v2410_v55, 5  ;;  %v2417_v17 = vrot.slane %v2415_v51, 4  ;;  %v997_v37 = vld [vmem:[#allocation2 + $0x88] sm:$0x1f] }
 0x1c5   :  { %v1262_v13 = vsel %vm6488_vm1, %v1257_v56, %v1261_v40  ;;  %v2420_v18 = vrot.slane %v2418_v21, 5  ;;  %v4626_v14 = vcombine.low %v2306_v33, %v2306_v33  ;;  %v2426_v6 = vrot.slane %v2424_v11, 5  ;;  %v2308_v40 = vld [vmem:[#allocation2 + $0x28] sm:$0x1f] }
 0x1c6   :  { %v5718_v29 = vld [vmem:[#allocation2 + $0x88] ss:$8 sps:$4 sm:$0xff]   ;;  %v1276_v32 = vsel %vm6488_vm1, %v1271_v60, %v1275_v31  ;;  %v2407_v62 = vor.u32 %v2406_v0, %v2403_v54  ;;  %v4627_v4 = vcombine.high %v2306_v33, %v2306_v33  ;;  %v4628_v27 = vcombine.low %v2307_v49, %v2307_v49 }
 0x1c7   :  { %v4516_v35 = vcombine.low %v1262_v13, %v1276_v32  ;;  %5131 = vmatmul.mubr.bf16.gmra.mrb[12].mxu1 %v5718_v29  ;;  %v2421_v5 = vor.u32 %v2420_v18, %v2417_v17  ;;  %v4629_v41 = vcombine.high %v2307_v49, %v2307_v49  ;;  %v2429_v23 = vshrl.u32 %v4626_v14, 16 }
 0x1c8   :  { %v2408_v19 = vrot.slane %v2407_v62, 4  ;;  %v2432_v34 = vshll.u32 %v4626_v14, 16  ;;  %v2438_v42 = vshll.u32 %v4627_v4, 16  ;;  %v2443_v44 = vshrl.u32 %v4628_v27, 16  ;;  %v2309_v14 = vld [vmem:[#allocation2 + $0x30] sm:$0x1f] }
 0x1c9   :  { %5034 = vmatprep.mubr.bf16.mxu0 %v4516_v35  ;;  %v2422_v43 = vrot.slane %v2421_v5, 4  ;;  %v2446_v48 = vshll.u32 %v4628_v27, 16  ;;  %v2452_v50 = vshll.u32 %v4629_v41, 16  ;;  %v2431_v46 = vrot.slane %v2429_v23, 4 }
 0x1ca   :  { %v2413_v31 = vsel %vm6488_vm1, %v2408_v19, %v2412_v7  ;;  %v2434_v10 = vrot.slane %v2432_v34, 5  ;;  %v2440_v25 = vrot.slane %v2438_v42, 5  ;;  %v2445_v55 = vrot.slane %v2443_v44, 4 }
 0x1cb   :  { %v2427_v47 = vsel %vm6488_vm1, %v2422_v43, %v2426_v6  ;;  %v2448_v33 = vrot.slane %v2446_v48, 5  ;;  %v2454_v56 = vrot.slane %v2452_v50, 5  ;;  %v4506_v11 = vcombine.low %v996_v24, %v996_v24  ;;  %v5741_v48 = vld [vmem:[#allocation3 + $0x148] sm:$0xff]  }
 0x1cc   :  { %v4654_v51 = vcombine.low %v2413_v31, %v2427_v47  ;;  %v2435_v21 = vor.u32 %v2434_v10, %v2431_v46  ;;  %v4507_v60 = vcombine.high %v996_v24, %v996_v24  ;;  %v4508_v0 = vcombine.low %v997_v37, %v997_v37  ;;  %v2310_v47 = vld [vmem:[#allocation2 + $0x38] sm:$0x1f] }
 0x1cd   :  { %v2449_v54 = vor.u32 %v2448_v33, %v2445_v55  ;;  %v4509_v49 = vcombine.high %v997_v37, %v997_v37  ;;  %v4630_v13 = vcombine.low %v2308_v40, %v2308_v40  ;;  %v1278_v7 = vshrl.u32 %v4506_v11, 16 }
 0x1ce   :  { %5150 = vmatprep.mubr.bf16.mxu1 %v4654_v51  ;;  %v2436_v29 = vrot.slane %v2435_v21, 4  ;;  %v1281_v17 = vshll.u32 %v4506_v11, 16  ;;  %v1287_v18 = vshll.u32 %v4507_v60, 16  ;;  %v1292_v62 = vshrl.u32 %v4508_v0, 16 }
 0x1cf   :  { %v2450_v32 = vrot.slane %v2449_v54, 4  ;;  %v1295_v6 = vshll.u32 %v4508_v0, 16  ;;  %v1301_v4 = vshll.u32 %v4509_v49, 16  ;;  %v1280_v5 = vrot.slane %v1278_v7, 4  ;;  %v2311_v54 = vld [vmem:[#allocation2 + $0x40] sm:$0x1f] }
 0x1d0   :  { %v2441_v35 = vsel %vm6488_vm1, %v2436_v29, %v2440_v25  ;;  %v1283_v27 = vrot.slane %v1281_v17, 5  ;;  %v1289_v41 = vrot.slane %v1287_v18, 5  ;;  %v1294_v19 = vrot.slane %v1292_v62, 4 }
 0x1d1   :  { %v2455_v24 = vsel %vm6488_vm1, %v2450_v32, %v2454_v56  ;;  %v1297_v23 = vrot.slane %v1295_v6, 5  ;;  %v1303_v34 = vrot.slane %v1301_v4, 5  ;;  %v4631_v43 = vcombine.high %v2308_v40, %v2308_v40 }
 0x1d2   :  { %v4655_v42 = vcombine.low %v2441_v35, %v2455_v24  ;;  %v1284_v37 = vor.u32 %v1283_v27, %v1280_v5  ;;  %v4632_v44 = vcombine.low %v2309_v14, %v2309_v14  ;;  %v4633_v31 = vcombine.high %v2309_v14, %v2309_v14  ;;  %v5740_v14 = vld [vmem:[#allocation2] ss:$8 sps:$4 sm:$0xff]   ;;  %v2312_v35 = vld [vmem:[#allocation2 + $0x58] sm:$0x1f] }
 0x1d3   :  { %v1298_v50 = vor.u32 %v1297_v23, %v1294_v19  ;;  %v2457_v46 = vshrl.u32 %v4630_v13, 16  ;;  %v2460_v10 = vshll.u32 %v4630_v13, 16  ;;  %v2466_v55 = vshll.u32 %v4631_v43, 16  ;;  %v5743_v13 = vld [vmem:[#allocation3 + $0x150] sm:$0xff]   ;;  %v2313_v19 = vld [vmem:[#allocation2 + $0x60] sm:$0x1f] }
 0x1d4   :  { %5151 = vmatmul.mubr.bf16.vlgmr.msra.gmra.mrb[0].mxu1 %v4655_v42  ;;  %v1285_v25 = vrot.slane %v1284_v37, 4  ;;  %v2471_v33 = vshrl.u32 %v4632_v44, 16  ;;  %v2474_v51 = vshll.u32 %v4632_v44, 16  ;;  %v2480_v60 = vshll.u32 %v4633_v31, 16  ;;  %v5755_v23 = vld [vmem:[#allocation3 + $0x158] sm:$0xff]  }
 0x1d5   :  { %5167 = vmatpush3.bf16.msra.mxu1 %v6615_v16  ;;  %v1299_v56 = vrot.slane %v1298_v50, 4  ;;  %v2459_v21 = vrot.slane %v2457_v46, 4  ;;  %v2462_v11 = vrot.slane %v2460_v10, 5  ;;  %v2468_v0 = vrot.slane %v2466_v55, 5  ;;  %v2314_v55 = vld [vmem:[#allocation2 + $0x68] sm:$0x1f] }
 0x1d6   :  { %v1290_v40 = vsel %vm6488_vm1, %v1285_v25, %v1289_v41  ;;  %v2473_v49 = vrot.slane %v2471_v33, 4  ;;  %v2476_v29 = vrot.slane %v2474_v51, 5  ;;  %5168 = vmatprep.subr.bf16.mxu1 %v5741_v48  ;;  %v2482_v18 = vrot.slane %v2480_v60, 5 }
 0x1d7   :  { %v1304_v7 = vsel %vm6488_vm1, %v1299_v56, %v1303_v34  ;;  %v2463_v17 = vor.u32 %v2462_v11, %v2459_v21  ;;  %v4634_v16 = vcombine.low %v2310_v47, %v2310_v47  ;;  %v4635_v6 = vcombine.high %v2310_v47, %v2310_v47 }
 0x1d8   :  { %v4517_v32 = vcombine.low %v1290_v40, %v1304_v7  ;;  %v2477_v62 = vor.u32 %v2476_v29, %v2473_v49  ;;  %v4636_v4 = vcombine.low %v2311_v54, %v2311_v54  ;;  %v4637_v27 = vcombine.high %v2311_v54, %v2311_v54  ;;  %v5748_v29 = vld [vmem:[#allocation2 + $0x10] ss:$8 sps:$4 sm:$0xff]  }
 0x1d9   :  { %v2464_v5 = vrot.slane %v2463_v17, 4  ;;  %5169 = vmatpush3.bf16.msra.mxu1 %v5741_v48  ;;  %v2485_v41 = vshrl.u32 %v4634_v16, 16  ;;  %v2488_v24 = vshll.u32 %v4634_v16, 16  ;;  %v2494_v34 = vshll.u32 %v4635_v6, 16 }
 0x1da   :  { %5035 = vmatmul.mubr.bf16.gmra.mrb[44].mxu0 %v4517_v32  ;;  %v2478_v42 = vrot.slane %v2477_v62, 4  ;;  %5170 = vmatprep.subr.bf16.mxu1 %v5743_v13  ;;  %v2499_v37 = vshrl.u32 %v4636_v4, 16  ;;  %v2502_v43 = vshll.u32 %v4636_v4, 16  ;;  %v2508_v46 = vshll.u32 %v4637_v27, 16  ;;  %v5754_v4 = vld [vmem:[#allocation2 + $0x20] ss:$8 sps:$4 sm:$0xff]  }
 0x1db   :  { %v2469_v44 = vsel %vm6488_vm1, %v2464_v5, %v2468_v0  ;;  %5054 = vmatprep.mubr.bf16.mxu0 %v5740_v14  ;;  %v2487_v50 = vrot.slane %v2485_v41, 4  ;;  %v2490_v31 = vrot.slane %v2488_v24, 5  ;;  %v2496_v10 = vrot.slane %v2494_v34, 5  ;;  %v5757_v0 = vld [vmem:[#allocation3 + $0x160] sm:$0xff]   ;;  %v2315_v41 = vld [vmem:[#allocation2 + $0x70] sm:$0x1f] }
 0x1dc   :  { %v2483_v48 = vsel %vm6488_vm1, %v2478_v42, %v2482_v18  ;;  %v2501_v47 = vrot.slane %v2499_v37, 4  ;;  %v2504_v25 = vrot.slane %v2502_v43, 5  ;;  %v2510_v56 = vrot.slane %v2508_v46, 5  ;;  %v5756_v18 = vld [vmem:[#allocation3 + $0x88] sm:$0xff]   ;;  %v2316_v37 = vld [vmem:[#allocation2 + $0x78] sm:$0x1f] }
 0x1dd   :  { %v4656_v33 = vcombine.low %v2469_v44, %v2483_v48  ;;  %v2491_v51 = vor.u32 %v2490_v31, %v2487_v50  ;;  %5171 = vmatpush3.bf16.msra.mxu1 %v5743_v13  ;;  %v4638_v21 = vcombine.low %v2312_v35, %v2312_v35  ;;  %v4639_v60 = vcombine.high %v2312_v35, %v2312_v35  ;;  %v5769_v46 = vld [vmem:[#allocation3 + $0x168] sm:$0xff]  }
 0x1de   :  { %v2505_v11 = vor.u32 %v2504_v25, %v2501_v47  ;;  %v4640_v54 = vcombine.low %v2313_v19, %v2313_v19  ;;  %v4641_v40 = vcombine.high %v2313_v19, %v2313_v19  ;;  %5172 = vmatprep.subr.bf16.mxu1 %v5755_v23  ;;  %v4642_v14 = vcombine.low %v2314_v55, %v2314_v55  ;;  %v5763_v25 = vld [vmem:[#allocation3 + $0x90] sm:$0xff]  }
 0x1df   :  { %5154 = vmatprep.mubr.bf16.mxu1 %v4656_v33  ;;  %v2492_v49 = vrot.slane %v2491_v51, 4  ;;  %v2513_v7 = vshrl.u32 %v4638_v21, 16  ;;  %v2516_v17 = vshll.u32 %v4638_v21, 16  ;;  %v2522_v32 = vshll.u32 %v4639_v60, 16 }
 0x1e0   :  { %v2506_v16 = vrot.slane %v2505_v11, 4  ;;  %v2527_v62 = vshrl.u32 %v4640_v54, 16  ;;  %v2530_v6 = vshll.u32 %v4640_v54, 16  ;;  %v2536_v27 = vshll.u32 %v4641_v40, 16 }
 0x1e1   :  { %v2497_v13 = vsel %vm6488_vm1, %v2492_v49, %v2496_v10  ;;  %v2515_v35 = vrot.slane %v2513_v7, 4  ;;  %v2518_v5 = vrot.slane %v2516_v17, 5  ;;  %5173 = vmatpush3.bf16.msra.mxu1 %v5755_v23  ;;  %v2524_v19 = vrot.slane %v2522_v32, 5  ;;  %v2317_v49 = vld [vmem:[#allocation2 + $0x80] sm:$0x1f] }
 0x1e2   :  { %v2511_v24 = vsel %vm6488_vm1, %v2506_v16, %v2510_v56  ;;  %5055 = vmatmul.mubr.bf16.vlgmr.msra.gmra.mrb[32].mxu0 %v5748_v29  ;;  %v2529_v42 = vrot.slane %v2527_v62, 4  ;;  %v2532_v34 = vrot.slane %v2530_v6, 5  ;;  %5174 = vmatprep.subr.bf16.mxu1 %v5757_v0  ;;  %v2538_v50 = vrot.slane %v2536_v27, 5  ;;  %v5762_v32 = vld [vmem:[#allocation2 + $0x30] ss:$8 sps:$4 sm:$0xff]  }
 0x1e3   :  { %v4657_v43 = vcombine.low %v2497_v13, %v2511_v24  ;;  %v2519_v44 = vor.u32 %v2518_v5, %v2515_v35  ;;  %5058 = vmatprep.mubr.bf16.mxu0 %v5754_v4  ;;  %5071 = vmatpush3.bf16.msra.mxu0 %v6648_v52  ;;  %v4643_v31 = vcombine.high %v2314_v55, %v2314_v55  ;;  %v2541_v47 = vshrl.u32 %v4642_v14, 16  ;;  %v5771_v6 = vld [vmem:[#allocation3 + $0x170] sm:$0xff]   ;;  %v5770_v27 = vld [vmem:[#allocation3 + $0x98] sm:$0xff]  }
 0x1e4   :  { %v2533_v48 = vor.u32 %v2532_v34, %v2529_v42  ;;  %5072 = vmatprep.subr.bf16.mxu0 %v5756_v18  ;;  %v4644_v23 = vcombine.low %v2315_v41, %v2315_v41  ;;  %v4645_v10 = vcombine.high %v2315_v41, %v2315_v41  ;;  %v2544_v51 = vshll.u32 %v4642_v14, 16  ;;  %v5768_v5 = vld [vmem:[#allocation2 + $0x50] ss:$8 sps:$4 sm:$0xff]  }
 0x1e5   :  { %5155 = vmatmul.mubr.bf16.gmra.mrb[4].mxu1 %v4657_v43  ;;  %v2520_v33 = vrot.slane %v2519_v44, 4  ;;  %v2550_v56 = vshll.u32 %v4643_v31, 16  ;;  %v4646_v21 = vcombine.low %v2316_v37, %v2316_v37  ;;  %v2543_v60 = vrot.slane %v2541_v47, 4  ;;  %v5783_v42 = vld [vmem:[#allocation3 + $0x178] sm:$0xff]   ;;  %v2319_v47 = vld [vmem:[#allocation2 + $0x90] sm:$0x1f] }
 0x1e6   :  { %v2534_v11 = vrot.slane %v2533_v48, 4  ;;  %v2555_v54 = vshrl.u32 %v4644_v23, 16  ;;  %v2558_v40 = vshll.u32 %v4644_v23, 16  ;;  %5175 = vmatpush3.bf16.msra.mxu1 %v5757_v0  ;;  %v2546_v55 = vrot.slane %v2544_v51, 5 }
 0x1e7   :  { %v2525_v52 = vsel %vm6488_vm1, %v2520_v33, %v2524_v19  ;;  %5073 = vmatpush3.bf16.msra.mxu0 %v5756_v18  ;;  %v2552_v29 = vrot.slane %v2550_v56, 5  ;;  %v2564_v7 = vshll.u32 %v4645_v10, 16  ;;  %5176 = vmatprep.subr.bf16.mxu1 %v5769_v46  ;;  %v4647_v62 = vcombine.high %v2316_v37, %v2316_v37  ;;  %v2318_v37 = vld [vmem:[#allocation2 + $0x88] sm:$0x1f] }
 0x1e8   :  { %v2539_v17 = vsel %vm6488_vm1, %v2534_v11, %v2538_v50  ;;  %v2557_v14 = vrot.slane %v2555_v54, 4  ;;  %v2560_v16 = vrot.slane %v2558_v40, 5  ;;  %5074 = vmatprep.subr.bf16.mxu0 %v5763_v25  ;;  %v2547_v0 = vor.u32 %v2546_v55, %v2543_v60 }
 0x1e9   :  { %v4658_v4 = vcombine.low %v2525_v52, %v2539_v17  ;;  %v2566_v13 = vrot.slane %v2564_v7, 5  ;;  %v4648_v35 = vcombine.low %v2317_v49, %v2317_v49  ;;  %v4649_v41 = vcombine.high %v2317_v49, %v2317_v49  ;;  %v2833_v7 = vld [vmem:[#allocation2 + $0x8] sm:$0x1e]  ;;  %v6697_v17 = vld [vmem:[#allocation3 + $0x180] sm:$0xff]  }
 0x1ea   :  { %v2561_v18 = vor.u32 %v2560_v16, %v2557_v14  ;;  %5059 = vmatmul.mubr.bf16.gmra.mrb[36].mxu0 %v5762_v32  ;;  %v2569_v24 = vshrl.u32 %v4646_v21, 16  ;;  %v2572_v19 = vshll.u32 %v4646_v21, 16  ;;  %5177 = vmatpush3.bf16.msra.mxu1 %v5769_v46  ;;  %v2548_v34 = vrot.slane %v2547_v0, 4  ;;  %v5777_v21 = vld [vmem:[#allocation3 + $0xa0] sm:$0xff]  }
 0x1eb   :  { %5158 = vmatprep.mubr.bf16.mxu1 %v4658_v4  ;;  %v2578_v43 = vshll.u32 %v4647_v62, 16  ;;  %v2583_v44 = vshrl.u32 %v4648_v35, 16  ;;  %v2586_v50 = vshll.u32 %v4648_v35, 16  ;;  %5062 = vmatprep.mubr.bf16.mxu0 %v5768_v5  ;;  %v2592_v10 = vshll.u32 %v4649_v41, 16  ;;  %v5776_v62 = vld [vmem:[#allocation2 + $0x60] ss:$8 sps:$4 sm:$0xff]  }
 0x1ec   :  { %v2562_v31 = vrot.slane %v2561_v18, 4  ;;  %v2571_v48 = vrot.slane %v2569_v24, 4  ;;  %v2574_v23 = vrot.slane %v2572_v19, 5  ;;  %5075 = vmatpush3.bf16.msra.mxu0 %v5763_v25  ;;  %5178 = vmatprep.subr.bf16.mxu1 %v5771_v6  ;;  %v2553_v33 = vsel %vm6488_vm1, %v2548_v34, %v2552_v29  ;;  %v5784_v4 = vld [vmem:[#allocation3 + $0xa8] sm:$0xff]   ;;  %v5782_v5 = vld [vmem:[#allocation2 + $0x70] ss:$8 sps:$4 sm:$0xff]  }
 0x1ed   :  { %v2580_v51 = vrot.slane %v2578_v43, 5  ;;  %v2585_v46 = vrot.slane %v2583_v44, 4  ;;  %v2588_v56 = vrot.slane %v2586_v50, 5  ;;  %5076 = vmatprep.subr.bf16.mxu0 %v5770_v27  ;;  %v2594_v54 = vrot.slane %v2592_v10, 5 }
 0x1ee   :  { %v2567_v11 = vsel %vm6488_vm1, %v2562_v31, %v2566_v13  ;;  %v2575_v60 = vor.u32 %v2574_v23, %v2571_v48  ;;  %v4650_v40 = vcombine.low %v2318_v37, %v2318_v37  ;;  %5179 = vmatpush3.bf16.msra.mxu1 %v5771_v6  ;;  %v4651_v25 = vcombine.high %v2318_v37, %v2318_v37  ;;  %v2835_v37 = vld [vmem:[#allocation2 + $0x18] sm:$0x1e] }
 0x1ef   :  { %v4659_v49 = vcombine.low %v2553_v33, %v2567_v11  ;;  %v2589_v52 = vor.u32 %v2588_v56, %v2585_v46  ;;  %v4652_v55 = vcombine.low %v2319_v47, %v2319_v47  ;;  %5180 = vmatprep.subr.bf16.mxu1 %v5783_v42  ;;  %v4653_v14 = vcombine.high %v2319_v47, %v2319_v47  ;;  %v5791_v56 = vld [vmem:[#allocation3 + $0xb0] sm:$0xff]  }
 0x1f0   :  { %v2576_v29 = vrot.slane %v2575_v60, 4  ;;  %5077 = vmatpush3.bf16.msra.mxu0 %v5770_v27  ;;  %v2597_v16 = vshrl.u32 %v4650_v40, 16  ;;  %v2600_v32 = vshll.u32 %v4650_v40, 16  ;;  %v2606_v13 = vshll.u32 %v4651_v25, 16  ;;  %v2834_v27 = vld [vmem:[#allocation2 + $0x10] sm:$0x1e] }
 0x1f1   :  { %5159 = vmatmul.mubr.bf16.gmra.mrb[8].mxu1 %v4659_v49  ;;  %v2590_v0 = vrot.slane %v2589_v52, 4  ;;  %v2611_v35 = vshrl.u32 %v4652_v55, 16  ;;  %v2614_v6 = vshll.u32 %v4652_v55, 16  ;;  %5078 = vmatprep.subr.bf16.mxu0 %v5777_v21  ;;  %v2620_v19 = vshll.u32 %v4653_v14, 16 }
 0x1f2   :  { %v2581_v18 = vsel %vm6488_vm1, %v2576_v29, %v2580_v51  ;;  %v2599_v41 = vrot.slane %v2597_v16, 4  ;;  %v2602_v24 = vrot.slane %v2600_v32, 5  ;;  %5063 = vmatmul.mubr.bf16.gmra.mrb[40].mxu0 %v5776_v62  ;;  %5181 = vmatpush3.bf16.msra.mxu1 %v5783_v42  ;;  %v2608_v43 = vrot.slane %v2606_v13, 5  ;;  %v2836_v42 = vld [vmem:[#allocation2 + $0x20] sm:$0x1e] }
 0x1f3   :  { %v2595_v34 = vsel %vm6488_vm1, %v2590_v0, %v2594_v54  ;;  %v2613_v44 = vrot.slane %v2611_v35, 4  ;;  %v2616_v50 = vrot.slane %v2614_v6, 5  ;;  %5066 = vmatprep.mubr.bf16.mxu0 %v5782_v5  ;;  %5198 = vmatprep.subr.bf16.mxu1 %v6697_v17  ;;  %v2622_v23 = vrot.slane %v2620_v19, 5  ;;  %v2837_v29 = vld [vmem:[#allocation2 + $0x28] sm:$0x1e] }
 0x1f4   :  { %v4660_v31 = vcombine.low %v2581_v18, %v2595_v34  ;;  %v2603_v48 = vor.u32 %v2602_v24, %v2599_v41  ;;  %v4670_v10 = vcombine.low %v2833_v7, %v2833_v7  ;;  %5079 = vmatpush3.bf16.msra.mxu0 %v5777_v21  ;;  %v4671_v33 = vcombine.high %v2833_v7, %v2833_v7  ;;  %v5790_v32 = vld [vmem:[#allocation2 + $0x80] ss:$8 sps:$4 sm:$0xff]   ;;  %v2838_v62 = vld [vmem:[#allocation2 + $0x30] sm:$0x1e]  ;;  %v5801_v18 = vld [vmem:[#allocation3 + $0xb8] sm:$0xff]  }
 0x1f5   :  { %v2617_v47 = vor.u32 %v2616_v50, %v2613_v44  ;;  %v4672_v51 = vcombine.low %v2834_v27, %v2834_v27  ;;  %v4673_v46 = vcombine.high %v2834_v27, %v2834_v27  ;;  %5080 = vmatprep.subr.bf16.mxu0 %v5784_v4  ;;  %v4674_v54 = vcombine.low %v2835_v37, %v2835_v37  ;;  %v1692_v5 = vld [vmem:[#allocation2 + $0x8] sm:$0x1e]  ;;  %v2839_v50 = vld [vmem:[#allocation2 + $0x38] sm:$0x1e] }
 0x1f6   :  { %5162 = vmatprep.mubr.bf16.mxu1 %v4660_v31  ;;  %v2604_v11 = vrot.slane %v2603_v48, 4  ;;  %v4702_v60 = vrot.slane %v4670_v10, 9  ;;  %v4675_v40 = vcombine.high %v2835_v37, %v2835_v37  ;;  %v2931_v52 = vrot.slane %v4671_v33, 5 }
 0x1f7   :  { %v2618_v49 = vrot.slane %v2617_v47, 4  ;;  %v4703_v25 = vrot.slane %v4672_v51, 9  ;;  %v2935_v55 = vrot.slane %v4673_v46, 5  ;;  %v4676_v7 = vcombine.low %v2836_v42, %v2836_v42  ;;  %v1693_v46 = vld [vmem:[#allocation2 + $0x10] sm:$0x1e] }
 0x1f8   :  { %v2609_v21 = vsel %vm6488_vm1, %v2604_v11, %v2608_v43  ;;  %5081 = vmatpush3.bf16.msra.mxu0 %v5784_v4  ;;  %v4677_v14 = vcombine.high %v2836_v42, %v2836_v42  ;;  %v4704_v16 = vrot.slane %v4674_v54, 9  ;;  %v2932_v13 = vsel %vm6606_vm13, %v4702_v60, %v2931_v52  ;;  %v6716_v42 = vld [vmem:[#allocation3 + $0x200] sm:$0xff]  }
 0x1f9   :  { %v2623_v0 = vsel %vm6488_vm1, %v2618_v49, %v2622_v23  ;;  %v2936_v35 = vsel %vm6606_vm13, %v4703_v25, %v2935_v55  ;;  %v2939_v6 = vrot.slane %v4675_v40, 5  ;;  %5082 = vmatprep.subr.bf16.mxu0 %v5791_v56  ;;  %v4705_v24 = vrot.slane %v4676_v7, 9  ;;  %v2840_v23 = vld [vmem:[#allocation2 + $0x40] sm:$0x1e]  ;;  %v1694_v55 = vld [vmem:[#allocation2 + $0x18] sm:$0x1e] }
 0x1fa   :  { %v4661_v41 = vcombine.low %v2609_v21, %v2623_v0  ;;  %v4718_v4 = vcombine.low %v2932_v13, %v2936_v35  ;;  %v2943_v19 = vrot.slane %v4677_v14, 5  ;;  %5067 = vmatmul.mubr.bf16.gmra.mrb[44].mxu0 %v5790_v32  ;;  %v4678_v34 = vcombine.low %v2837_v29, %v2837_v29  ;;  %v5800_v35 = vld [vmem:[#allocation3 + $0x188] sm:$0xff]  }
 0x1fb   :  { %v2940_v27 = vsel %vm6606_vm13, %v4704_v16, %v2939_v6  ;;  %v4679_v43 = vcombine.high %v2837_v29, %v2837_v29  ;;  %v4680_v44 = vcombine.low %v2838_v62, %v2838_v62  ;;  %v4681_v31 = vcombine.high %v2838_v62, %v2838_v62 }
 0x1fc   :  { %5163 = vmatmul.mubr.bf16.gmra.mrb[12].mxu1 %v4661_v41  ;;  %v2944_v37 = vsel %vm6606_vm13, %v4705_v24, %v2943_v19  ;;  %5083 = vmatpush3.bf16.msra.mxu0 %v5791_v56  ;;  %v4544_v48 = vcombine.low %v1692_v5, %v1692_v5  ;;  %v4706_v47 = vrot.slane %v4678_v34, 9  ;;  %v4545_v60 = vcombine.high %v1692_v5, %v1692_v5  ;;  %v2842_v24 = vld [vmem:[#allocation2 + $0x60] sm:$0x1e] }
 0x1fd   :  { %5182 = vmatprep.mubr.bf16.mxu1 %v4718_v4  ;;  %v4719_v10 = vcombine.low %v2940_v27, %v2944_v37  ;;  %v2947_v33 = vrot.slane %v4679_v43, 5  ;;  %v4707_v51 = vrot.slane %v4680_v44, 9  ;;  %5084 = vmatprep.subr.bf16.mxu0 %v5801_v18  ;;  %v2951_v11 = vrot.slane %v4681_v31, 5  ;;  %v2841_v4 = vld [vmem:[#allocation2 + $0x58] sm:$0x1e] }
 0x1fe   :  { %v4575_v54 = vrot.slane %v4544_v48, 9  ;;  %v4682_v40 = vcombine.low %v2839_v50, %v2839_v50  ;;  %v4683_v52 = vcombine.high %v2839_v50, %v2839_v50  ;;  %v4684_v56 = vcombine.low %v2840_v23, %v2840_v23 }
 0x1ff   :  { %v2948_v49 = vsel %vm6606_vm13, %v4706_v47, %v2947_v33  ;;  %v4685_v25 = vcombine.high %v2840_v23, %v2840_v23  ;;  %v2952_v29 = vsel %vm6606_vm13, %v4707_v51, %v2951_v11  ;;  %v1796_v21 = vrot.slane %v4545_v60, 5  ;;  %v2843_v51 = vld [vmem:[#allocation2 + $0x68] sm:$0x1e] }
 0x200   :  { %5085 = vmatpush3.bf16.msra.mxu0 %v5801_v18  ;;  %v4708_v7 = vrot.slane %v4682_v40, 9  ;;  %v4546_v14 = vcombine.low %v1693_v46, %v1693_v46  ;;  %v4720_v16 = vcombine.low %v2948_v49, %v2952_v29  ;;  %v2955_v32 = vrot.slane %v4683_v52, 5 }
 0x201   :  { %v4709_v62 = vrot.slane %v4684_v56, 9  ;;  %v2959_v0 = vrot.slane %v4685_v25, 5  ;;  %5262 = vmatprep.subr.bf16.mxu0 %v6716_v42  ;;  %v1797_v13 = vsel %vm6606_vm13, %v4575_v54, %v1796_v21  ;;  %v4547_v6 = vcombine.high %v1693_v46, %v1693_v46  ;;  %v6739_v54 = vld [vmem:[#allocation3 + $0x208] sm:$0xff]   ;;  %v2844_v25 = vld [vmem:[#allocation2 + $0x70] sm:$0x1e] }
 0x202   :  { %v4548_v5 = vcombine.low %v1694_v55, %v1694_v55  ;;  %v4549_v41 = vcombine.high %v1694_v55, %v1694_v55  ;;  %v4590_v18 = vcombine.low %v1793_v9, %v1797_v13  ;;  %v2956_v19 = vsel %vm6606_vm13, %v4708_v7, %v2955_v32  ;;  %v5802_v9 = vld [vmem:[#allocation3 + $0x190] sm:$0xff]  }
 0x203   :  { %v2960_v27 = vsel %vm6606_vm13, %v4709_v62, %v2959_v0  ;;  %v4576_v34 = vrot.slane %v4546_v14, 9  ;;  %v1800_v44 = vrot.slane %v4547_v6, 5  ;;  %v4686_v31 = vcombine.low %v2841_v4, %v2841_v4  ;;  %v1697_v7 = vld [vmem:[#allocation2 + $0x30] sm:$0x1e]  ;;  %v5820_v0 = vld [vmem:[#allocation3 + $0x198] sm:$0xff]  }
 0x204   :  { %5183 = vmatmul.mubr.bf16.vlgmr.msra.gmra.mrb[0].mxu1 %v4719_v10  ;;  %v4721_v43 = vcombine.low %v2956_v19, %v2960_v27  ;;  %v4577_v50 = vrot.slane %v4548_v5, 9  ;;  %v1804_v37 = vrot.slane %v4549_v41, 5  ;;  %v4687_v48 = vcombine.high %v2841_v4, %v2841_v4  ;;  %5086 = vmatprep.mubr.bf16.mxu0 %v4590_v18  ;;  %v1698_v41 = vld [vmem:[#allocation2 + $0x38] sm:$0x1e]  ;;  %v6747_v4 = vld [vmem:[#allocation3 + $0x210] sm:$0xff]  }
 0x205   :  { %5199 = vmatpush3.bf16.msra.mxu1 %v6697_v17  ;;  %5186 = vmatprep.mubr.bf16.mxu1 %v4720_v16  ;;  %v4688_v23 = vcombine.low %v2842_v24, %v2842_v24  ;;  %v1801_v47 = vsel %vm6606_vm13, %v4576_v34, %v1800_v44  ;;  %v4689_v33 = vcombine.high %v2842_v24, %v2842_v24  ;;  %v4710_v11 = vrot.slane %v4686_v31, 9  ;;  %v2845_v34 = vld [vmem:[#allocation2 + $0x78] sm:$0x1e] }
 0x206   :  { %5200 = vmatprep.subr.bf16.mxu1 %v5800_v35  ;;  %v1805_v10 = vsel %vm6606_vm13, %v4577_v50, %v1804_v37  ;;  %v2963_v17 = vrot.slane %v4687_v48, 5  ;;  %v4550_v49 = vcombine.low %v1695_v57, %v1695_v57  ;;  %v4551_v52 = vcombine.high %v1695_v57, %v1695_v57 }
 0x207   :  { %v4591_v46 = vcombine.low %v1801_v47, %v1805_v10  ;;  %v4711_v60 = vrot.slane %v4688_v23, 9  ;;  %v2967_v40 = vrot.slane %v4689_v33, 5  ;;  %v4552_v56 = vcombine.low %v1696_v8, %v1696_v8  ;;  %v2846_v47 = vld [vmem:[#allocation2 + $0x80] sm:$0x1e] }
 0x208   :  { %v2964_v55 = vsel %vm6606_vm13, %v4710_v11, %v2963_v17  ;;  %v4553_v29 = vcombine.high %v1696_v8, %v1696_v8  ;;  %v4690_v21 = vcombine.low %v2843_v51, %v2843_v51  ;;  %v4578_v16 = vrot.slane %v4550_v49, 9  ;;  %v6757_v11 = vld [vmem:[#allocation3 + $0x218] sm:$0xff]  }
 0x209   :  { %5201 = vmatpush3.bf16.msra.mxu1 %v5800_v35  ;;  %5087 = vmatmul.mubr.bf16.vlgmr.msra.gmra.mrb[32].mxu0 %v4591_v46  ;;  %v2968_v14 = vsel %vm6606_vm13, %v4711_v60, %v2967_v40  ;;  %v1808_v32 = vrot.slane %v4551_v52, 5  ;;  %v4579_v62 = vrot.slane %v4552_v56, 9  ;;  %v4691_v35 = vcombine.high %v2843_v51, %v2843_v51  ;;  %v1699_v46 = vld [vmem:[#allocation2 + $0x50] sm:$0x1e] }
 0x20a   :  { %5202 = vmatprep.subr.bf16.mxu1 %v5802_v9  ;;  %5263 = vmatpush3.bf16.msra.mxu0 %v6716_v42  ;;  %v4722_v13 = vcombine.low %v2964_v55, %v2968_v14  ;;  %v1812_v6 = vrot.slane %v4553_v29, 5  ;;  %v4692_v5 = vcombine.low %v2844_v25, %v2844_v25  ;;  %v4693_v18 = vcombine.high %v2844_v25, %v2844_v25  ;;  %v1700_v29 = vld [vmem:[#allocation2 + $0x58] sm:$0x1e] }
 0x20b   :  { %5264 = vmatprep.subr.bf16.mxu0 %v6739_v54  ;;  %v1809_v24 = vsel %vm6606_vm13, %v4578_v16, %v1808_v32  ;;  %v4712_v19 = vrot.slane %v4690_v21, 9  ;;  %v4554_v27 = vcombine.low %v1697_v7, %v1697_v7  ;;  %v2971_v50 = vrot.slane %v4691_v35, 5  ;;  %v5840_v32 = vld [vmem:[#allocation3 + $0x1a8] sm:$0xff]  }
 0x20c   :  { %5187 = vmatmul.mubr.bf16.gmra.mrb[4].mxu1 %v4721_v43  ;;  %v1813_v44 = vsel %vm6606_vm13, %v4579_v62, %v1812_v6  ;;  %v4713_v37 = vrot.slane %v4692_v5, 9  ;;  %v4555_v31 = vcombine.high %v1697_v7, %v1697_v7  ;;  %v5822_v43 = vld [vmem:[#allocation3 + $0x1a0] sm:$0xff]   ;;  %v2975_v23 = vrot.slane %v4693_v18, 5  ;;  %v2847_v62 = vld [vmem:[#allocation2 + $0x88] sm:$0x1e] }
 0x20d   :  { %5203 = vmatpush3.bf16.msra.mxu1 %v5802_v9  ;;  %5190 = vmatprep.mubr.bf16.mxu1 %v4722_v13  ;;  %v4592_v48 = vcombine.low %v1809_v24, %v1813_v44  ;;  %v4556_v57 = vcombine.low %v1698_v41, %v1698_v41  ;;  %v4557_v8 = vcombine.high %v1698_v41, %v1698_v41  ;;  %v4580_v9 = vrot.slane %v4554_v27, 9  ;;  %v2848_v5 = vld [vmem:[#allocation2 + $0x90] sm:$0x1e]  ;;  %v6767_v41 = vld [vmem:[#allocation3 + $0x220] sm:$0xff]  }
 0x20e   :  { %5204 = vmatprep.subr.bf16.mxu1 %v5820_v0  ;;  %5265 = vmatpush3.bf16.msra.mxu0 %v6739_v54  ;;  %v2972_v10 = vsel %vm6606_vm13, %v4712_v19, %v2971_v50  ;;  %v1816_v33 = vrot.slane %v4555_v31, 5  ;;  %v4694_v51 = vcombine.low %v2845_v34, %v2845_v34  ;;  %v2976_v17 = vsel %vm6606_vm13, %v4713_v37, %v2975_v23  ;;  %v1701_v31 = vld [vmem:[#allocation2 + $0x60] sm:$0x1e] }
 0x20f   :  { %5266 = vmatprep.subr.bf16.mxu0 %v6747_v4  ;;  %5090 = vmatprep.mubr.bf16.mxu0 %v4592_v48  ;;  %v4581_v60 = vrot.slane %v4556_v57, 9  ;;  %v1820_v40 = vrot.slane %v4557_v8, 5  ;;  %v4695_v49 = vcombine.high %v2845_v34, %v2845_v34  ;;  %v4723_v52 = vcombine.low %v2972_v10, %v2976_v17  ;;  %v5842_v8 = vld [vmem:[#allocation3 + $0x1b0] sm:$0xff]   ;;  %v1702_v10 = vld [vmem:[#allocation2 + $0x68] sm:$0x1e] }
 0x210   :  { %v1817_v56 = vsel %vm6606_vm13, %v4580_v9, %v1816_v33  ;;  %v4696_v25 = vcombine.low %v2846_v47, %v2846_v47  ;;  %v4697_v55 = vcombine.high %v2846_v47, %v2846_v47  ;;  %v4714_v7 = vrot.slane %v4694_v51, 9  ;;  %v6777_v17 = vld [vmem:[#allocation3 + $0x228] sm:$0xff]  }
 0x211   :  { %5205 = vmatpush3.bf16.msra.mxu1 %v5820_v0  ;;  %v1821_v21 = vsel %vm6606_vm13, %v4581_v60, %v1820_v40  ;;  %v2979_v14 = vrot.slane %v4695_v49, 5  ;;  %v4558_v16 = vcombine.low %v1699_v46, %v1699_v46  ;;  %v4559_v35 = vcombine.high %v1699_v46, %v1699_v46  ;;  %v1703_v46 = vld [vmem:[#allocation2 + $0x70] sm:$0x1e] }
 0x212   :  { %5206 = vmatprep.subr.bf16.mxu1 %v5822_v43  ;;  %5267 = vmatpush3.bf16.msra.mxu0 %v6747_v4  ;;  %v4593_v13 = vcombine.low %v1817_v56, %v1821_v21  ;;  %v4715_v0 = vrot.slane %v4696_v25, 9  ;;  %v2983_v6 = vrot.slane %v4697_v55, 5  ;;  %v4560_v18 = vcombine.low %v1700_v29, %v1700_v29  ;;  %v1704_v56 = vld [vmem:[#allocation2 + $0x78] sm:$0x1e] }
 0x213   :  { %5268 = vmatprep.subr.bf16.mxu0 %v6757_v11  ;;  %v2980_v24 = vsel %vm6606_vm13, %v4714_v7, %v2979_v14  ;;  %v4561_v19 = vcombine.high %v1700_v29, %v1700_v29  ;;  %v4582_v27 = vrot.slane %v4558_v16, 9  ;;  %v1824_v44 = vrot.slane %v4559_v35, 5 }
 0x214   :  { %5191 = vmatmul.mubr.bf16.gmra.mrb[8].mxu1 %v4723_v52  ;;  %5091 = vmatmul.mubr.bf16.gmra.mrb[36].mxu0 %v4593_v13  ;;  %v2984_v34 = vsel %vm6606_vm13, %v4715_v0, %v2983_v6  ;;  %v4698_v50 = vcombine.low %v2847_v62, %v2847_v62  ;;  %v4699_v37 = vcombine.high %v2847_v62, %v2847_v62  ;;  %v4583_v23 = vrot.slane %v4560_v18, 9  ;;  %v5857_v13 = vld [vmem:[#allocation3 + $0x1b8] sm:$0xff]   ;;  %v1705_v0 = vld [vmem:[#allocation2 + $0x80] sm:$0x1e] }
 0x215   :  { %5207 = vmatpush3.bf16.msra.mxu1 %v5822_v43  ;;  %v4724_v48 = vcombine.low %v2980_v24, %v2984_v34  ;;  %v1828_v57 = vrot.slane %v4561_v19, 5  ;;  %v4700_v47 = vcombine.low %v2848_v5, %v2848_v5  ;;  %v1825_v43 = vsel %vm6606_vm13, %v4582_v27, %v1824_v44  ;;  %v1706_v24 = vld [vmem:[#allocation2 + $0x88] sm:$0x1e]  ;;  %v5851_v34 = vld [vmem:[#allocation2 + $0x10] ss:$8 sps:$4 sm:$0xff]  }
 0x216   :  { %5208 = vmatprep.subr.bf16.mxu1 %v5840_v32  ;;  %5269 = vmatpush3.bf16.msra.mxu0 %v6757_v11  ;;  %v4701_v9 = vcombine.high %v2848_v5, %v2848_v5  ;;  %v4716_v33 = vrot.slane %v4698_v50, 9  ;;  %v2987_v51 = vrot.slane %v4699_v37, 5  ;;  %v4562_v49 = vcombine.low %v1701_v31, %v1701_v31  ;;  %v6789_v50 = vld [vmem:[#allocation3 + $0x230] sm:$0xff]  }
 0x217   :  { %5270 = vmatprep.subr.bf16.mxu0 %v6767_v41  ;;  %5194 = vmatprep.mubr.bf16.mxu1 %v4724_v48  ;;  %v1829_v60 = vsel %vm6606_vm13, %v4583_v23, %v1828_v57  ;;  %v4717_v40 = vrot.slane %v4700_v47, 9  ;;  %v4563_v52 = vcombine.high %v1701_v31, %v1701_v31  ;;  %v4564_v21 = vcombine.low %v1702_v10, %v1702_v10  ;;  %v3973_v57 = vld [vmem:[#allocation2 + $0x10] sm:$0x1e] }
 0x218   :  { %v4594_v25 = vcombine.low %v1825_v43, %v1829_v60  ;;  %v2988_v55 = vsel %vm6606_vm13, %v4716_v33, %v2987_v51  ;;  %v2991_v29 = vrot.slane %v4701_v9, 5  ;;  %v4565_v7 = vcombine.high %v1702_v10, %v1702_v10  ;;  %v5859_v43 = vld [vmem:[#allocation3 + $0x1c0] sm:$0xff]   ;;  %v3974_v51 = vld [vmem:[#allocation2 + $0x18] sm:$0x1e] }
 0x219   :  { %5209 = vmatpush3.bf16.msra.mxu1 %v5840_v32  ;;  %v4584_v14 = vrot.slane %v4562_v49, 9  ;;  %v1832_v16 = vrot.slane %v4563_v52, 5  ;;  %v4566_v62 = vcombine.low %v1703_v46, %v1703_v46  ;;  %v4585_v35 = vrot.slane %v4564_v21, 9  ;;  %v3975_v49 = vld [vmem:[#allocation2 + $0x20] sm:$0x1e] }
 0x21a   :  { %5210 = vmatprep.subr.bf16.mxu1 %v5842_v8  ;;  %5271 = vmatpush3.bf16.msra.mxu0 %v6767_v41  ;;  %v2992_v6 = vsel %vm6606_vm13, %v4717_v40, %v2991_v29  ;;  %v4567_v32 = vcombine.high %v1703_v46, %v1703_v46  ;;  %v4568_v5 = vcombine.low %v1704_v56, %v1704_v56  ;;  %v1836_v27 = vrot.slane %v4565_v7, 5  ;;  %v6799_v29 = vld [vmem:[#allocation3 + $0x238] sm:$0xff]  }
 0x21b   :  { %5094 = vmatprep.mubr.bf16.mxu0 %v4594_v25  ;;  %5272 = vmatprep.subr.bf16.mxu0 %v6777_v17  ;;  %v4725_v18 = vcombine.low %v2988_v55, %v2992_v6  ;;  %v1833_v19 = vsel %vm6606_vm13, %v4584_v14, %v1832_v16  ;;  %v4569_v44 = vcombine.high %v1704_v56, %v1704_v56  ;;  %v4586_v37 = vrot.slane %v4566_v62, 9  ;;  %v3976_v62 = vld [vmem:[#allocation2 + $0x28] sm:$0x1e] }
 0x21c   :  { %v1840_v31 = vrot.slane %v4567_v32, 5  ;;  %v4587_v48 = vrot.slane %v4568_v5, 9  ;;  %v4570_v23 = vcombine.low %v1705_v0, %v1705_v0  ;;  %v1837_v47 = vsel %vm6606_vm13, %v4585_v35, %v1836_v27  ;;  %v3977_v5 = vld [vmem:[#allocation2 + $0x30] sm:$0x1e]  ;;  %v5860_v27 = vld [vmem:[#allocation2 + $0x20] ss:$8 sps:$4 sm:$0xff]  }
 0x21d   :  { %5211 = vmatpush3.bf16.msra.mxu1 %v5842_v8  ;;  %v1844_v10 = vrot.slane %v4569_v44, 5  ;;  %v4571_v9 = vcombine.high %v1705_v0, %v1705_v0  ;;  %v4572_v33 = vcombine.low %v1706_v24, %v1706_v24  ;;  %v4595_v46 = vcombine.low %v1833_v19, %v1837_v47 }
 0x21e   :  { %5195 = vmatmul.mubr.bf16.gmra.mrb[12].mxu1 %v4725_v18  ;;  %5212 = vmatprep.subr.bf16.mxu1 %v5857_v13  ;;  %v1841_v8 = vsel %vm6606_vm13, %v4586_v37, %v1840_v31  ;;  %v4573_v60 = vcombine.high %v1706_v24, %v1706_v24  ;;  %v4588_v40 = vrot.slane %v4570_v23, 9  ;;  %v4798_v55 = vcombine.low %v3973_v57, %v3973_v57  ;;  %v5871_v37 = vld [vmem:[#allocation3 + $0x1c8] sm:$0xff]   ;;  %v3978_v23 = vld [vmem:[#allocation2 + $0x38] sm:$0x1e] }
 0x21f   :  { %5214 = vmatprep.mubr.bf16.mxu1 %v5851_v34  ;;  %5273 = vmatpush3.bf16.msra.mxu0 %v6777_v17  ;;  %v1845_v52 = vsel %vm6606_vm13, %v4587_v48, %v1844_v10  ;;  %v1848_v56 = vrot.slane %v4571_v9, 5  ;;  %v4589_v25 = vrot.slane %v4572_v33, 9  ;;  %v4799_v14 = vcombine.high %v3973_v57, %v3973_v57  ;;  %v5865_v57 = vld [vmem:[#allocation2 + $0x30] ss:$8 sps:$4 sm:$0xff]  }
 0x220   :  { %5274 = vmatprep.subr.bf16.mxu0 %v6789_v50  ;;  %5095 = vmatmul.mubr.bf16.gmra.mrb[40].mxu0 %v4595_v46  ;;  %v4596_v21 = vcombine.low %v1841_v8, %v1845_v52  ;;  %v1852_v7 = vrot.slane %v4573_v60, 5  ;;  %v4800_v16 = vcombine.low %v3974_v51, %v3974_v51  ;;  %v4801_v6 = vcombine.high %v3974_v51, %v3974_v51  ;;  %v3979_v51 = vld [vmem:[#allocation2 + $0x40] sm:$0x1e] }
 0x221   :  { %5213 = vmatpush3.bf16.msra.mxu1 %v5857_v13  ;;  %v1849_v0 = vsel %vm6606_vm13, %v4588_v40, %v1848_v56  ;;  %v4830_v35 = vrot.slane %v4798_v55, 9  ;;  %v4802_v32 = vcombine.low %v3975_v49, %v3975_v49  ;;  %v4071_v18 = vrot.slane %v4799_v14, 5 }
 0x222   :  { %5230 = vmatprep.subr.bf16.mxu1 %v5859_v43  ;;  %5098 = vmatprep.mubr.bf16.mxu0 %v4596_v21  ;;  %v1853_v24 = vsel %vm6606_vm13, %v4589_v25, %v1852_v7  ;;  %v4831_v13 = vrot.slane %v4800_v16, 9  ;;  %v4803_v19 = vcombine.high %v3975_v49, %v3975_v49  ;;  %v4075_v44 = vrot.slane %v4801_v6, 5  ;;  %v3980_v49 = vld [vmem:[#allocation2 + $0x48] sm:$0x1e]  ;;  %v5873_v21 = vld [vmem:[#allocation3 + $0x1d0] sm:$0xff]  }
 0x223   :  { %5275 = vmatpush3.bf16.msra.mxu0 %v6789_v50  ;;  %v4597_v34 = vcombine.low %v1849_v0, %v1853_v24  ;;  %v4804_v31 = vcombine.low %v3976_v62, %v3976_v62  ;;  %v4805_v48 = vcombine.high %v3976_v62, %v3976_v62  ;;  %v4072_v47 = vsel %vm6606_vm13, %v4830_v35, %v4071_v18  ;;  %v3981_v0 = vld [vmem:[#allocation2 + $0x60] sm:$0x1e] }
 0x224   :  { %5276 = vmatprep.subr.bf16.mxu0 %v6799_v29  ;;  %v4832_v10 = vrot.slane %v4802_v32, 9  ;;  %v4079_v9 = vrot.slane %v4803_v19, 5  ;;  %v4806_v33 = vcombine.low %v3977_v5, %v3977_v5  ;;  %v4076_v46 = vsel %vm6606_vm13, %v4831_v13, %v4075_v44 }
 0x225   :  { %v4833_v8 = vrot.slane %v4804_v31, 9  ;;  %v4083_v60 = vrot.slane %v4805_v48, 5  ;;  %v4807_v40 = vcombine.high %v3977_v5, %v3977_v5  ;;  %v4846_v52 = vcombine.low %v4072_v47, %v4076_v46  ;;  %v3982_v5 = vld [vmem:[#allocation2 + $0x68] sm:$0x1e]  ;;  %v5884_v47 = vld [vmem:[#allocation3 + $0x1d8] sm:$0xff]  }
 0x226   :  { %5215 = vmatmul.mubr.bf16.vlgmr.msra.gmra.mrb[0].mxu1 %v5860_v27  ;;  %v4080_v56 = vsel %vm6606_vm13, %v4832_v10, %v4079_v9  ;;  %v4808_v25 = vcombine.low %v3978_v23, %v3978_v23  ;;  %v4834_v55 = vrot.slane %v4806_v33, 9  ;;  %v4809_v14 = vcombine.high %v3978_v23, %v3978_v23  ;;  %v3444_v23 = vld [vmem:[#allocation2 + $0x10] sm:$0x1f] }
 0x227   :  { %5231 = vmatpush3.bf16.msra.mxu1 %v5859_v43  ;;  %5218 = vmatprep.mubr.bf16.mxu1 %v5865_v57  ;;  %v4084_v7 = vsel %vm6606_vm13, %v4833_v8, %v4083_v60  ;;  %v4087_v16 = vrot.slane %v4807_v40, 5  ;;  %v4810_v62 = vcombine.low %v3979_v51, %v3979_v51  ;;  %v4811_v35 = vcombine.high %v3979_v51, %v3979_v51  ;;  %v5875_v51 = vld [vmem:[#allocation2 + $0x60] ss:$8 sps:$4 sm:$0xff]   ;;  %v3445_v40 = vld [vmem:[#allocation2 + $0x18] sm:$0x1f] }
 0x228   :  { %5232 = vmatprep.subr.bf16.mxu1 %v5871_v37  ;;  %5277 = vmatpush3.bf16.msra.mxu0 %v6799_v29  ;;  %v4847_v43 = vcombine.low %v4080_v56, %v4084_v7  ;;  %v4835_v6 = vrot.slane %v4808_v25, 9  ;;  %v4812_v32 = vcombine.low %v3980_v49, %v3980_v49  ;;  %v4091_v18 = vrot.slane %v4809_v14, 5 }
 0x229   :  { %5099 = vmatmul.mubr.bf16.gmra.mrb[44].mxu0 %v4597_v34  ;;  %v4088_v24 = vsel %vm6606_vm13, %v4834_v55, %v4087_v16  ;;  %v4813_v13 = vcombine.high %v3980_v49, %v3980_v49  ;;  %v4836_v19 = vrot.slane %v4810_v62, 9  ;;  %v4095_v27 = vrot.slane %v4811_v35, 5  ;;  %v5874_v34 = vld [vmem:[#allocation2 + $0x40] ss:$8 sps:$4 sm:$0xff]   ;;  %v3983_v55 = vld [vmem:[#allocation2 + $0x70] sm:$0x1e] }
 0x22a   :  { %5278 = vmatprep.mubr.bf16.mxu0 %v4846_v52  ;;  %v4837_v44 = vrot.slane %v4812_v32, 9  ;;  %v4814_v31 = vcombine.low %v3981_v0, %v3981_v0  ;;  %v4815_v48 = vcombine.high %v3981_v0, %v3981_v0  ;;  %v4092_v57 = vsel %vm6606_vm13, %v4835_v6, %v4091_v18  ;;  %v5885_v62 = vld [vmem:[#allocation3 + $0x1e0] sm:$0xff]  }
 0x22b   :  { %5233 = vmatpush3.bf16.msra.mxu1 %v5871_v37  ;;  %v4099_v10 = vrot.slane %v4813_v13, 5  ;;  %v4816_v9 = vcombine.low %v3982_v5, %v3982_v5  ;;  %v4817_v33 = vcombine.high %v3982_v5, %v3982_v5  ;;  %v4848_v46 = vcombine.low %v4088_v24, %v4092_v57  ;;  %v3984_v5 = vld [vmem:[#allocation2 + $0x78] sm:$0x1e] }
 0x22c   :  { %5234 = vmatprep.subr.bf16.mxu1 %v5873_v21  ;;  %v4096_v8 = vsel %vm6606_vm13, %v4836_v19, %v4095_v27  ;;  %v4838_v37 = vrot.slane %v4814_v31, 9  ;;  %v4103_v60 = vrot.slane %v4815_v48, 5  ;;  %v4750_v25 = vcombine.low %v3444_v23, %v3444_v23  ;;  %v5886_v48 = vld [vmem:[#allocation2 + $0x70] ss:$8 sps:$4 sm:$0xff]  }
 0x22d   :  { %v4100_v49 = vsel %vm6606_vm13, %v4837_v44, %v4099_v10  ;;  %v4839_v52 = vrot.slane %v4816_v9, 9  ;;  %v4107_v56 = vrot.slane %v4817_v33, 5  ;;  %v4751_v16 = vcombine.high %v3444_v23, %v3444_v23  ;;  %v3446_v9 = vld [vmem:[#allocation2 + $0x20] sm:$0x1f]  ;;  %v5896_v33 = vld [vmem:[#allocation3 + $0x1e8] sm:$0xff]  }
 0x22e   :  { %5219 = vmatmul.mubr.bf16.gmra.mrb[4].mxu1 %v5874_v34  ;;  %v4849_v7 = vcombine.low %v4096_v8, %v4100_v49  ;;  %v4104_v14 = vsel %vm6606_vm13, %v4838_v37, %v4103_v60  ;;  %v4752_v6 = vcombine.low %v3445_v40, %v3445_v40  ;;  %v4753_v35 = vcombine.high %v3445_v40, %v3445_v40  ;;  %v3447_v60 = vld [vmem:[#allocation2 + $0x28] sm:$0x1f] }
 0x22f   :  { %5235 = vmatpush3.bf16.msra.mxu1 %v5873_v21  ;;  %5222 = vmatprep.mubr.bf16.mxu1 %v5875_v51  ;;  %v4108_v0 = vsel %vm6606_vm13, %v4839_v52, %v4107_v56  ;;  %v3541_v32 = vshrl.u32 %v4750_v25, 16  ;;  %v3544_v18 = vshll.u32 %v4750_v25, 16  ;;  %v3550_v13 = vshll.u32 %v4751_v16, 16  ;;  %v5887_v40 = vld [vmem:[#allocation2 + $0x80] ss:$8 sps:$4 sm:$0xff]  }
 0x230   :  { %5236 = vmatprep.subr.bf16.mxu1 %v5884_v47  ;;  %v4850_v24 = vcombine.low %v4104_v14, %v4108_v0  ;;  %v4818_v21 = vcombine.low %v3983_v55, %v3983_v55  ;;  %v3555_v27 = vshrl.u32 %v4752_v6, 16  ;;  %v3558_v44 = vshll.u32 %v4752_v6, 16 }
 0x231   :  { %5279 = vmatmul.mubr.bf16.vlgmr.msra.gmra.mrb[48].mxu0 %v4847_v43  ;;  %v3543_v19 = vrot.slane %v3541_v32, 4  ;;  %v3564_v31 = vshll.u32 %v4753_v35, 16  ;;  %v3546_v23 = vrot.slane %v3544_v18, 5  ;;  %v3552_v34 = vrot.slane %v3550_v13, 5  ;;  %v5897_v32 = vld [vmem:[#allocation3 + $0x1f0] sm:$0xff]  }
 0x232   :  { %5282 = vmatprep.mubr.bf16.mxu0 %v4848_v46  ;;  %v4819_v57 = vcombine.high %v3983_v55, %v3983_v55  ;;  %v4820_v10 = vcombine.low %v3984_v5, %v3984_v5  ;;  %v3557_v51 = vrot.slane %v3555_v27, 4  ;;  %v3560_v43 = vrot.slane %v3558_v44, 5 }
 0x233   :  { %5237 = vmatpush3.bf16.msra.mxu1 %v5884_v47  ;;  %v3566_v8 = vrot.slane %v3564_v31, 5  ;;  %v4821_v37 = vcombine.high %v3984_v5, %v3984_v5  ;;  %v3547_v46 = vor.u32 %v3546_v23, %v3543_v19  ;;  %v4840_v49 = vrot.slane %v4818_v21, 9  ;;  %v3448_v31 = vld [vmem:[#allocation2 + $0x30] sm:$0x1f] }
 0x234   :  { %5238 = vmatprep.subr.bf16.mxu1 %v5885_v62  ;;  %v4111_v52 = vrot.slane %v4819_v57, 5  ;;  %v4841_v56 = vrot.slane %v4820_v10, 9  ;;  %v3561_v47 = vor.u32 %v3560_v43, %v3557_v51  ;;  %v4754_v14 = vcombine.low %v3446_v9, %v3446_v9  ;;  %v3450_v51 = vld [vmem:[#allocation2 + $0x40] sm:$0x1f] }
 0x235   :  { %v4115_v25 = vrot.slane %v4821_v37, 5  ;;  %v4755_v16 = vcombine.high %v3446_v9, %v3446_v9  ;;  %v3548_v55 = vrot.slane %v3547_v46, 4  ;;  %v4756_v6 = vcombine.low %v3447_v60, %v3447_v60 }
 0x236   :  { %5223 = vmatmul.mubr.bf16.gmra.mrb[8].mxu1 %v5886_v48  ;;  %v4112_v0 = vsel %vm6606_vm13, %v4840_v49, %v4111_v52  ;;  %v4757_v35 = vcombine.high %v3447_v60, %v3447_v60  ;;  %v3562_v5 = vrot.slane %v3561_v47, 4  ;;  %v3569_v13 = vshrl.u32 %v4754_v14, 16  ;;  %v3449_v48 = vld [vmem:[#allocation2 + $0x38] sm:$0x1f] }
 0x237   :  { %5239 = vmatpush3.bf16.msra.mxu1 %v5885_v62  ;;  %5226 = vmatprep.mubr.bf16.mxu1 %v5887_v40  ;;  %v4116_v18 = vsel %vm6606_vm13, %v4841_v56, %v4115_v25  ;;  %v3572_v21 = vshll.u32 %v4754_v14, 16  ;;  %v3553_v19 = vsel %vm6488_vm1, %v3548_v55, %v3552_v34  ;;  %v3578_v27 = vshll.u32 %v4755_v16, 16  ;;  %v5898_v34 = vld [vmem:[#allocation2 + $0x90] ss:$8 sps:$4 sm:$0xff]  }
 0x238   :  { %5240 = vmatprep.subr.bf16.mxu1 %v5896_v33  ;;  %v4851_v62 = vcombine.low %v4112_v0, %v4116_v18  ;;  %v3583_v44 = vshrl.u32 %v4756_v6, 16  ;;  %v3567_v23 = vsel %vm6488_vm1, %v3562_v5, %v3566_v8  ;;  %v3571_v57 = vrot.slane %v3569_v13, 4  ;;  %v5907_v40 = vld [vmem:[#allocation3 + $0x1f8] sm:$0xff]   ;;  %v3451_v18 = vld [vmem:[#allocation2 + $0x48] sm:$0x1f] }
 0x239   :  { %5283 = vmatmul.mubr.bf16.gmra.mrb[52].mxu0 %v4849_v7  ;;  %v3574_v10 = vrot.slane %v3572_v21, 5  ;;  %v3586_v9 = vshll.u32 %v4756_v6, 16  ;;  %v4782_v43 = vcombine.low %v3553_v19, %v3567_v23  ;;  %v3580_v37 = vrot.slane %v3578_v27, 5 }
 0x23a   :  { %5286 = vmatprep.mubr.bf16.mxu0 %v4850_v24  ;;  %v3585_v7 = vrot.slane %v3583_v44, 4  ;;  %v3592_v60 = vshll.u32 %v4757_v35, 16  ;;  %v4758_v52 = vcombine.low %v3448_v31, %v3448_v31  ;;  %v4759_v56 = vcombine.high %v3448_v31, %v3448_v31 }
 0x23b   :  { %5241 = vmatpush3.bf16.msra.mxu1 %v5896_v33  ;;  %v3575_v46 = vor.u32 %v3574_v10, %v3571_v57  ;;  %v3588_v49 = vrot.slane %v3586_v9, 5  ;;  %v4760_v47 = vcombine.low %v3449_v48, %v3449_v48  ;;  %v4761_v25 = vcombine.high %v3449_v48, %v3449_v48 }
 0x23c   :  { %5242 = vmatprep.subr.bf16.mxu1 %v5897_v32  ;;  %v3594_v24 = vrot.slane %v3592_v60, 5  ;;  %v4762_v8 = vcombine.low %v3450_v51, %v3450_v51  ;;  %v3597_v55 = vshrl.u32 %v4758_v52, 16  ;;  %v3600_v33 = vshll.u32 %v4758_v52, 16  ;;  %v3452_v52 = vld [vmem:[#allocation2 + $0x60] sm:$0x1f] }
 0x23d   :  { %v3576_v14 = vrot.slane %v3575_v46, 4  ;;  %v3589_v16 = vor.u32 %v3588_v49, %v3585_v7  ;;  %v3606_v0 = vshll.u32 %v4759_v56, 16  ;;  %v3611_v6 = vshrl.u32 %v4760_v47, 16 }
 0x23e   :  { %5227 = vmatmul.mubr.bf16.gmra.mrb[12].mxu1 %v5898_v34  ;;  %v3614_v35 = vshll.u32 %v4760_v47, 16  ;;  %v3620_v5 = vshll.u32 %v4761_v25, 16  ;;  %v3599_v19 = vrot.slane %v3597_v55, 4  ;;  %v3602_v27 = vrot.slane %v3600_v33, 5 }
 0x23f   :  { %5243 = vmatpush3.bf16.msra.mxu1 %v5897_v32  ;;  %5246 = vmatprep.mubr.bf16.mxu1 %v4782_v43  ;;  %v3581_v13 = vsel %vm6488_vm1, %v3576_v14, %v3580_v37  ;;  %v3590_v21 = vrot.slane %v3589_v16, 4  ;;  %v3608_v44 = vrot.slane %v3606_v0, 5  ;;  %v3613_v31 = vrot.slane %v3611_v6, 4 }
 0x240   :  { %5244 = vmatprep.subr.bf16.mxu1 %v5907_v40  ;;  %v3616_v48 = vrot.slane %v3614_v35, 5  ;;  %v3622_v23 = vrot.slane %v3620_v5, 5  ;;  %v3603_v57 = vor.u32 %v3602_v27, %v3599_v19  ;;  %v4763_v10 = vcombine.high %v3450_v51, %v3450_v51 }
 0x241   :  { %5287 = vmatmul.mubr.bf16.gmra.mrb[56].mxu0 %v4851_v62  ;;  %v3595_v32 = vsel %vm6488_vm1, %v3590_v21, %v3594_v24  ;;  %v4764_v9 = vcombine.low %v3451_v18, %v3451_v18  ;;  %v4765_v60 = vcombine.high %v3451_v18, %v3451_v18  ;;  %v3625_v34 = vshrl.u32 %v4762_v8, 16  ;;  %v3453_v24 = vld [vmem:[#allocation2 + $0x68] sm:$0x1f] }
 0x242   :  { %v4783_v43 = vcombine.low %v3581_v13, %v3595_v32  ;;  %v3617_v7 = vor.u32 %v3616_v48, %v3613_v31  ;;  %v3604_v37 = vrot.slane %v3603_v57, 4  ;;  %v3628_v46 = vshll.u32 %v4762_v8, 16  ;;  %v3454_v57 = vld [vmem:[#allocation2 + $0x70] sm:$0x1f] }
 0x243   :  { %5245 = vmatpush3.bf16.msra.mxu1 %v5907_v40  ;;  %v3634_v62 = vshll.u32 %v4763_v10, 16  ;;  %v3639_v49 = vshrl.u32 %v4764_v9, 16  ;;  %v3627_v47 = vrot.slane %v3625_v34, 4  ;;  %v3642_v25 = vshll.u32 %v4764_v9, 16 }
 0x244   :  { %5294 = vmatprep.subr.bf16.mxu1 %v6716_v42  ;;  %v3618_v56 = vrot.slane %v3617_v7, 4  ;;  %v3648_v14 = vshll.u32 %v4765_v60, 16  ;;  %v3609_v51 = vsel %vm6488_vm1, %v3604_v37, %v3608_v44  ;;  %v3630_v40 = vrot.slane %v3628_v46, 5  ;;  %v3455_v7 = vld [vmem:[#allocation2 + $0x78] sm:$0x1f] }
 0x245   :  { %v3636_v16 = vrot.slane %v3634_v62, 5  ;;  %v3641_v55 = vrot.slane %v3639_v49, 4  ;;  %v3644_v33 = vrot.slane %v3642_v25, 5  ;;  %v4766_v6 = vcombine.low %v3452_v52, %v3452_v52 }
 0x246   :  { %5247 = vmatmul.mubr.bf16.vlgmr.msra.gmra.mrb[0].mxu1 %v4783_v43  ;;  %v3623_v8 = vsel %vm6488_vm1, %v3618_v56, %v3622_v23  ;;  %v3650_v0 = vrot.slane %v3648_v14, 5  ;;  %v3631_v5 = vor.u32 %v3630_v40, %v3627_v47  ;;  %v4767_v18 = vcombine.high %v3452_v52, %v3452_v52 }
 0x247   :  { %5302 = vmatpush3.bf16.msra.mxu1 %v6716_v42  ;;  %v4784_v35 = vcombine.low %v3609_v51, %v3623_v8  ;;  %v4768_v13 = vcombine.low %v3453_v24, %v3453_v24  ;;  %v3645_v21 = vor.u32 %v3644_v33, %v3641_v55  ;;  %v4769_v19 = vcombine.high %v3453_v24, %v3453_v24 }
 0x248   :  { %5295 = vmatprep.subr.bf16.mxu1 %v6739_v54  ;;  %v3653_v27 = vshrl.u32 %v4766_v6, 16  ;;  %v3656_v44 = vshll.u32 %v4766_v6, 16  ;;  %v3632_v31 = vrot.slane %v3631_v5, 4  ;;  %v3662_v48 = vshll.u32 %v4767_v18, 16  ;;  %v3456_v6 = vld [vmem:[#allocation2 + $0x80] sm:$0x1f] }
 0x249   :  { %5250 = vmatprep.mubr.bf16.mxu1 %v4784_v35  ;;  %v3667_v42 = vshrl.u32 %v4768_v13, 16  ;;  %v3670_v32 = vshll.u32 %v4768_v13, 16  ;;  %v3646_v23 = vrot.slane %v3645_v21, 4  ;;  %v3676_v43 = vshll.u32 %v4769_v19, 16  ;;  %v3457_v21 = vld [vmem:[#allocation2 + $0x88] sm:$0x1f] }
 0x24a   :  { %v3655_v10 = vrot.slane %v3653_v27, 4  ;;  %v3658_v9 = vrot.slane %v3656_v44, 5  ;;  %v3637_v60 = vsel %vm6488_vm1, %v3632_v31, %v3636_v16  ;;  %v3664_v34 = vrot.slane %v3662_v48, 5  ;;  %v3458_v31 = vld [vmem:[#allocation2 + $0x90] sm:$0x1f] }
 0x24b   :  { %5303 = vmatpush3.bf16.msra.mxu1 %v6739_v54  ;;  %v3669_v37 = vrot.slane %v3667_v42, 4  ;;  %v3672_v46 = vrot.slane %v3670_v32, 5  ;;  %v3651_v62 = vsel %vm6488_vm1, %v3646_v23, %v3650_v0  ;;  %v3678_v52 = vrot.slane %v3676_v43, 5 }
 0x24c   :  { %5296 = vmatprep.subr.bf16.mxu1 %v6747_v4  ;;  %v3659_v49 = vor.u32 %v3658_v9, %v3655_v10  ;;  %v4770_v56 = vcombine.low %v3454_v57, %v3454_v57  ;;  %v4785_v54 = vcombine.low %v3637_v60, %v3651_v62  ;;  %v4771_v25 = vcombine.high %v3454_v57, %v3454_v57 }
 0x24d   :  { %v3673_v47 = vor.u32 %v3672_v46, %v3669_v37  ;;  %v4772_v14 = vcombine.low %v3455_v7, %v3455_v7  ;;  %v4773_v51 = vcombine.high %v3455_v7, %v3455_v7  ;;  %v4774_v57 = vcombine.low %v3456_v6, %v3456_v6 }
 0x24e   :  { %v3660_v24 = vrot.slane %v3659_v49, 4  ;;  %v3681_v40 = vshrl.u32 %v4770_v56, 16  ;;  %v3684_v16 = vshll.u32 %v4770_v56, 16  ;;  %5251 = vmatmul.mubr.bf16.gmra.mrb[4].mxu1 %v4785_v54  ;;  %v3690_v8 = vshll.u32 %v4771_v25, 16 }
 0x24f   :  { %5304 = vmatpush3.bf16.msra.mxu1 %v6747_v4  ;;  %v3674_v55 = vrot.slane %v3673_v47, 4  ;;  %v3695_v33 = vshrl.u32 %v4772_v14, 16  ;;  %v3698_v0 = vshll.u32 %v4772_v14, 16  ;;  %v3704_v13 = vshll.u32 %v4773_v51, 16  ;;  %v3459_v47 = vld [vmem:[#allocation2 + $0x98] sm:$0x1f] }
 0x250   :  { %5297 = vmatprep.subr.bf16.mxu1 %v6757_v11  ;;  %v3665_v35 = vsel %vm6488_vm1, %v3660_v24, %v3664_v34  ;;  %v3683_v5 = vrot.slane %v3681_v40, 4  ;;  %v3686_v18 = vrot.slane %v3684_v16, 5  ;;  %v3692_v19 = vrot.slane %v3690_v8, 5 }
 0x251   :  { %v3679_v4 = vsel %vm6488_vm1, %v3674_v55, %v3678_v52  ;;  %v3697_v27 = vrot.slane %v3695_v33, 4  ;;  %v3700_v44 = vrot.slane %v3698_v0, 5  ;;  %v3706_v32 = vrot.slane %v3704_v13, 5 }
 0x252   :  { %v4786_v48 = vcombine.low %v3665_v35, %v3679_v4  ;;  %v3687_v42 = vor.u32 %v3686_v18, %v3683_v5  ;;  %v4775_v10 = vcombine.high %v3456_v6, %v3456_v6  ;;  %v4776_v9 = vcombine.low %v3457_v21, %v3457_v21 }
 0x253   :  { %5305 = vmatpush3.bf16.msra.mxu1 %v6757_v11  ;;  %v3701_v23 = vor.u32 %v3700_v44, %v3697_v27  ;;  %v4777_v43 = vcombine.high %v3457_v21, %v3457_v21  ;;  %v3709_v60 = vshrl.u32 %v4774_v57, 16  ;;  %v3712_v34 = vshll.u32 %v4774_v57, 16 }
 0x254   :  { %5298 = vmatprep.subr.bf16.mxu1 %v6767_v41  ;;  %5254 = vmatprep.mubr.bf16.mxu1 %v4786_v48  ;;  %v3688_v7 = vrot.slane %v3687_v42, 4  ;;  %v4778_v37 = vcombine.low %v3458_v31, %v3458_v31  ;;  %v3718_v62 = vshll.u32 %v4775_v10, 16  ;;  %v3723_v49 = vshrl.u32 %v4776_v9, 16  ;;  %v3986_v48 = vld [vmem:[#allocation2 + $0x88] sm:$0x1e] }
 0x255   :  { %v3702_v46 = vrot.slane %v3701_v23, 4  ;;  %v3726_v52 = vshll.u32 %v4776_v9, 16  ;;  %v3711_v56 = vrot.slane %v3709_v60, 4  ;;  %v3714_v11 = vrot.slane %v3712_v34, 5 }
 0x256   :  { %v3732_v54 = vshll.u32 %v4777_v43, 16  ;;  %v3693_v25 = vsel %vm6488_vm1, %v3688_v7, %v3692_v19  ;;  %v3725_v24 = vrot.slane %v3723_v49, 4  ;;  %v3720_v55 = vrot.slane %v3718_v62, 5 }
 0x257   :  { %5306 = vmatpush3.bf16.msra.mxu1 %v6767_v41  ;;  %v3707_v14 = vsel %vm6488_vm1, %v3702_v46, %v3706_v32  ;;  %v3728_v51 = vrot.slane %v3726_v52, 5  ;;  %v3715_v16 = vor.u32 %v3714_v11, %v3711_v56  ;;  %v4779_v8 = vcombine.high %v3458_v31, %v3458_v31  ;;  %v3985_v41 = vld [vmem:[#allocation2 + $0x80] sm:$0x1e] }
 0x258   :  { %5299 = vmatprep.subr.bf16.mxu1 %v6777_v17  ;;  %v4787_v40 = vcombine.low %v3693_v25, %v3707_v14  ;;  %v4780_v0 = vcombine.low %v3459_v47, %v3459_v47  ;;  %v4781_v6 = vcombine.high %v3459_v47, %v3459_v47  ;;  %v3737_v35 = vshrl.u32 %v4778_v37, 16  ;;  %v3987_v25 = vld [vmem:[#allocation2 + $0x90] sm:$0x1e] }
 0x259   :  { %v3729_v33 = vor.u32 %v3728_v51, %v3725_v24  ;;  %v3716_v5 = vrot.slane %v3715_v16, 4  ;;  %v3734_v18 = vrot.slane %v3732_v54, 5  ;;  %v3740_v13 = vshll.u32 %v4778_v37, 16  ;;  %v3988_v24 = vld [vmem:[#allocation2 + $0x98] sm:$0x1e] }
 0x25a   :  { %5255 = vmatmul.mubr.bf16.gmra.mrb[8].mxu1 %v4787_v40  ;;  %v3746_v21 = vshll.u32 %v4779_v8, 16  ;;  %v3739_v19 = vrot.slane %v3737_v35, 4  ;;  %v3751_v27 = vshrl.u32 %v4780_v0, 16  ;;  %v3754_v44 = vshll.u32 %v4780_v0, 16 }
 0x25b   :  { %v3730_v4 = vrot.slane %v3729_v33, 4  ;;  %5307 = vmatpush3.bf16.msra.mxu1 %v6777_v17  ;;  %v3721_v31 = vsel %vm6488_vm1, %v3716_v5, %v3720_v55  ;;  %v3742_v42 = vrot.slane %v3740_v13, 5  ;;  %v3760_v32 = vshll.u32 %v4781_v6, 16 }
 0x25c   :  { %v4822_v57 = vcombine.low %v3985_v41, %v3985_v41  ;;  %5300 = vmatprep.subr.bf16.mxu1 %v6789_v50  ;;  %v3753_v10 = vrot.slane %v3751_v27, 4  ;;  %v3756_v9 = vrot.slane %v3754_v44, 5  ;;  %v4823_v43 = vcombine.high %v3985_v41, %v3985_v41 }
 0x25d   :  { %v3735_v23 = vsel %vm6488_vm1, %v3730_v4, %v3734_v18  ;;  %v3743_v17 = vor.u32 %v3742_v42, %v3739_v19  ;;  %v4824_v60 = vcombine.low %v3986_v48, %v3986_v48  ;;  %v3748_v34 = vrot.slane %v3746_v21, 5 }
 0x25e   :  { %v4788_v7 = vcombine.low %v3721_v31, %v3735_v23  ;;  %v3757_v37 = vor.u32 %v3756_v9, %v3753_v10  ;;  %v3762_v46 = vrot.slane %v3760_v32, 5  ;;  %v4825_v62 = vcombine.high %v3986_v48, %v3986_v48 }
 0x25f   :  { %5308 = vmatpush3.bf16.msra.mxu1 %v6789_v50  ;;  %v3744_v49 = vrot.slane %v3743_v17, 4  ;;  %v4842_v52 = vrot.slane %v4822_v57, 9  ;;  %v4119_v56 = vrot.slane %v4823_v43, 5  ;;  %v4843_v11 = vrot.slane %v4824_v60, 9 }
 0x260   :  { %5258 = vmatprep.mubr.bf16.mxu1 %v4788_v7  ;;  %5301 = vmatprep.subr.bf16.mxu1 %v6799_v29  ;;  %v3758_v54 = vrot.slane %v3757_v37, 4  ;;  %v4123_v47 = vrot.slane %v4825_v62, 5  ;;  %v4826_v55 = vcombine.low %v3987_v25, %v3987_v25  ;;  %v4827_v33 = vcombine.high %v3987_v25, %v3987_v25 }
 0x261   :  { %v3749_v14 = vsel %vm6488_vm1, %v3744_v49, %v3748_v34  ;;  %v4120_v16 = vsel %vm6606_vm13, %v4842_v52, %v4119_v56  ;;  %v4828_v0 = vcombine.low %v3988_v24, %v3988_v24  ;;  %v4829_v6 = vcombine.high %v3988_v24, %v3988_v24 }
 0x262   :  { %v3763_v51 = vsel %vm6488_vm1, %v3758_v54, %v3762_v46  ;;  %v4124_v50 = vsel %vm6606_vm13, %v4843_v11, %v4123_v47  ;;  %v4844_v35 = vrot.slane %v4826_v55, 9  ;;  %v4127_v41 = vrot.slane %v4827_v33, 5 }
 0x263   :  { %5309 = vmatpush3.bf16.msra.mxu1 %v6799_v29  ;;  %v4789_v40 = vcombine.low %v3749_v14, %v3763_v51  ;;  %v4852_v8 = vcombine.low %v4120_v16, %v4124_v50  ;;  %v4845_v36 = vrot.slane %v4828_v0, 9  ;;  %v4131_v5 = vrot.slane %v4829_v6, 5  ;;  %v5944_v50 = vld [vmem:[%s7034_s3] sm:$0xff]  ;;  %s6001_s3 = smov [#allocation6]  }
 0x264   :  { %v4128_v18 = vsel %vm6606_vm13, %v4844_v35, %v4127_v41  ;;  %v4344_v47 = vsub.s32 1, %v6447_v22  ;;  %v813_v25 = vsub.s32 2, %v6447_v22  ;;  %v4396_v16 = vsub.s32 4, %v6447_v22  ;;  %s4451_s11 = sshll.u32 %s6001_s3, 4  ;;  %s4452_s11 = int_to_ptr.vmem [resolvable:$true] %s4451_s11 }
 0x265   :  { %5259 = vmatmul.mubr.bf16.gmra.mrb[12].mxu1 %v4789_v40  ;;  %v4132_v29 = vsel %vm6606_vm13, %v4845_v36, %v4131_v5  ;;  %s5967_s23 = scalar_lea.vmem %s4452_s11, 2048  ;;  %p5972_p9 = scmp.lt.s32.totalorder %s4452_s11, %s4452_s11 }
 0x266   :  { %5290 = vmatprep.mubr.bf16.mxu1 %v4852_v8  ;;  %v4853_v13 = vcombine.low %v4128_v18, %v4132_v29  ;;  %v6929_v40 = vrot.slane %v5944_v50, %v4344_v47  ;;  %v6932_v8 = vrot.slane %v5944_v50, %v813_v25  ;;  %p5968_p8 = scmp.ne.s32.totalorder %s4452_s11, %s5967_s23  ;;  %p5973_p10 = scmp.lt.s32.totalorder %s5967_s23, %s5967_s23 }
 0x268   :  { %v817_v18 = vadd.f32 %v6932_v8, %v6473_v45  ;;  %v815_v22 = vadd.f32 %v6932_v8, %v6459_v30  ;;  %v816_v45 = vadd.f32 %v6932_v8, %v6463_v39  ;;  %p5974_p11 = por %p5973_p10, %p5972_p9 }
 0x26a   :  { %p5975_p12 = pnand %p5974_p11, %p5968_p8 }
 0x271   :  { %5291 = vmatmul.mubr.bf16.vlgmr.msra.gmra.mrb[12].mxu1 %v4853_v13  ;;  %v6937_v13 = vrot.slane %v5944_v50, %v4396_v16 }
 0x2dc   :  { %v5088_v21 = vpop.f32.mrb[32].mxu0 }
 0x2dd   :  { %v1984_v4 = vpop.f32.mrb[33].mxu0 }
 0x2de   :  { %v5089_v19 = vpop.f32.mrb[34].mxu0 }
 0x2df   :  { %v1987_v27 = vpop.f32.mrb[35].mxu0 }
 0x2e7   :  { %v6888_v44 = vpop.f32.mrb[36].mxu0 }
 0x2e8   :  { %v6890_v48 = vpop.f32.mrb[37].mxu0 }
 0x2e9   :  { %v6892_v31 = vpop.f32.mrb[38].mxu0 }
 0x2ea   :  { %v6894_v42 = vpop.f32.mrb[39].mxu0 }
 0x2f3   :  { %v6896_v32 = vpop.f32.mrb[40].mxu0 }
 0x2f4   :  { %v6898_v57 = vpop.f32.mrb[41].mxu0 }
 0x2f5   :  { %v6900_v38 = vpop.f32.mrb[42].mxu0 }
 0x2f6   :  { %v6902_v23 = vpop.f32.mrb[43].mxu0 }
 0x2fc   :  { %v6904_v10 = vpop.f32.mrb[44].mxu0 }
 0x2fd   :  { %v6906_v9 = vpop.f32.mrb[45].mxu0 }
 0x2fe   :  { %v6908_v43 = vpop.f32.mrb[46].mxu0 }
 0x2ff   :  { %v6910_v7 = vpop.f32.mrb[47].mxu0 }
 0x304   :  { %v5280_v17 = vpop.f32.mrb[48].mxu0 }
 0x305   :  { %v4263_v60 = vpop.f32.mrb[49].mxu0 }
 0x306   :  { %v5281_v34 = vpop.f32.mrb[50].mxu0 }
 0x307   :  { %v4266_v37 = vpop.f32.mrb[51].mxu0 }
 0x30c   :  { %v5284_v46 = vpop.f32.mrb[52].mxu0 }
 0x30d   :  { %v4279_v62 = vpop.f32.mrb[53].mxu0 }
 0x30e   :  { %v6912_v49 = vpop.f32.mrb[54].mxu0 }
 0x30f   :  { %v6914_v52 = vpop.f32.mrb[55].mxu0 }
 0x314   :  { %v6916_v56 = vpop.f32.mrb[56].mxu0 }
 0x315   :  { %v6918_v11 = vpop.f32.mrb[57].mxu0 }
 0x316   :  { %v6920_v54 = vpop.f32.mrb[58].mxu0 }
 0x317   :  { %v6924_v14 = vpop.f32.mrb[59].mxu0 }
 0x319   :  { %v5248_v24 = vpop.f32.mrb[0].mxu1 }
 0x31a   :  { %v5310_v51 = vadd.f32 %v5248_v24, %v5088_v21  ;;  %v3894_v55 = vpop.f32.mrb[1].mxu1 }
 0x31b   :  { %v5312_v33 = vadd.f32 %v3894_v55, %v1984_v4  ;;  %v5249_v0 = vpop.f32.mrb[2].mxu1 }
 0x31c   :  { %v5311_v6 = vadd.f32 %v5310_v51, %v5280_v17  ;;  %v5314_v35 = vadd.f32 %v5249_v0, %v5089_v19  ;;  %v3897_v41 = vpop.f32.mrb[3].mxu1  ;;  %v818_v19 = vadd.f32 %v6932_v8, %v6479_v63 }
 0x31d   :  { %v5313_v36 = vadd.f32 %v5312_v33, %v4263_v60  ;;  %v5316_v5 = vadd.f32 %v3897_v41, %v1987_v27 }
 0x31e   :  { %v4348_v29 = vadd.f32 %v5311_v6, %v6929_v40  ;;  %v5315_v21 = vadd.f32 %v5314_v35, %v5281_v34 }
 0x31f   :  { %v4346_v47 = vadd.f32 %v5313_v36, %v6929_v40  ;;  %v5317_v4 = vadd.f32 %v5316_v5, %v4266_v37 }
 0x320   :  { %v4364_v17 = vadd.f32 %v4348_v29, %v817_v18  ;;  %v4349_v27 = vadd.f32 %v5315_v21, %v6929_v40  ;;  %v821_v21 = vadd.f32 %v6932_v8, %v6512_v59  ;;  %v820_v59 = vadd.f32 %v6932_v8, %v6498_v26 }
 0x321   :  { %v4362_v60 = vadd.f32 %v4346_v47, %v815_v22  ;;  %v4347_v25 = vadd.f32 %v5317_v4, %v6929_v40  ;;  %v5252_v51 = vpop.f32.mrb[4].mxu1  ;;  %v819_v47 = vadd.f32 %v6932_v8, %v6485_v20 }
 0x322   :  { %vm4380_vm11 = vcmp.gt.f32.partialorder %v4364_v17, 0.0  ;;  %v4400_v34 = vmul.f32 %v6937_v13, %v4364_v17  ;;  %v4365_v24 = vadd.f32 %v4349_v27, %v818_v19  ;;  %v5318_v16 = vadd.f32 %v5252_v51, %v6888_v44  ;;  %v3910_v55 = vpop.f32.mrb[5].mxu1 }
 0x323   :  { %vm4378_vm1 = vcmp.gt.f32.partialorder %v4362_v60, 0.0  ;;  %v4398_v30 = vmul.f32 %v6937_v13, %v4362_v60  ;;  %v4363_v37 = vadd.f32 %v4347_v25, %v816_v45  ;;  %v5320_v0 = vadd.f32 %v3910_v55, %v6890_v48  ;;  %v5253_v6 = vpop.f32.mrb[6].mxu1 }
 0x324   :  { %v4416_v50 = vsel %vm4380_vm11, %v4364_v17, %v4400_v34  ;;  %vm4381_vm3 = vcmp.gt.f32.partialorder %v4365_v24, 0.0  ;;  %v4401_v63 = vmul.f32 %v6937_v13, %v4365_v24  ;;  %v5319_v41 = vadd.f32 %v5318_v16, %v5284_v46  ;;  %v3913_v5 = vpop.f32.mrb[7].mxu1 }
 0x325   :  { %4432 = vst [vmem:[#allocation6 + $0x10] sm:$0xff] %v4416_v50  ;;  %v4414_v39 = vsel %vm4378_vm1, %v4362_v60, %v4398_v30  ;;  %vm4379_vm4 = vcmp.gt.f32.partialorder %v4363_v37, 0.0  ;;  %v4399_v33 = vmul.f32 %v6937_v13, %v4363_v37  ;;  %v5322_v36 = vadd.f32 %v5253_v6, %v6892_v31 }
 0x326   :  { %4430 = vst [vmem:[#allocation6] sm:$0xff] %v4414_v39  ;;  %v4417_v35 = vsel %vm4381_vm3, %v4365_v24, %v4401_v63  ;;  %v5321_v29 = vadd.f32 %v5320_v0, %v4279_v62  ;;  %v5324_v44 = vadd.f32 %v3913_v5, %v6894_v42  ;;  %v4352_v22 = vadd.f32 %v5319_v41, %v6929_v40 }
 0x327   :  { %4433 = vst [vmem:[#allocation6 + $0x18] sm:$0xff] %v4417_v35  ;;  %v4415_v18 = vsel %vm4379_vm4, %v4363_v37, %v4399_v33  ;;  %v5323_v48 = vadd.f32 %v5322_v36, %v6912_v49  ;;  %v822_v62 = vadd.f32 %v6932_v8, %v6518_v12  ;;  %v823_v6 = vadd.f32 %v6932_v8, %v6533_v53 }
 0x328   :  { %4431 = vst [vmem:[#allocation6 + $0x8] sm:$0xff] %v4415_v18  ;;  %v4350_v46 = vadd.f32 %v5321_v29, %v6929_v40  ;;  %v5325_v31 = vadd.f32 %v5324_v44, %v6914_v52  ;;  %v4368_v4 = vadd.f32 %v4352_v22, %v821_v21  ;;  %v826_v35 = vadd.f32 %v6932_v8, %v6579_v2 }
 0x329   :  { %v4353_v42 = vadd.f32 %v5323_v48, %v6929_v40 }
 0x32a   :  { %v4366_v19 = vadd.f32 %v4350_v46, %v819_v47  ;;  %v4351_v17 = vadd.f32 %v5325_v31, %v6929_v40  ;;  %vm4384_vm5 = vcmp.gt.f32.partialorder %v4368_v4, 0.0  ;;  %v4404_v49 = vmul.f32 %v6937_v13, %v4368_v4 }
 0x32b   :  { %v4369_v20 = vadd.f32 %v4353_v42, %v822_v62  ;;  %v829_v62 = vadd.f32 %v6932_v8, %v6632_v61  ;;  %v828_v61 = vadd.f32 %v6932_v8, %v6613_v15 }
 0x32c   :  { %vm4382_vm6 = vcmp.gt.f32.partialorder %v4366_v19, 0.0  ;;  %v4402_v27 = vmul.f32 %v6937_v13, %v4366_v19  ;;  %v4367_v52 = vadd.f32 %v4351_v17, %v820_v59  ;;  %v4420_v45 = vsel %vm4384_vm5, %v4368_v4, %v4404_v49 }
 0x32d   :  { %vm4385_vm7 = vcmp.gt.f32.partialorder %v4369_v20, 0.0  ;;  %v4405_v12 = vmul.f32 %v6937_v13, %v4369_v20  ;;  %v5256_v60 = vpop.f32.mrb[8].mxu1  ;;  %4436 = vst [vmem:[#allocation6 + $0x30] sm:$0xff] %v4420_v45 }
 0x32e   :  { %v4418_v25 = vsel %vm4382_vm6, %v4366_v19, %v4402_v27  ;;  %vm4383_vm8 = vcmp.gt.f32.partialorder %v4367_v52, 0.0  ;;  %v4403_v26 = vmul.f32 %v6937_v13, %v4367_v52  ;;  %v5326_v34 = vadd.f32 %v5256_v60, %v6896_v32  ;;  %v3926_v24 = vpop.f32.mrb[9].mxu1 }
 0x32f   :  { %4434 = vst [vmem:[#allocation6 + $0x20] sm:$0xff] %v4418_v25  ;;  %v4421_v30 = vsel %vm4385_vm7, %v4369_v20, %v4405_v12  ;;  %v5328_v37 = vadd.f32 %v3926_v24, %v6898_v57  ;;  %v5257_v51 = vpop.f32.mrb[10].mxu1  ;;  %v825_v32 = vadd.f32 %v6932_v8, %v6570_v58  ;;  %v824_v58 = vadd.f32 %v6932_v8, %v6541_v1 }
 0x330   :  { %4437 = vst [vmem:[#allocation6 + $0x38] sm:$0xff] %v4421_v30  ;;  %v4419_v50 = vsel %vm4383_vm8, %v4367_v52, %v4403_v26  ;;  %v5327_v63 = vadd.f32 %v5326_v34, %v6916_v56  ;;  %v5330_v16 = vadd.f32 %v5257_v51, %v6900_v38  ;;  %v3929_v55 = vpop.f32.mrb[11].mxu1  ;;  %v827_v19 = vadd.f32 %v6932_v8, %v6602_v28 }
 0x331   :  { %4435 = vst [vmem:[#allocation6 + $0x28] sm:$0xff] %v4419_v50  ;;  %v5329_v39 = vadd.f32 %v5328_v37, %v6918_v11  ;;  %v5332_v33 = vadd.f32 %v3929_v55, %v6902_v23 }
 0x332   :  { %v4356_v0 = vadd.f32 %v5327_v63, %v6929_v40  ;;  %v5331_v57 = vadd.f32 %v5330_v16, %v6920_v54 }
 0x333   :  { %v4354_v56 = vadd.f32 %v5329_v39, %v6929_v40  ;;  %v5333_v38 = vadd.f32 %v5332_v33, %v6924_v14 }
 0x334   :  { %v4372_v11 = vadd.f32 %v4356_v0, %v825_v32  ;;  %v4357_v23 = vadd.f32 %v5331_v57, %v6929_v40 }
 0x335   :  { %v4370_v41 = vadd.f32 %v4354_v56, %v823_v6  ;;  %v4355_v36 = vadd.f32 %v5333_v38, %v6929_v40 }
 0x336   :  { %vm4388_vm9 = vcmp.gt.f32.partialorder %v4372_v11, 0.0  ;;  %v4408_v54 = vmul.f32 %v6937_v13, %v4372_v11  ;;  %v4373_v53 = vadd.f32 %v4357_v23, %v826_v35 }
 0x337   :  { %vm4386_vm10 = vcmp.gt.f32.partialorder %v4370_v41, 0.0  ;;  %v4406_v5 = vmul.f32 %v6937_v13, %v4370_v41  ;;  %v4371_v14 = vadd.f32 %v4355_v36, %v824_v58 }
 0x338   :  { %v4424_v18 = vsel %vm4388_vm9, %v4372_v11, %v4408_v54  ;;  %vm4389_vm12 = vcmp.gt.f32.partialorder %v4373_v53, 0.0  ;;  %v4409_v2 = vmul.f32 %v6937_v13, %v4373_v53 }
 0x339   :  { %4440 = vst [vmem:[#allocation6 + $0x50] sm:$0xff] %v4424_v18  ;;  %v4422_v29 = vsel %vm4386_vm10, %v4370_v41, %v4406_v5  ;;  %vm4387_vm13 = vcmp.gt.f32.partialorder %v4371_v14, 0.0  ;;  %v4407_v1 = vmul.f32 %v6937_v13, %v4371_v14 }
 0x33a   :  { %4438 = vst [vmem:[#allocation6 + $0x40] sm:$0xff] %v4422_v29  ;;  %v4425_v44 = vsel %vm4389_vm12, %v4373_v53, %v4409_v2 }
 0x33b   :  { %4441 = vst [vmem:[#allocation6 + $0x58] sm:$0xff] %v4425_v44  ;;  %v4423_v21 = vsel %vm4387_vm13, %v4371_v14, %v4407_v1 }
 0x33c   :  { %4439 = vst [vmem:[#allocation6 + $0x48] sm:$0xff] %v4423_v21 }
 0x344   :  { %v5292_v22 = vpop.f32.mrb[12].mxu1 }
 0x345   :  { %v5334_v48 = vadd.f32 %v5292_v22, %v6904_v10  ;;  %v4311_v47 = vpop.f32.mrb[13].mxu1  ;;  %v830_v10 = vadd.f32 %v6932_v8, %v6638_v3 }
 0x346   :  { %v5335_v46 = vadd.f32 %v4311_v47, %v6906_v9  ;;  %v5293_v31 = vpop.f32.mrb[14].mxu1 }
 0x347   :  { %v4360_v4 = vadd.f32 %v5334_v48, %v6929_v40  ;;  %v5336_v42 = vadd.f32 %v5293_v31, %v6908_v43  ;;  %v4314_v59 = vpop.f32.mrb[15].mxu1 }
 0x348   :  { %v4358_v17 = vadd.f32 %v5335_v46, %v6929_v40  ;;  %v5337_v49 = vadd.f32 %v4314_v59, %v6910_v7 }
 0x349   :  { %v4376_v9 = vadd.f32 %v4360_v4, %v829_v62  ;;  %v4361_v20 = vadd.f32 %v5336_v42, %v6929_v40 }
 0x34a   :  { %v4374_v27 = vadd.f32 %v4358_v17, %v827_v19  ;;  %v4359_v43 = vadd.f32 %v5337_v49, %v6929_v40 }
 0x34b   :  { %vm4392_vm14 = vcmp.gt.f32.partialorder %v4376_v9, 0.0  ;;  %v4412_v52 = vmul.f32 %v6937_v13, %v4376_v9  ;;  %v4377_v28 = vadd.f32 %v4361_v20, %v830_v10 }
 0x34c   :  { %vm4390_vm15 = vcmp.gt.f32.partialorder %v4374_v27, 0.0  ;;  %v4410_v45 = vmul.f32 %v6937_v13, %v4374_v27  ;;  %v4375_v7 = vadd.f32 %v4359_v43, %v828_v61 }
 0x34d   :  { %v4428_v3 = vsel %vm4392_vm14, %v4376_v9, %v4412_v52  ;;  %vm4393_vm0 = vcmp.gt.f32.partialorder %v4377_v28, 0.0  ;;  %v4413_v12 = vmul.f32 %v6937_v13, %v4377_v28 }
 0x34e   :  { %4444 = vst [vmem:[#allocation6 + $0x70] sm:$0xff] %v4428_v3  ;;  %v4426_v60 = vsel %vm4390_vm15, %v4374_v27, %v4410_v45  ;;  %vm4391_vm2 = vcmp.gt.f32.partialorder %v4375_v7, 0.0  ;;  %v4411_v15 = vmul.f32 %v6937_v13, %v4375_v7 }
 0x34f   :  { %4442 = vst [vmem:[#allocation6 + $0x60] sm:$0xff] %v4426_v60  ;;  %v4429_v40 = vsel %vm4393_vm0, %v4377_v28, %v4413_v12 }
 0x350   :  { %4445 = vst [vmem:[#allocation6 + $0x78] sm:$0xff] %v4429_v40  ;;  %v4427_v8 = vsel %vm4391_vm2, %v4375_v7, %v4411_v15 }
 0x351   :  { %4443 = vst [vmem:[#allocation6 + $0x68] sm:$0xff] %v4427_v8 }
 0x352   :  { %5978 = shalt.err (!%p5975_p12)
}
 0x353   :  { %s5979_s27 = scalar_lea.hbm %s7035_s4, 2048 }
 0x354   :  { %p5980_p13 = scmp.ne.s32.totalorder %s7035_s4, %s5979_s27  ;;  %p5983_p0 = scmp.lt.u32.totalorder %s5979_s27, %s7035_s4 }
 0x356   :  { %p5985_p1 = pnand %p5983_p0, %p5980_p13 }
 0x358   :  { %5988 = shalt.err (!%p5985_p1)
}
 0x359   :  { %s6002_s6 = smov 128  }
 0x35a   :  { %4457 = dma.vmem_to_hbm [thread:$0]  %s4452_s11, 2048, %s7035_s4, [#allocation5], %s6002_s6, %s6002_s6, %s5998_s7  }
 0x35b   :  { %5991 = dma.done.wait [#allocation5], 2048  }
 0x35c   :  { %5992 = vsyncadd [#allocation5], 4294965248 }
 0x35d   :  { %4461 = vsyncpa [#allocation4], 1 }
 0x35e   :  { %4462 = vsyncpa [#allocation5], 1 }

</bundles_post_ra>
